<compile_context>
chip_gen: v6e
topology: v6e:2x2x1
jax: 0.10.0
libtpu: 0.0.40
codegen_flags: <defaults>
</compile_context>

<pallas_src>
import functools
import math

import jax
import jax.numpy as jnp
from jax.experimental import pallas as pl
from jax.experimental.pallas import tpu as pltpu

MODEL_DIM = 64
N_HEADS = 4
HEAD_DIM = MODEL_DIM // N_HEADS
HIDDEN_DIM = 128
N_ENCODERS = 4
LN_EPS = 1e-5
FC_PAD = 128            # lane-dense fc_out width (sliced back to num_classes outside)


def _layernorm(x, gamma, beta):
    mu = jnp.mean(x, axis=-1, keepdims=True)
    var = jnp.mean((x - mu) ** 2, axis=-1, keepdims=True)
    return (x - mu) * jax.lax.rsqrt(var + LN_EPS) * gamma + beta


# ----------------------------------------------------------------------------
# Single fused kernel: embedding -> 4 encoder layers -> mean(dim=1) -> fc_out
# ----------------------------------------------------------------------------
def fused_transformer_kernel(src_ref, bias_ref, pool_ref, emb_ref,
                             wqkv_ref, bqkv_ref, wo_ref, bo_ref,
                             ln1g_ref, ln1b_ref, w1_ref, b1_ref,
                             w2_ref, b2_ref, ln2g_ref, ln2b_ref,
                             wfc_ref, bfc_ref, out_ref):
    t = src_ref.shape[0]
    vocab = emb_ref.shape[0]

    # ------------- embedding: gather-free one-hot matmul (bf16 to MXU) -------------
    ids = src_ref[...]                                              # (T, 1) int32
    vocab_iota = jax.lax.broadcasted_iota(jnp.int32, (t, vocab), 1)
    onehot = (ids == vocab_iota).astype(jnp.bfloat16)               # (T, V)
    x = jnp.dot(onehot, emb_ref[...],
                preferred_element_type=jnp.float32)                 # (T, D) f32

    attn_bias = bias_ref[...]                                       # (T, T) f32 constant

    # ------------------- encoder layers, statically unrolled ----------------
    for layer in range(N_ENCODERS):
        # Fused QKV: ONE lane-dense matmul (1/sqrt(head_dim) folded into q columns).
        qkv = jnp.dot(x.astype(jnp.bfloat16), wqkv_ref[layer],
                      preferred_element_type=jnp.float32) + bqkv_ref[layer]   # (T, 3D)
        q = qkv[:, :MODEL_DIM]                                       # (T, D)
        kt = qkv[:, MODEL_DIM:2 * MODEL_DIM].T                       # (D, T): 1 transpose/layer
        v = qkv[:, 2 * MODEL_DIM:]                                   # (T, D)

        heads = []
        for h in range(N_HEADS):
            lo, hi = h * HEAD_DIM, (h + 1) * HEAD_DIM
            qh = q[:, lo:hi].astype(jnp.bfloat16)                    # (T, Hd)
            kth = kt[lo:hi, :].astype(jnp.bfloat16)                  # (Hd, T)
            vh = v[:, lo:hi].astype(jnp.bfloat16)                    # (T, Hd)
            s = jnp.dot(qh, kth,
                        preferred_element_type=jnp.float32) + attn_bias       # (T, T) f32
            s = s - jnp.max(s, axis=-1, keepdims=True)
            p = jnp.exp(s)
            p = p * pl.reciprocal(jnp.sum(p, axis=-1, keepdims=True), approx=True)
            heads.append(jnp.dot(p.astype(jnp.bfloat16), vh,
                                 preferred_element_type=jnp.float32))          # (T, Hd)

        # Collapse heads BEFORE the output projection -> one (T,D)@(D,D) matmul.
        oh = jnp.concatenate(heads, axis=1)                          # (T, D) f32
        attn = jnp.dot(oh.astype(jnp.bfloat16), wo_ref[layer],
                       preferred_element_type=jnp.float32) + bo_ref[layer]
        x = _layernorm(x + attn, ln1g_ref[layer], ln1b_ref[layer])   # post-norm, f32

        # Feed-forward (ReLU), post-norm; elementwise math stays f32.
        h1 = jnp.maximum(
            jnp.dot(x.astype(jnp.bfloat16), w1_ref[layer],
                    preferred_element_type=jnp.float32) + b1_ref[layer], 0.0)
        ff = jnp.dot(h1.astype(jnp.bfloat16), w2_ref[layer],
                     preferred_element_type=jnp.float32) + b2_ref[layer]
        x = _layernorm(x + ff, ln2g_ref[layer], ln2b_ref[layer])

    # --------- mean over torch dim=1 (a1 axis) as a constant pooling matmul ---------
    pooled = jnp.dot(pool_ref[...], x.astype(jnp.bfloat16),
                     preferred_element_type=jnp.float32)             # (A0, D)

    # --------------------------- fc_out (lane-dense) ------------------------
    out_ref[...] = (jnp.dot(pooled.astype(jnp.bfloat16), wfc_ref[...],
                            preferred_element_type=jnp.float32) + bfc_ref[...])


def _full_spec(shape):
    nd = len(shape)
    return pl.BlockSpec(shape, lambda i, _nd=nd: (0,) * _nd)


@functools.partial(jax.jit, static_argnames=("num_classes",))
def transformer_forward(src, params, num_classes):
    (emb, wqkv, bqkv, wo, bo, ln1g, ln1b,
     w1, b1, w2, b2, ln2g, ln2b, wfc, bfc) = params
    a0, a1 = src.shape
    t = a0 * a1
    src_flat = src.reshape(t, 1).astype(jnp.int32)   # row-major: token t = a0*A1 + a1

    # Constant block-diagonal additive attention bias: attend within the same a1 column.
    col = jnp.arange(t, dtype=jnp.int32) % a1
    attn_bias = jnp.where(col[:, None] == col[None, :],
                          jnp.float32(0.0), jnp.float32(-1e30))
    # Constant pooling matrix: mean over the a1 (torch dim=1) axis.
    row = jnp.arange(t, dtype=jnp.int32) // a1
    pool = ((row[None, :] == jnp.arange(a0, dtype=jnp.int32)[:, None])
            .astype(jnp.float32) / a1).astype(jnp.bfloat16)

    inputs = (src_flat, attn_bias, pool, emb, wqkv, bqkv, wo, bo,
              ln1g, ln1b, w1, b1, w2, b2, ln2g, ln2b, wfc, bfc)

    # Single fused invocation.  Batching several src matrices would add a leading
    # "parallel" grid axis here (lights up v7x's 2nd TensorCore); a single forward
    # has no independent work to split, so keep grid=(1,).
    out_pad = pl.pallas_call(
        fused_transformer_kernel,
        out_shape=jax.ShapeDtypeStruct((a0, FC_PAD), jnp.float32),
        grid=(1,),
        in_specs=[_full_spec(a.shape) for a in inputs],
        out_specs=_full_spec((a0, FC_PAD)),
        compiler_params=pltpu.CompilerParams(dimension_semantics=("arbitrary",)),
    )(*inputs)
    return out_pad[:, :num_classes]


# ----------------------------------------------------------------------------
# Deterministic parameter construction (synthetic weights; no checkpoint load)
# ----------------------------------------------------------------------------
def init_params(key, vocab, num_classes):
    keys = iter(jax.random.split(key, 2 + N_ENCODERS * 4))
    s = 0.02
    scale = 1.0 / math.sqrt(HEAD_DIM)

    emb = (s * jax.random.normal(next(keys), (vocab, MODEL_DIM), jnp.float32)
           ).astype(jnp.bfloat16)

    names = ("wqkv", "bqkv", "wo", "bo", "ln1g", "ln1b",
             "w1", "b1", "w2", "b2", "ln2g", "ln2b")
    stacks = {n: [] for n in names}

    for _ in range(N_ENCODERS):
        # TODO(synk): real nn.MultiheadAttention stores in_proj_weight as (3D, D);
        # transpose + re-fold the 1/sqrt(head_dim) scale if ever loading a checkpoint.
        wqkv = s * jax.random.normal(next(keys), (MODEL_DIM, 3 * MODEL_DIM), jnp.float32)
        wqkv = wqkv.at[:, :MODEL_DIM].multiply(scale)    # fold softmax scale into q cols
        bqkv = jnp.zeros((1, 3 * MODEL_DIM), jnp.float32)  # q part pre-scaled (zero anyway)
        wo = s * jax.random.normal(next(keys), (MODEL_DIM, MODEL_DIM), jnp.float32)
        bo = jnp.zeros((1, MODEL_DIM), jnp.float32)
        ln1g = jnp.ones((1, MODEL_DIM), jnp.float32)
        ln1b = jnp.zeros((1, MODEL_DIM), jnp.float32)
        w1 = s * jax.random.normal(next(keys), (MODEL_DIM, HIDDEN_DIM), jnp.float32)
        b1 = jnp.zeros((1, HIDDEN_DIM), jnp.float32)
        w2 = s * jax.random.normal(next(keys), (HIDDEN_DIM, MODEL_DIM), jnp.float32)
        b2 = jnp.zeros((1, MODEL_DIM), jnp.float32)
        ln2g = jnp.ones((1, MODEL_DIM), jnp.float32)
        ln2b = jnp.zeros((1, MODEL_DIM), jnp.float32)
        for n, v_ in zip(names, (wqkv, bqkv, wo, bo, ln1g, ln1b,
                                 w1, b1, w2, b2, ln2g, ln2b)):
            stacks[n].append(v_)

    st = {n: jnp.stack(v) for n, v in stacks.items()}
    # Matmul weights live in bf16 (MXU operands); biases / LN params stay f32.
    for n in ("wqkv", "wo", "w1", "w2"):
        st[n] = st[n].astype(jnp.bfloat16)

    wfc = s * jax.random.normal(next(keys), (MODEL_DIM, num_classes), jnp.float32)
    wfc_pad = (jnp.zeros((MODEL_DIM, FC_PAD), jnp.float32)
               .at[:, :num_classes].set(wfc)).astype(jnp.bfloat16)
    bfc_pad = jnp.zeros((1, FC_PAD), jnp.float32)

    return (emb, st["wqkv"], st["bqkv"], st["wo"], st["bo"],
            st["ln1g"], st["ln1b"], st["w1"], st["b1"], st["w2"], st["b2"],
            st["ln2g"], st["ln2b"], wfc_pad, bfc_pad)


if __name__ == "__main__":
    key = jax.random.PRNGKey(0)
    vocab, num_classes = 50, 10
    A0, A1 = 2, 8  # src shape: A0 = attn sequence axis, A1 = attn batch axis

    k_src, k_par = jax.random.split(key)
    src = jax.random.randint(k_src, (A0, A1), 0, vocab, dtype=jnp.int32)
    params = init_params(k_par, vocab, num_classes)

    out = transformer_forward(src, params, num_classes)
    out = jax.block_until_ready(out)

    assert out.shape == (A0, num_classes), out.shape
    assert out.dtype == jnp.float32
    assert bool(jnp.all(jnp.isfinite(out)))
    print("KERNEL_OK")
</pallas_src>

<mosaic_0001>
module attributes {stable_mosaic.version = 11 : i64} {
  func.func @fused_transformer_kernel(%arg0: i32, %arg1: memref<16x1xi32, #tpu.memory_space<vmem>>, %arg2: memref<16x16xf32, #tpu.memory_space<vmem>>, %arg3: memref<2x16xbf16, #tpu.memory_space<vmem>>, %arg4: memref<50x64xbf16, #tpu.memory_space<vmem>>, %arg5: memref<4x64x192xbf16, #tpu.memory_space<vmem>>, %arg6: memref<4x1x192xf32, #tpu.memory_space<vmem>>, %arg7: memref<4x64x64xbf16, #tpu.memory_space<vmem>>, %arg8: memref<4x1x64xf32, #tpu.memory_space<vmem>>, %arg9: memref<4x1x64xf32, #tpu.memory_space<vmem>>, %arg10: memref<4x1x64xf32, #tpu.memory_space<vmem>>, %arg11: memref<4x64x128xbf16, #tpu.memory_space<vmem>>, %arg12: memref<4x1x128xf32, #tpu.memory_space<vmem>>, %arg13: memref<4x128x64xbf16, #tpu.memory_space<vmem>>, %arg14: memref<4x1x64xf32, #tpu.memory_space<vmem>>, %arg15: memref<4x1x64xf32, #tpu.memory_space<vmem>>, %arg16: memref<4x1x64xf32, #tpu.memory_space<vmem>>, %arg17: memref<64x128xbf16, #tpu.memory_space<vmem>>, %arg18: memref<1x128xf32, #tpu.memory_space<vmem>>, %arg19: memref<2x128xf32, #tpu.memory_space<vmem>>) attributes {dimension_semantics = [#tpu.dimension_semantics<arbitrary>], iteration_bounds = array<i64: 1>, scalar_prefetch = 0 : i64, scratch_operands = 0 : i64, tpu.core_type = #tpu.core_type<tc>, window_params = [{pipeline_mode = #tpu.pipeline_mode<synchronous>, transform_indices = @transform_0, window_bounds = array<i64: 16, 1>}, {pipeline_mode = #tpu.pipeline_mode<synchronous>, transform_indices = @transform_1, window_bounds = array<i64: 16, 16>}, {pipeline_mode = #tpu.pipeline_mode<synchronous>, transform_indices = @transform_2, window_bounds = array<i64: 2, 16>}, {pipeline_mode = #tpu.pipeline_mode<synchronous>, transform_indices = @transform_3, window_bounds = array<i64: 50, 64>}, {pipeline_mode = #tpu.pipeline_mode<synchronous>, transform_indices = @transform_4, window_bounds = array<i64: 4, 64, 192>}, {pipeline_mode = #tpu.pipeline_mode<synchronous>, transform_indices = @transform_5, window_bounds = array<i64: 4, 1, 192>}, {pipeline_mode = #tpu.pipeline_mode<synchronous>, transform_indices = @transform_6, window_bounds = array<i64: 4, 64, 64>}, {pipeline_mode = #tpu.pipeline_mode<synchronous>, transform_indices = @transform_7, window_bounds = array<i64: 4, 1, 64>}, {pipeline_mode = #tpu.pipeline_mode<synchronous>, transform_indices = @transform_8, window_bounds = array<i64: 4, 1, 64>}, {pipeline_mode = #tpu.pipeline_mode<synchronous>, transform_indices = @transform_9, window_bounds = array<i64: 4, 1, 64>}, {pipeline_mode = #tpu.pipeline_mode<synchronous>, transform_indices = @transform_10, window_bounds = array<i64: 4, 64, 128>}, {pipeline_mode = #tpu.pipeline_mode<synchronous>, transform_indices = @transform_11, window_bounds = array<i64: 4, 1, 128>}, {pipeline_mode = #tpu.pipeline_mode<synchronous>, transform_indices = @transform_12, window_bounds = array<i64: 4, 128, 64>}, {pipeline_mode = #tpu.pipeline_mode<synchronous>, transform_indices = @transform_13, window_bounds = array<i64: 4, 1, 64>}, {pipeline_mode = #tpu.pipeline_mode<synchronous>, transform_indices = @transform_14, window_bounds = array<i64: 4, 1, 64>}, {pipeline_mode = #tpu.pipeline_mode<synchronous>, transform_indices = @transform_15, window_bounds = array<i64: 4, 1, 64>}, {pipeline_mode = #tpu.pipeline_mode<synchronous>, transform_indices = @transform_16, window_bounds = array<i64: 64, 128>}, {pipeline_mode = #tpu.pipeline_mode<synchronous>, transform_indices = @transform_17, window_bounds = array<i64: 1, 128>}, {pipeline_mode = #tpu.pipeline_mode<synchronous>, transform_indices = @transform_18, window_bounds = array<i64: 2, 128>}]} {
    %c0 = arith.constant 0 : index
    %c0_0 = arith.constant 0 : index
    %0 = vector.load %arg1[%c0, %c0_0] : memref<16x1xi32, #tpu.memory_space<vmem>>, vector<16x1xi32>
    %1 = tpu.iota {dimensions = array<i32: 1>} : vector<16x50xi32>
    %2 = vector.broadcast %0 : vector<16x1xi32> to vector<16x50xi32>
    %3 = arith.cmpi eq, %2, %1 : vector<16x50xi32>
    %4 = arith.extui %3 : vector<16x50xi1> to vector<16x50xi32>
    %5 = arith.sitofp %4 : vector<16x50xi32> to vector<16x50xf32>
    %6 = arith.truncf %5 : vector<16x50xf32> to vector<16x50xbf16>
    %c0_1 = arith.constant 0 : index
    %c0_2 = arith.constant 0 : index
    %7 = vector.load %arg4[%c0_1, %c0_2] : memref<50x64xbf16, #tpu.memory_space<vmem>>, vector<50x64xbf16>
    %cst = arith.constant dense<0.000000e+00> : vector<16x64xf32>
    %8 = tpu.matmul %6, %7, %cst {dimension_numbers = #tpu.dot_dimension_numbers<[1], [0], [0], [1], [0, 0, 1, 1], [], []>} : vector<16x50xbf16>, vector<50x64xbf16>, vector<16x64xf32> -> vector<16x64xf32>
    %c0_3 = arith.constant 0 : index
    %c0_4 = arith.constant 0 : index
    %9 = vector.load %arg2[%c0_3, %c0_4] : memref<16x16xf32, #tpu.memory_space<vmem>>, vector<16x16xf32>
    %10 = arith.truncf %8 : vector<16x64xf32> to vector<16x64xbf16>
    %c0_5 = arith.constant 0 : index
    %c0_6 = arith.constant 0 : index
    %c0_7 = arith.constant 0 : index
    %11 = vector.load %arg5[%c0_5, %c0_6, %c0_7] : memref<4x64x192xbf16, #tpu.memory_space<vmem>>, vector<1x64x192xbf16>
    %12 = vector.shape_cast %11 : vector<1x64x192xbf16> to vector<64x192xbf16>
    %cst_8 = arith.constant dense<0.000000e+00> : vector<16x192xf32>
    %13 = tpu.matmul %10, %12, %cst_8 {dimension_numbers = #tpu.dot_dimension_numbers<[1], [0], [0], [1], [0, 0, 1, 1], [], []>} : vector<16x64xbf16>, vector<64x192xbf16>, vector<16x192xf32> -> vector<16x192xf32>
    %c0_9 = arith.constant 0 : index
    %c0_10 = arith.constant 0 : index
    %c0_11 = arith.constant 0 : index
    %14 = vector.load %arg6[%c0_9, %c0_10, %c0_11] : memref<4x1x192xf32, #tpu.memory_space<vmem>>, vector<1x1x192xf32>
    %15 = vector.shape_cast %14 : vector<1x1x192xf32> to vector<1x192xf32>
    %16 = vector.broadcast %15 : vector<1x192xf32> to vector<16x192xf32>
    %17 = arith.addf %13, %16 : vector<16x192xf32>
    %18 = vector.extract_strided_slice %17 {offsets = [0, 0], sizes = [16, 64], strides = [1, 1]} : vector<16x192xf32> to vector<16x64xf32>
    %19 = vector.extract_strided_slice %17 {offsets = [0, 64], sizes = [16, 64], strides = [1, 1]} : vector<16x192xf32> to vector<16x64xf32>
    %20 = tpu.transpose %19, [1, 0] : vector<16x64xf32> -> vector<64x16xf32>
    %21 = vector.extract_strided_slice %17 {offsets = [0, 128], sizes = [16, 64], strides = [1, 1]} : vector<16x192xf32> to vector<16x64xf32>
    %22 = vector.extract_strided_slice %18 {offsets = [0, 0], sizes = [16, 16], strides = [1, 1]} : vector<16x64xf32> to vector<16x16xf32>
    %23 = arith.truncf %22 : vector<16x16xf32> to vector<16x16xbf16>
    %24 = vector.extract_strided_slice %20 {offsets = [0, 0], sizes = [16, 16], strides = [1, 1]} : vector<64x16xf32> to vector<16x16xf32>
    %25 = arith.truncf %24 : vector<16x16xf32> to vector<16x16xbf16>
    %26 = vector.extract_strided_slice %21 {offsets = [0, 0], sizes = [16, 16], strides = [1, 1]} : vector<16x64xf32> to vector<16x16xf32>
    %27 = arith.truncf %26 : vector<16x16xf32> to vector<16x16xbf16>
    %cst_12 = arith.constant dense<0.000000e+00> : vector<16x16xf32>
    %28 = tpu.matmul %23, %25, %cst_12 {dimension_numbers = #tpu.dot_dimension_numbers<[1], [0], [0], [1], [0, 0, 1, 1], [], []>} : vector<16x16xbf16>, vector<16x16xbf16>, vector<16x16xf32> -> vector<16x16xf32>
    %29 = arith.addf %28, %9 : vector<16x16xf32>
    %cst_13 = arith.constant dense<0xFF800000> : vector<16xf32>
    %30 = vector.multi_reduction <maximumf>, %29, %cst_13 [1] : vector<16x16xf32> to vector<16xf32>
    %31 = vector.shape_cast %30 : vector<16xf32> to vector<16x1xf32>
    %32 = vector.broadcast %31 : vector<16x1xf32> to vector<16x16xf32>
    %33 = arith.subf %29, %32 : vector<16x16xf32>
    %34 = math.exp %33 : vector<16x16xf32>
    %cst_14 = arith.constant dense<0.000000e+00> : vector<16xf32>
    %35 = vector.multi_reduction <add>, %34, %cst_14 [1] : vector<16x16xf32> to vector<16xf32>
    %36 = vector.shape_cast %35 : vector<16xf32> to vector<16x1xf32>
    %37 = tpu.reciprocal %36 {approx = true} : vector<16x1xf32> -> vector<16x1xf32>
    %38 = vector.broadcast %37 : vector<16x1xf32> to vector<16x16xf32>
    %39 = arith.mulf %34, %38 : vector<16x16xf32>
    %40 = arith.truncf %39 : vector<16x16xf32> to vector<16x16xbf16>
    %cst_15 = arith.constant dense<0.000000e+00> : vector<16x16xf32>
    %41 = tpu.matmul %40, %27, %cst_15 {dimension_numbers = #tpu.dot_dimension_numbers<[1], [0], [0], [1], [0, 0, 1, 1], [], []>} : vector<16x16xbf16>, vector<16x16xbf16>, vector<16x16xf32> -> vector<16x16xf32>
    %42 = vector.extract_strided_slice %18 {offsets = [0, 16], sizes = [16, 16], strides = [1, 1]} : vector<16x64xf32> to vector<16x16xf32>
    %43 = arith.truncf %42 : vector<16x16xf32> to vector<16x16xbf16>
    %44 = vector.extract_strided_slice %20 {offsets = [16, 0], sizes = [16, 16], strides = [1, 1]} : vector<64x16xf32> to vector<16x16xf32>
    %45 = arith.truncf %44 : vector<16x16xf32> to vector<16x16xbf16>
    %46 = vector.extract_strided_slice %21 {offsets = [0, 16], sizes = [16, 16], strides = [1, 1]} : vector<16x64xf32> to vector<16x16xf32>
    %47 = arith.truncf %46 : vector<16x16xf32> to vector<16x16xbf16>
    %cst_16 = arith.constant dense<0.000000e+00> : vector<16x16xf32>
    %48 = tpu.matmul %43, %45, %cst_16 {dimension_numbers = #tpu.dot_dimension_numbers<[1], [0], [0], [1], [0, 0, 1, 1], [], []>} : vector<16x16xbf16>, vector<16x16xbf16>, vector<16x16xf32> -> vector<16x16xf32>
    %49 = arith.addf %48, %9 : vector<16x16xf32>
    %cst_17 = arith.constant dense<0xFF800000> : vector<16xf32>
    %50 = vector.multi_reduction <maximumf>, %49, %cst_17 [1] : vector<16x16xf32> to vector<16xf32>
    %51 = vector.shape_cast %50 : vector<16xf32> to vector<16x1xf32>
    %52 = vector.broadcast %51 : vector<16x1xf32> to vector<16x16xf32>
    %53 = arith.subf %49, %52 : vector<16x16xf32>
    %54 = math.exp %53 : vector<16x16xf32>
    %cst_18 = arith.constant dense<0.000000e+00> : vector<16xf32>
    %55 = vector.multi_reduction <add>, %54, %cst_18 [1] : vector<16x16xf32> to vector<16xf32>
    %56 = vector.shape_cast %55 : vector<16xf32> to vector<16x1xf32>
    %57 = tpu.reciprocal %56 {approx = true} : vector<16x1xf32> -> vector<16x1xf32>
    %58 = vector.broadcast %57 : vector<16x1xf32> to vector<16x16xf32>
    %59 = arith.mulf %54, %58 : vector<16x16xf32>
    %60 = arith.truncf %59 : vector<16x16xf32> to vector<16x16xbf16>
    %cst_19 = arith.constant dense<0.000000e+00> : vector<16x16xf32>
    %61 = tpu.matmul %60, %47, %cst_19 {dimension_numbers = #tpu.dot_dimension_numbers<[1], [0], [0], [1], [0, 0, 1, 1], [], []>} : vector<16x16xbf16>, vector<16x16xbf16>, vector<16x16xf32> -> vector<16x16xf32>
    %62 = vector.extract_strided_slice %18 {offsets = [0, 32], sizes = [16, 16], strides = [1, 1]} : vector<16x64xf32> to vector<16x16xf32>
    %63 = arith.truncf %62 : vector<16x16xf32> to vector<16x16xbf16>
    %64 = vector.extract_strided_slice %20 {offsets = [32, 0], sizes = [16, 16], strides = [1, 1]} : vector<64x16xf32> to vector<16x16xf32>
    %65 = arith.truncf %64 : vector<16x16xf32> to vector<16x16xbf16>
    %66 = vector.extract_strided_slice %21 {offsets = [0, 32], sizes = [16, 16], strides = [1, 1]} : vector<16x64xf32> to vector<16x16xf32>
    %67 = arith.truncf %66 : vector<16x16xf32> to vector<16x16xbf16>
    %cst_20 = arith.constant dense<0.000000e+00> : vector<16x16xf32>
    %68 = tpu.matmul %63, %65, %cst_20 {dimension_numbers = #tpu.dot_dimension_numbers<[1], [0], [0], [1], [0, 0, 1, 1], [], []>} : vector<16x16xbf16>, vector<16x16xbf16>, vector<16x16xf32> -> vector<16x16xf32>
    %69 = arith.addf %68, %9 : vector<16x16xf32>
    %cst_21 = arith.constant dense<0xFF800000> : vector<16xf32>
    %70 = vector.multi_reduction <maximumf>, %69, %cst_21 [1] : vector<16x16xf32> to vector<16xf32>
    %71 = vector.shape_cast %70 : vector<16xf32> to vector<16x1xf32>
    %72 = vector.broadcast %71 : vector<16x1xf32> to vector<16x16xf32>
    %73 = arith.subf %69, %72 : vector<16x16xf32>
    %74 = math.exp %73 : vector<16x16xf32>
    %cst_22 = arith.constant dense<0.000000e+00> : vector<16xf32>
    %75 = vector.multi_reduction <add>, %74, %cst_22 [1] : vector<16x16xf32> to vector<16xf32>
    %76 = vector.shape_cast %75 : vector<16xf32> to vector<16x1xf32>
    %77 = tpu.reciprocal %76 {approx = true} : vector<16x1xf32> -> vector<16x1xf32>
    %78 = vector.broadcast %77 : vector<16x1xf32> to vector<16x16xf32>
    %79 = arith.mulf %74, %78 : vector<16x16xf32>
    %80 = arith.truncf %79 : vector<16x16xf32> to vector<16x16xbf16>
    %cst_23 = arith.constant dense<0.000000e+00> : vector<16x16xf32>
    %81 = tpu.matmul %80, %67, %cst_23 {dimension_numbers = #tpu.dot_dimension_numbers<[1], [0], [0], [1], [0, 0, 1, 1], [], []>} : vector<16x16xbf16>, vector<16x16xbf16>, vector<16x16xf32> -> vector<16x16xf32>
    %82 = vector.extract_strided_slice %18 {offsets = [0, 48], sizes = [16, 16], strides = [1, 1]} : vector<16x64xf32> to vector<16x16xf32>
    %83 = arith.truncf %82 : vector<16x16xf32> to vector<16x16xbf16>
    %84 = vector.extract_strided_slice %20 {offsets = [48, 0], sizes = [16, 16], strides = [1, 1]} : vector<64x16xf32> to vector<16x16xf32>
    %85 = arith.truncf %84 : vector<16x16xf32> to vector<16x16xbf16>
    %86 = vector.extract_strided_slice %21 {offsets = [0, 48], sizes = [16, 16], strides = [1, 1]} : vector<16x64xf32> to vector<16x16xf32>
    %87 = arith.truncf %86 : vector<16x16xf32> to vector<16x16xbf16>
    %cst_24 = arith.constant dense<0.000000e+00> : vector<16x16xf32>
    %88 = tpu.matmul %83, %85, %cst_24 {dimension_numbers = #tpu.dot_dimension_numbers<[1], [0], [0], [1], [0, 0, 1, 1], [], []>} : vector<16x16xbf16>, vector<16x16xbf16>, vector<16x16xf32> -> vector<16x16xf32>
    %89 = arith.addf %88, %9 : vector<16x16xf32>
    %cst_25 = arith.constant dense<0xFF800000> : vector<16xf32>
    %90 = vector.multi_reduction <maximumf>, %89, %cst_25 [1] : vector<16x16xf32> to vector<16xf32>
    %91 = vector.shape_cast %90 : vector<16xf32> to vector<16x1xf32>
    %92 = vector.broadcast %91 : vector<16x1xf32> to vector<16x16xf32>
    %93 = arith.subf %89, %92 : vector<16x16xf32>
    %94 = math.exp %93 : vector<16x16xf32>
    %cst_26 = arith.constant dense<0.000000e+00> : vector<16xf32>
    %95 = vector.multi_reduction <add>, %94, %cst_26 [1] : vector<16x16xf32> to vector<16xf32>
    %96 = vector.shape_cast %95 : vector<16xf32> to vector<16x1xf32>
    %97 = tpu.reciprocal %96 {approx = true} : vector<16x1xf32> -> vector<16x1xf32>
    %98 = vector.broadcast %97 : vector<16x1xf32> to vector<16x16xf32>
    %99 = arith.mulf %94, %98 : vector<16x16xf32>
    %100 = arith.truncf %99 : vector<16x16xf32> to vector<16x16xbf16>
    %cst_27 = arith.constant dense<0.000000e+00> : vector<16x16xf32>
    %101 = tpu.matmul %100, %87, %cst_27 {dimension_numbers = #tpu.dot_dimension_numbers<[1], [0], [0], [1], [0, 0, 1, 1], [], []>} : vector<16x16xbf16>, vector<16x16xbf16>, vector<16x16xf32> -> vector<16x16xf32>
    %102 = tpu.concatenate %41, %61, %81, %101 in 1 : vector<16x16xf32>, vector<16x16xf32>, vector<16x16xf32>, vector<16x16xf32> -> vector<16x64xf32>
    %103 = arith.truncf %102 : vector<16x64xf32> to vector<16x64xbf16>
    %c0_28 = arith.constant 0 : index
    %c0_29 = arith.constant 0 : index
    %c0_30 = arith.constant 0 : index
    %104 = vector.load %arg7[%c0_28, %c0_29, %c0_30] : memref<4x64x64xbf16, #tpu.memory_space<vmem>>, vector<1x64x64xbf16>
    %105 = vector.shape_cast %104 : vector<1x64x64xbf16> to vector<64x64xbf16>
    %cst_31 = arith.constant dense<0.000000e+00> : vector<16x64xf32>
    %106 = tpu.matmul %103, %105, %cst_31 {dimension_numbers = #tpu.dot_dimension_numbers<[1], [0], [0], [1], [0, 0, 1, 1], [], []>} : vector<16x64xbf16>, vector<64x64xbf16>, vector<16x64xf32> -> vector<16x64xf32>
    %c0_32 = arith.constant 0 : index
    %c0_33 = arith.constant 0 : index
    %c0_34 = arith.constant 0 : index
    %107 = vector.load %arg8[%c0_32, %c0_33, %c0_34] : memref<4x1x64xf32, #tpu.memory_space<vmem>>, vector<1x1x64xf32>
    %108 = vector.shape_cast %107 : vector<1x1x64xf32> to vector<1x64xf32>
    %109 = vector.broadcast %108 : vector<1x64xf32> to vector<16x64xf32>
    %110 = arith.addf %106, %109 : vector<16x64xf32>
    %111 = arith.addf %8, %110 : vector<16x64xf32>
    %c0_35 = arith.constant 0 : index
    %c0_36 = arith.constant 0 : index
    %c0_37 = arith.constant 0 : index
    %112 = vector.load %arg9[%c0_35, %c0_36, %c0_37] : memref<4x1x64xf32, #tpu.memory_space<vmem>>, vector<1x1x64xf32>
    %113 = vector.shape_cast %112 : vector<1x1x64xf32> to vector<1x64xf32>
    %c0_38 = arith.constant 0 : index
    %c0_39 = arith.constant 0 : index
    %c0_40 = arith.constant 0 : index
    %114 = vector.load %arg10[%c0_38, %c0_39, %c0_40] : memref<4x1x64xf32, #tpu.memory_space<vmem>>, vector<1x1x64xf32>
    %115 = vector.shape_cast %114 : vector<1x1x64xf32> to vector<1x64xf32>
    %cst_41 = arith.constant dense<0.000000e+00> : vector<16xf32>
    %116 = vector.multi_reduction <add>, %111, %cst_41 [1] : vector<16x64xf32> to vector<16xf32>
    %117 = vector.shape_cast %116 : vector<16xf32> to vector<16x1xf32>
    %cst_42 = arith.constant 6.400000e+01 : f32
    %118 = vector.broadcast %cst_42 : f32 to vector<16x1xf32>
    %119 = arith.divf %117, %118 : vector<16x1xf32>
    %120 = vector.broadcast %119 : vector<16x1xf32> to vector<16x64xf32>
    %121 = arith.subf %111, %120 : vector<16x64xf32>
    %122 = arith.mulf %121, %121 : vector<16x64xf32>
    %cst_43 = arith.constant dense<0.000000e+00> : vector<16xf32>
    %123 = vector.multi_reduction <add>, %122, %cst_43 [1] : vector<16x64xf32> to vector<16xf32>
    %124 = vector.shape_cast %123 : vector<16xf32> to vector<16x1xf32>
    %cst_44 = arith.constant 6.400000e+01 : f32
    %125 = vector.broadcast %cst_44 : f32 to vector<16x1xf32>
    %126 = arith.divf %124, %125 : vector<16x1xf32>
    %127 = vector.broadcast %119 : vector<16x1xf32> to vector<16x64xf32>
    %128 = arith.subf %111, %127 : vector<16x64xf32>
    %cst_45 = arith.constant 9.99999974E-6 : f32
    %129 = vector.broadcast %cst_45 : f32 to vector<16x1xf32>
    %130 = arith.addf %126, %129 : vector<16x1xf32>
    %131 = math.rsqrt %130 : vector<16x1xf32>
    %132 = vector.broadcast %131 : vector<16x1xf32> to vector<16x64xf32>
    %133 = arith.mulf %128, %132 : vector<16x64xf32>
    %134 = vector.broadcast %113 : vector<1x64xf32> to vector<16x64xf32>
    %135 = arith.mulf %133, %134 : vector<16x64xf32>
    %136 = vector.broadcast %115 : vector<1x64xf32> to vector<16x64xf32>
    %137 = arith.addf %135, %136 : vector<16x64xf32>
    %138 = arith.truncf %137 : vector<16x64xf32> to vector<16x64xbf16>
    %c0_46 = arith.constant 0 : index
    %c0_47 = arith.constant 0 : index
    %c0_48 = arith.constant 0 : index
    %139 = vector.load %arg11[%c0_46, %c0_47, %c0_48] : memref<4x64x128xbf16, #tpu.memory_space<vmem>>, vector<1x64x128xbf16>
    %140 = vector.shape_cast %139 : vector<1x64x128xbf16> to vector<64x128xbf16>
    %cst_49 = arith.constant dense<0.000000e+00> : vector<16x128xf32>
    %141 = tpu.matmul %138, %140, %cst_49 {dimension_numbers = #tpu.dot_dimension_numbers<[1], [0], [0], [1], [0, 0, 1, 1], [], []>} : vector<16x64xbf16>, vector<64x128xbf16>, vector<16x128xf32> -> vector<16x128xf32>
    %c0_50 = arith.constant 0 : index
    %c0_51 = arith.constant 0 : index
    %c0_52 = arith.constant 0 : index
    %142 = vector.load %arg12[%c0_50, %c0_51, %c0_52] : memref<4x1x128xf32, #tpu.memory_space<vmem>>, vector<1x1x128xf32>
    %143 = vector.shape_cast %142 : vector<1x1x128xf32> to vector<1x128xf32>
    %144 = vector.broadcast %143 : vector<1x128xf32> to vector<16x128xf32>
    %145 = arith.addf %141, %144 : vector<16x128xf32>
    %cst_53 = arith.constant 0.000000e+00 : f32
    %146 = vector.broadcast %cst_53 : f32 to vector<16x128xf32>
    %147 = arith.maximumf %145, %146 : vector<16x128xf32>
    %148 = arith.truncf %147 : vector<16x128xf32> to vector<16x128xbf16>
    %c0_54 = arith.constant 0 : index
    %c0_55 = arith.constant 0 : index
    %c0_56 = arith.constant 0 : index
    %149 = vector.load %arg13[%c0_54, %c0_55, %c0_56] : memref<4x128x64xbf16, #tpu.memory_space<vmem>>, vector<1x128x64xbf16>
    %150 = vector.shape_cast %149 : vector<1x128x64xbf16> to vector<128x64xbf16>
    %cst_57 = arith.constant dense<0.000000e+00> : vector<16x64xf32>
    %151 = tpu.matmul %148, %150, %cst_57 {dimension_numbers = #tpu.dot_dimension_numbers<[1], [0], [0], [1], [0, 0, 1, 1], [], []>} : vector<16x128xbf16>, vector<128x64xbf16>, vector<16x64xf32> -> vector<16x64xf32>
    %c0_58 = arith.constant 0 : index
    %c0_59 = arith.constant 0 : index
    %c0_60 = arith.constant 0 : index
    %152 = vector.load %arg14[%c0_58, %c0_59, %c0_60] : memref<4x1x64xf32, #tpu.memory_space<vmem>>, vector<1x1x64xf32>
    %153 = vector.shape_cast %152 : vector<1x1x64xf32> to vector<1x64xf32>
    %154 = vector.broadcast %153 : vector<1x64xf32> to vector<16x64xf32>
    %155 = arith.addf %151, %154 : vector<16x64xf32>
    %156 = arith.addf %137, %155 : vector<16x64xf32>
    %c0_61 = arith.constant 0 : index
    %c0_62 = arith.constant 0 : index
    %c0_63 = arith.constant 0 : index
    %157 = vector.load %arg15[%c0_61, %c0_62, %c0_63] : memref<4x1x64xf32, #tpu.memory_space<vmem>>, vector<1x1x64xf32>
    %158 = vector.shape_cast %157 : vector<1x1x64xf32> to vector<1x64xf32>
    %c0_64 = arith.constant 0 : index
    %c0_65 = arith.constant 0 : index
    %c0_66 = arith.constant 0 : index
    %159 = vector.load %arg16[%c0_64, %c0_65, %c0_66] : memref<4x1x64xf32, #tpu.memory_space<vmem>>, vector<1x1x64xf32>
    %160 = vector.shape_cast %159 : vector<1x1x64xf32> to vector<1x64xf32>
    %cst_67 = arith.constant dense<0.000000e+00> : vector<16xf32>
    %161 = vector.multi_reduction <add>, %156, %cst_67 [1] : vector<16x64xf32> to vector<16xf32>
    %162 = vector.shape_cast %161 : vector<16xf32> to vector<16x1xf32>
    %cst_68 = arith.constant 6.400000e+01 : f32
    %163 = vector.broadcast %cst_68 : f32 to vector<16x1xf32>
    %164 = arith.divf %162, %163 : vector<16x1xf32>
    %165 = vector.broadcast %164 : vector<16x1xf32> to vector<16x64xf32>
    %166 = arith.subf %156, %165 : vector<16x64xf32>
    %167 = arith.mulf %166, %166 : vector<16x64xf32>
    %cst_69 = arith.constant dense<0.000000e+00> : vector<16xf32>
    %168 = vector.multi_reduction <add>, %167, %cst_69 [1] : vector<16x64xf32> to vector<16xf32>
    %169 = vector.shape_cast %168 : vector<16xf32> to vector<16x1xf32>
    %cst_70 = arith.constant 6.400000e+01 : f32
    %170 = vector.broadcast %cst_70 : f32 to vector<16x1xf32>
    %171 = arith.divf %169, %170 : vector<16x1xf32>
    %172 = vector.broadcast %164 : vector<16x1xf32> to vector<16x64xf32>
    %173 = arith.subf %156, %172 : vector<16x64xf32>
    %cst_71 = arith.constant 9.99999974E-6 : f32
    %174 = vector.broadcast %cst_71 : f32 to vector<16x1xf32>
    %175 = arith.addf %171, %174 : vector<16x1xf32>
    %176 = math.rsqrt %175 : vector<16x1xf32>
    %177 = vector.broadcast %176 : vector<16x1xf32> to vector<16x64xf32>
    %178 = arith.mulf %173, %177 : vector<16x64xf32>
    %179 = vector.broadcast %158 : vector<1x64xf32> to vector<16x64xf32>
    %180 = arith.mulf %178, %179 : vector<16x64xf32>
    %181 = vector.broadcast %160 : vector<1x64xf32> to vector<16x64xf32>
    %182 = arith.addf %180, %181 : vector<16x64xf32>
    %183 = arith.truncf %182 : vector<16x64xf32> to vector<16x64xbf16>
    %c1 = arith.constant 1 : index
    %c0_72 = arith.constant 0 : index
    %c0_73 = arith.constant 0 : index
    %184 = vector.load %arg5[%c1, %c0_72, %c0_73] : memref<4x64x192xbf16, #tpu.memory_space<vmem>>, vector<1x64x192xbf16>
    %185 = vector.shape_cast %184 : vector<1x64x192xbf16> to vector<64x192xbf16>
    %cst_74 = arith.constant dense<0.000000e+00> : vector<16x192xf32>
    %186 = tpu.matmul %183, %185, %cst_74 {dimension_numbers = #tpu.dot_dimension_numbers<[1], [0], [0], [1], [0, 0, 1, 1], [], []>} : vector<16x64xbf16>, vector<64x192xbf16>, vector<16x192xf32> -> vector<16x192xf32>
    %c1_75 = arith.constant 1 : index
    %c0_76 = arith.constant 0 : index
    %c0_77 = arith.constant 0 : index
    %187 = vector.load %arg6[%c1_75, %c0_76, %c0_77] : memref<4x1x192xf32, #tpu.memory_space<vmem>>, vector<1x1x192xf32>
    %188 = vector.shape_cast %187 : vector<1x1x192xf32> to vector<1x192xf32>
    %189 = vector.broadcast %188 : vector<1x192xf32> to vector<16x192xf32>
    %190 = arith.addf %186, %189 : vector<16x192xf32>
    %191 = vector.extract_strided_slice %190 {offsets = [0, 0], sizes = [16, 64], strides = [1, 1]} : vector<16x192xf32> to vector<16x64xf32>
    %192 = vector.extract_strided_slice %190 {offsets = [0, 64], sizes = [16, 64], strides = [1, 1]} : vector<16x192xf32> to vector<16x64xf32>
    %193 = tpu.transpose %192, [1, 0] : vector<16x64xf32> -> vector<64x16xf32>
    %194 = vector.extract_strided_slice %190 {offsets = [0, 128], sizes = [16, 64], strides = [1, 1]} : vector<16x192xf32> to vector<16x64xf32>
    %195 = vector.extract_strided_slice %191 {offsets = [0, 0], sizes = [16, 16], strides = [1, 1]} : vector<16x64xf32> to vector<16x16xf32>
    %196 = arith.truncf %195 : vector<16x16xf32> to vector<16x16xbf16>
    %197 = vector.extract_strided_slice %193 {offsets = [0, 0], sizes = [16, 16], strides = [1, 1]} : vector<64x16xf32> to vector<16x16xf32>
    %198 = arith.truncf %197 : vector<16x16xf32> to vector<16x16xbf16>
    %199 = vector.extract_strided_slice %194 {offsets = [0, 0], sizes = [16, 16], strides = [1, 1]} : vector<16x64xf32> to vector<16x16xf32>
    %200 = arith.truncf %199 : vector<16x16xf32> to vector<16x16xbf16>
    %cst_78 = arith.constant dense<0.000000e+00> : vector<16x16xf32>
    %201 = tpu.matmul %196, %198, %cst_78 {dimension_numbers = #tpu.dot_dimension_numbers<[1], [0], [0], [1], [0, 0, 1, 1], [], []>} : vector<16x16xbf16>, vector<16x16xbf16>, vector<16x16xf32> -> vector<16x16xf32>
    %202 = arith.addf %201, %9 : vector<16x16xf32>
    %cst_79 = arith.constant dense<0xFF800000> : vector<16xf32>
    %203 = vector.multi_reduction <maximumf>, %202, %cst_79 [1] : vector<16x16xf32> to vector<16xf32>
    %204 = vector.shape_cast %203 : vector<16xf32> to vector<16x1xf32>
    %205 = vector.broadcast %204 : vector<16x1xf32> to vector<16x16xf32>
    %206 = arith.subf %202, %205 : vector<16x16xf32>
    %207 = math.exp %206 : vector<16x16xf32>
    %cst_80 = arith.constant dense<0.000000e+00> : vector<16xf32>
    %208 = vector.multi_reduction <add>, %207, %cst_80 [1] : vector<16x16xf32> to vector<16xf32>
    %209 = vector.shape_cast %208 : vector<16xf32> to vector<16x1xf32>
    %210 = tpu.reciprocal %209 {approx = true} : vector<16x1xf32> -> vector<16x1xf32>
    %211 = vector.broadcast %210 : vector<16x1xf32> to vector<16x16xf32>
    %212 = arith.mulf %207, %211 : vector<16x16xf32>
    %213 = arith.truncf %212 : vector<16x16xf32> to vector<16x16xbf16>
    %cst_81 = arith.constant dense<0.000000e+00> : vector<16x16xf32>
    %214 = tpu.matmul %213, %200, %cst_81 {dimension_numbers = #tpu.dot_dimension_numbers<[1], [0], [0], [1], [0, 0, 1, 1], [], []>} : vector<16x16xbf16>, vector<16x16xbf16>, vector<16x16xf32> -> vector<16x16xf32>
    %215 = vector.extract_strided_slice %191 {offsets = [0, 16], sizes = [16, 16], strides = [1, 1]} : vector<16x64xf32> to vector<16x16xf32>
    %216 = arith.truncf %215 : vector<16x16xf32> to vector<16x16xbf16>
    %217 = vector.extract_strided_slice %193 {offsets = [16, 0], sizes = [16, 16], strides = [1, 1]} : vector<64x16xf32> to vector<16x16xf32>
    %218 = arith.truncf %217 : vector<16x16xf32> to vector<16x16xbf16>
    %219 = vector.extract_strided_slice %194 {offsets = [0, 16], sizes = [16, 16], strides = [1, 1]} : vector<16x64xf32> to vector<16x16xf32>
    %220 = arith.truncf %219 : vector<16x16xf32> to vector<16x16xbf16>
    %cst_82 = arith.constant dense<0.000000e+00> : vector<16x16xf32>
    %221 = tpu.matmul %216, %218, %cst_82 {dimension_numbers = #tpu.dot_dimension_numbers<[1], [0], [0], [1], [0, 0, 1, 1], [], []>} : vector<16x16xbf16>, vector<16x16xbf16>, vector<16x16xf32> -> vector<16x16xf32>
    %222 = arith.addf %221, %9 : vector<16x16xf32>
    %cst_83 = arith.constant dense<0xFF800000> : vector<16xf32>
    %223 = vector.multi_reduction <maximumf>, %222, %cst_83 [1] : vector<16x16xf32> to vector<16xf32>
    %224 = vector.shape_cast %223 : vector<16xf32> to vector<16x1xf32>
    %225 = vector.broadcast %224 : vector<16x1xf32> to vector<16x16xf32>
    %226 = arith.subf %222, %225 : vector<16x16xf32>
    %227 = math.exp %226 : vector<16x16xf32>
    %cst_84 = arith.constant dense<0.000000e+00> : vector<16xf32>
    %228 = vector.multi_reduction <add>, %227, %cst_84 [1] : vector<16x16xf32> to vector<16xf32>
    %229 = vector.shape_cast %228 : vector<16xf32> to vector<16x1xf32>
    %230 = tpu.reciprocal %229 {approx = true} : vector<16x1xf32> -> vector<16x1xf32>
    %231 = vector.broadcast %230 : vector<16x1xf32> to vector<16x16xf32>
    %232 = arith.mulf %227, %231 : vector<16x16xf32>
    %233 = arith.truncf %232 : vector<16x16xf32> to vector<16x16xbf16>
    %cst_85 = arith.constant dense<0.000000e+00> : vector<16x16xf32>
    %234 = tpu.matmul %233, %220, %cst_85 {dimension_numbers = #tpu.dot_dimension_numbers<[1], [0], [0], [1], [0, 0, 1, 1], [], []>} : vector<16x16xbf16>, vector<16x16xbf16>, vector<16x16xf32> -> vector<16x16xf32>
    %235 = vector.extract_strided_slice %191 {offsets = [0, 32], sizes = [16, 16], strides = [1, 1]} : vector<16x64xf32> to vector<16x16xf32>
    %236 = arith.truncf %235 : vector<16x16xf32> to vector<16x16xbf16>
    %237 = vector.extract_strided_slice %193 {offsets = [32, 0], sizes = [16, 16], strides = [1, 1]} : vector<64x16xf32> to vector<16x16xf32>
    %238 = arith.truncf %237 : vector<16x16xf32> to vector<16x16xbf16>
    %239 = vector.extract_strided_slice %194 {offsets = [0, 32], sizes = [16, 16], strides = [1, 1]} : vector<16x64xf32> to vector<16x16xf32>
    %240 = arith.truncf %239 : vector<16x16xf32> to vector<16x16xbf16>
    %cst_86 = arith.constant dense<0.000000e+00> : vector<16x16xf32>
    %241 = tpu.matmul %236, %238, %cst_86 {dimension_numbers = #tpu.dot_dimension_numbers<[1], [0], [0], [1], [0, 0, 1, 1], [], []>} : vector<16x16xbf16>, vector<16x16xbf16>, vector<16x16xf32> -> vector<16x16xf32>
    %242 = arith.addf %241, %9 : vector<16x16xf32>
    %cst_87 = arith.constant dense<0xFF800000> : vector<16xf32>
    %243 = vector.multi_reduction <maximumf>, %242, %cst_87 [1] : vector<16x16xf32> to vector<16xf32>
    %244 = vector.shape_cast %243 : vector<16xf32> to vector<16x1xf32>
    %245 = vector.broadcast %244 : vector<16x1xf32> to vector<16x16xf32>
    %246 = arith.subf %242, %245 : vector<16x16xf32>
    %247 = math.exp %246 : vector<16x16xf32>
    %cst_88 = arith.constant dense<0.000000e+00> : vector<16xf32>
    %248 = vector.multi_reduction <add>, %247, %cst_88 [1] : vector<16x16xf32> to vector<16xf32>
    %249 = vector.shape_cast %248 : vector<16xf32> to vector<16x1xf32>
    %250 = tpu.reciprocal %249 {approx = true} : vector<16x1xf32> -> vector<16x1xf32>
    %251 = vector.broadcast %250 : vector<16x1xf32> to vector<16x16xf32>
    %252 = arith.mulf %247, %251 : vector<16x16xf32>
    %253 = arith.truncf %252 : vector<16x16xf32> to vector<16x16xbf16>
    %cst_89 = arith.constant dense<0.000000e+00> : vector<16x16xf32>
    %254 = tpu.matmul %253, %240, %cst_89 {dimension_numbers = #tpu.dot_dimension_numbers<[1], [0], [0], [1], [0, 0, 1, 1], [], []>} : vector<16x16xbf16>, vector<16x16xbf16>, vector<16x16xf32> -> vector<16x16xf32>
    %255 = vector.extract_strided_slice %191 {offsets = [0, 48], sizes = [16, 16], strides = [1, 1]} : vector<16x64xf32> to vector<16x16xf32>
    %256 = arith.truncf %255 : vector<16x16xf32> to vector<16x16xbf16>
    %257 = vector.extract_strided_slice %193 {offsets = [48, 0], sizes = [16, 16], strides = [1, 1]} : vector<64x16xf32> to vector<16x16xf32>
    %258 = arith.truncf %257 : vector<16x16xf32> to vector<16x16xbf16>
    %259 = vector.extract_strided_slice %194 {offsets = [0, 48], sizes = [16, 16], strides = [1, 1]} : vector<16x64xf32> to vector<16x16xf32>
    %260 = arith.truncf %259 : vector<16x16xf32> to vector<16x16xbf16>
    %cst_90 = arith.constant dense<0.000000e+00> : vector<16x16xf32>
    %261 = tpu.matmul %256, %258, %cst_90 {dimension_numbers = #tpu.dot_dimension_numbers<[1], [0], [0], [1], [0, 0, 1, 1], [], []>} : vector<16x16xbf16>, vector<16x16xbf16>, vector<16x16xf32> -> vector<16x16xf32>
    %262 = arith.addf %261, %9 : vector<16x16xf32>
    %cst_91 = arith.constant dense<0xFF800000> : vector<16xf32>
    %263 = vector.multi_reduction <maximumf>, %262, %cst_91 [1] : vector<16x16xf32> to vector<16xf32>
    %264 = vector.shape_cast %263 : vector<16xf32> to vector<16x1xf32>
    %265 = vector.broadcast %264 : vector<16x1xf32> to vector<16x16xf32>
    %266 = arith.subf %262, %265 : vector<16x16xf32>
    %267 = math.exp %266 : vector<16x16xf32>
    %cst_92 = arith.constant dense<0.000000e+00> : vector<16xf32>
    %268 = vector.multi_reduction <add>, %267, %cst_92 [1] : vector<16x16xf32> to vector<16xf32>
    %269 = vector.shape_cast %268 : vector<16xf32> to vector<16x1xf32>
    %270 = tpu.reciprocal %269 {approx = true} : vector<16x1xf32> -> vector<16x1xf32>
    %271 = vector.broadcast %270 : vector<16x1xf32> to vector<16x16xf32>
    %272 = arith.mulf %267, %271 : vector<16x16xf32>
    %273 = arith.truncf %272 : vector<16x16xf32> to vector<16x16xbf16>
    %cst_93 = arith.constant dense<0.000000e+00> : vector<16x16xf32>
    %274 = tpu.matmul %273, %260, %cst_93 {dimension_numbers = #tpu.dot_dimension_numbers<[1], [0], [0], [1], [0, 0, 1, 1], [], []>} : vector<16x16xbf16>, vector<16x16xbf16>, vector<16x16xf32> -> vector<16x16xf32>
    %275 = tpu.concatenate %214, %234, %254, %274 in 1 : vector<16x16xf32>, vector<16x16xf32>, vector<16x16xf32>, vector<16x16xf32> -> vector<16x64xf32>
    %276 = arith.truncf %275 : vector<16x64xf32> to vector<16x64xbf16>
    %c1_94 = arith.constant 1 : index
    %c0_95 = arith.constant 0 : index
    %c0_96 = arith.constant 0 : index
    %277 = vector.load %arg7[%c1_94, %c0_95, %c0_96] : memref<4x64x64xbf16, #tpu.memory_space<vmem>>, vector<1x64x64xbf16>
    %278 = vector.shape_cast %277 : vector<1x64x64xbf16> to vector<64x64xbf16>
    %cst_97 = arith.constant dense<0.000000e+00> : vector<16x64xf32>
    %279 = tpu.matmul %276, %278, %cst_97 {dimension_numbers = #tpu.dot_dimension_numbers<[1], [0], [0], [1], [0, 0, 1, 1], [], []>} : vector<16x64xbf16>, vector<64x64xbf16>, vector<16x64xf32> -> vector<16x64xf32>
    %c1_98 = arith.constant 1 : index
    %c0_99 = arith.constant 0 : index
    %c0_100 = arith.constant 0 : index
    %280 = vector.load %arg8[%c1_98, %c0_99, %c0_100] : memref<4x1x64xf32, #tpu.memory_space<vmem>>, vector<1x1x64xf32>
    %281 = vector.shape_cast %280 : vector<1x1x64xf32> to vector<1x64xf32>
    %282 = vector.broadcast %281 : vector<1x64xf32> to vector<16x64xf32>
    %283 = arith.addf %279, %282 : vector<16x64xf32>
    %284 = arith.addf %182, %283 : vector<16x64xf32>
    %c1_101 = arith.constant 1 : index
    %c0_102 = arith.constant 0 : index
    %c0_103 = arith.constant 0 : index
    %285 = vector.load %arg9[%c1_101, %c0_102, %c0_103] : memref<4x1x64xf32, #tpu.memory_space<vmem>>, vector<1x1x64xf32>
    %286 = vector.shape_cast %285 : vector<1x1x64xf32> to vector<1x64xf32>
    %c1_104 = arith.constant 1 : index
    %c0_105 = arith.constant 0 : index
    %c0_106 = arith.constant 0 : index
    %287 = vector.load %arg10[%c1_104, %c0_105, %c0_106] : memref<4x1x64xf32, #tpu.memory_space<vmem>>, vector<1x1x64xf32>
    %288 = vector.shape_cast %287 : vector<1x1x64xf32> to vector<1x64xf32>
    %cst_107 = arith.constant dense<0.000000e+00> : vector<16xf32>
    %289 = vector.multi_reduction <add>, %284, %cst_107 [1] : vector<16x64xf32> to vector<16xf32>
    %290 = vector.shape_cast %289 : vector<16xf32> to vector<16x1xf32>
    %cst_108 = arith.constant 6.400000e+01 : f32
    %291 = vector.broadcast %cst_108 : f32 to vector<16x1xf32>
    %292 = arith.divf %290, %291 : vector<16x1xf32>
    %293 = vector.broadcast %292 : vector<16x1xf32> to vector<16x64xf32>
    %294 = arith.subf %284, %293 : vector<16x64xf32>
    %295 = arith.mulf %294, %294 : vector<16x64xf32>
    %cst_109 = arith.constant dense<0.000000e+00> : vector<16xf32>
    %296 = vector.multi_reduction <add>, %295, %cst_109 [1] : vector<16x64xf32> to vector<16xf32>
    %297 = vector.shape_cast %296 : vector<16xf32> to vector<16x1xf32>
    %cst_110 = arith.constant 6.400000e+01 : f32
    %298 = vector.broadcast %cst_110 : f32 to vector<16x1xf32>
    %299 = arith.divf %297, %298 : vector<16x1xf32>
    %300 = vector.broadcast %292 : vector<16x1xf32> to vector<16x64xf32>
    %301 = arith.subf %284, %300 : vector<16x64xf32>
    %cst_111 = arith.constant 9.99999974E-6 : f32
    %302 = vector.broadcast %cst_111 : f32 to vector<16x1xf32>
    %303 = arith.addf %299, %302 : vector<16x1xf32>
    %304 = math.rsqrt %303 : vector<16x1xf32>
    %305 = vector.broadcast %304 : vector<16x1xf32> to vector<16x64xf32>
    %306 = arith.mulf %301, %305 : vector<16x64xf32>
    %307 = vector.broadcast %286 : vector<1x64xf32> to vector<16x64xf32>
    %308 = arith.mulf %306, %307 : vector<16x64xf32>
    %309 = vector.broadcast %288 : vector<1x64xf32> to vector<16x64xf32>
    %310 = arith.addf %308, %309 : vector<16x64xf32>
    %311 = arith.truncf %310 : vector<16x64xf32> to vector<16x64xbf16>
    %c1_112 = arith.constant 1 : index
    %c0_113 = arith.constant 0 : index
    %c0_114 = arith.constant 0 : index
    %312 = vector.load %arg11[%c1_112, %c0_113, %c0_114] : memref<4x64x128xbf16, #tpu.memory_space<vmem>>, vector<1x64x128xbf16>
    %313 = vector.shape_cast %312 : vector<1x64x128xbf16> to vector<64x128xbf16>
    %cst_115 = arith.constant dense<0.000000e+00> : vector<16x128xf32>
    %314 = tpu.matmul %311, %313, %cst_115 {dimension_numbers = #tpu.dot_dimension_numbers<[1], [0], [0], [1], [0, 0, 1, 1], [], []>} : vector<16x64xbf16>, vector<64x128xbf16>, vector<16x128xf32> -> vector<16x128xf32>
    %c1_116 = arith.constant 1 : index
    %c0_117 = arith.constant 0 : index
    %c0_118 = arith.constant 0 : index
    %315 = vector.load %arg12[%c1_116, %c0_117, %c0_118] : memref<4x1x128xf32, #tpu.memory_space<vmem>>, vector<1x1x128xf32>
    %316 = vector.shape_cast %315 : vector<1x1x128xf32> to vector<1x128xf32>
    %317 = vector.broadcast %316 : vector<1x128xf32> to vector<16x128xf32>
    %318 = arith.addf %314, %317 : vector<16x128xf32>
    %cst_119 = arith.constant 0.000000e+00 : f32
    %319 = vector.broadcast %cst_119 : f32 to vector<16x128xf32>
    %320 = arith.maximumf %318, %319 : vector<16x128xf32>
    %321 = arith.truncf %320 : vector<16x128xf32> to vector<16x128xbf16>
    %c1_120 = arith.constant 1 : index
    %c0_121 = arith.constant 0 : index
    %c0_122 = arith.constant 0 : index
    %322 = vector.load %arg13[%c1_120, %c0_121, %c0_122] : memref<4x128x64xbf16, #tpu.memory_space<vmem>>, vector<1x128x64xbf16>
    %323 = vector.shape_cast %322 : vector<1x128x64xbf16> to vector<128x64xbf16>
    %cst_123 = arith.constant dense<0.000000e+00> : vector<16x64xf32>
    %324 = tpu.matmul %321, %323, %cst_123 {dimension_numbers = #tpu.dot_dimension_numbers<[1], [0], [0], [1], [0, 0, 1, 1], [], []>} : vector<16x128xbf16>, vector<128x64xbf16>, vector<16x64xf32> -> vector<16x64xf32>
    %c1_124 = arith.constant 1 : index
    %c0_125 = arith.constant 0 : index
    %c0_126 = arith.constant 0 : index
    %325 = vector.load %arg14[%c1_124, %c0_125, %c0_126] : memref<4x1x64xf32, #tpu.memory_space<vmem>>, vector<1x1x64xf32>
    %326 = vector.shape_cast %325 : vector<1x1x64xf32> to vector<1x64xf32>
    %327 = vector.broadcast %326 : vector<1x64xf32> to vector<16x64xf32>
    %328 = arith.addf %324, %327 : vector<16x64xf32>
    %329 = arith.addf %310, %328 : vector<16x64xf32>
    %c1_127 = arith.constant 1 : index
    %c0_128 = arith.constant 0 : index
    %c0_129 = arith.constant 0 : index
    %330 = vector.load %arg15[%c1_127, %c0_128, %c0_129] : memref<4x1x64xf32, #tpu.memory_space<vmem>>, vector<1x1x64xf32>
    %331 = vector.shape_cast %330 : vector<1x1x64xf32> to vector<1x64xf32>
    %c1_130 = arith.constant 1 : index
    %c0_131 = arith.constant 0 : index
    %c0_132 = arith.constant 0 : index
    %332 = vector.load %arg16[%c1_130, %c0_131, %c0_132] : memref<4x1x64xf32, #tpu.memory_space<vmem>>, vector<1x1x64xf32>
    %333 = vector.shape_cast %332 : vector<1x1x64xf32> to vector<1x64xf32>
    %cst_133 = arith.constant dense<0.000000e+00> : vector<16xf32>
    %334 = vector.multi_reduction <add>, %329, %cst_133 [1] : vector<16x64xf32> to vector<16xf32>
    %335 = vector.shape_cast %334 : vector<16xf32> to vector<16x1xf32>
    %cst_134 = arith.constant 6.400000e+01 : f32
    %336 = vector.broadcast %cst_134 : f32 to vector<16x1xf32>
    %337 = arith.divf %335, %336 : vector<16x1xf32>
    %338 = vector.broadcast %337 : vector<16x1xf32> to vector<16x64xf32>
    %339 = arith.subf %329, %338 : vector<16x64xf32>
    %340 = arith.mulf %339, %339 : vector<16x64xf32>
    %cst_135 = arith.constant dense<0.000000e+00> : vector<16xf32>
    %341 = vector.multi_reduction <add>, %340, %cst_135 [1] : vector<16x64xf32> to vector<16xf32>
    %342 = vector.shape_cast %341 : vector<16xf32> to vector<16x1xf32>
    %cst_136 = arith.constant 6.400000e+01 : f32
    %343 = vector.broadcast %cst_136 : f32 to vector<16x1xf32>
    %344 = arith.divf %342, %343 : vector<16x1xf32>
    %345 = vector.broadcast %337 : vector<16x1xf32> to vector<16x64xf32>
    %346 = arith.subf %329, %345 : vector<16x64xf32>
    %cst_137 = arith.constant 9.99999974E-6 : f32
    %347 = vector.broadcast %cst_137 : f32 to vector<16x1xf32>
    %348 = arith.addf %344, %347 : vector<16x1xf32>
    %349 = math.rsqrt %348 : vector<16x1xf32>
    %350 = vector.broadcast %349 : vector<16x1xf32> to vector<16x64xf32>
    %351 = arith.mulf %346, %350 : vector<16x64xf32>
    %352 = vector.broadcast %331 : vector<1x64xf32> to vector<16x64xf32>
    %353 = arith.mulf %351, %352 : vector<16x64xf32>
    %354 = vector.broadcast %333 : vector<1x64xf32> to vector<16x64xf32>
    %355 = arith.addf %353, %354 : vector<16x64xf32>
    %356 = arith.truncf %355 : vector<16x64xf32> to vector<16x64xbf16>
    %c2 = arith.constant 2 : index
    %c0_138 = arith.constant 0 : index
    %c0_139 = arith.constant 0 : index
    %357 = vector.load %arg5[%c2, %c0_138, %c0_139] : memref<4x64x192xbf16, #tpu.memory_space<vmem>>, vector<1x64x192xbf16>
    %358 = vector.shape_cast %357 : vector<1x64x192xbf16> to vector<64x192xbf16>
    %cst_140 = arith.constant dense<0.000000e+00> : vector<16x192xf32>
    %359 = tpu.matmul %356, %358, %cst_140 {dimension_numbers = #tpu.dot_dimension_numbers<[1], [0], [0], [1], [0, 0, 1, 1], [], []>} : vector<16x64xbf16>, vector<64x192xbf16>, vector<16x192xf32> -> vector<16x192xf32>
    %c2_141 = arith.constant 2 : index
    %c0_142 = arith.constant 0 : index
    %c0_143 = arith.constant 0 : index
    %360 = vector.load %arg6[%c2_141, %c0_142, %c0_143] : memref<4x1x192xf32, #tpu.memory_space<vmem>>, vector<1x1x192xf32>
    %361 = vector.shape_cast %360 : vector<1x1x192xf32> to vector<1x192xf32>
    %362 = vector.broadcast %361 : vector<1x192xf32> to vector<16x192xf32>
    %363 = arith.addf %359, %362 : vector<16x192xf32>
    %364 = vector.extract_strided_slice %363 {offsets = [0, 0], sizes = [16, 64], strides = [1, 1]} : vector<16x192xf32> to vector<16x64xf32>
    %365 = vector.extract_strided_slice %363 {offsets = [0, 64], sizes = [16, 64], strides = [1, 1]} : vector<16x192xf32> to vector<16x64xf32>
    %366 = tpu.transpose %365, [1, 0] : vector<16x64xf32> -> vector<64x16xf32>
    %367 = vector.extract_strided_slice %363 {offsets = [0, 128], sizes = [16, 64], strides = [1, 1]} : vector<16x192xf32> to vector<16x64xf32>
    %368 = vector.extract_strided_slice %364 {offsets = [0, 0], sizes = [16, 16], strides = [1, 1]} : vector<16x64xf32> to vector<16x16xf32>
    %369 = arith.truncf %368 : vector<16x16xf32> to vector<16x16xbf16>
    %370 = vector.extract_strided_slice %366 {offsets = [0, 0], sizes = [16, 16], strides = [1, 1]} : vector<64x16xf32> to vector<16x16xf32>
    %371 = arith.truncf %370 : vector<16x16xf32> to vector<16x16xbf16>
    %372 = vector.extract_strided_slice %367 {offsets = [0, 0], sizes = [16, 16], strides = [1, 1]} : vector<16x64xf32> to vector<16x16xf32>
    %373 = arith.truncf %372 : vector<16x16xf32> to vector<16x16xbf16>
    %cst_144 = arith.constant dense<0.000000e+00> : vector<16x16xf32>
    %374 = tpu.matmul %369, %371, %cst_144 {dimension_numbers = #tpu.dot_dimension_numbers<[1], [0], [0], [1], [0, 0, 1, 1], [], []>} : vector<16x16xbf16>, vector<16x16xbf16>, vector<16x16xf32> -> vector<16x16xf32>
    %375 = arith.addf %374, %9 : vector<16x16xf32>
    %cst_145 = arith.constant dense<0xFF800000> : vector<16xf32>
    %376 = vector.multi_reduction <maximumf>, %375, %cst_145 [1] : vector<16x16xf32> to vector<16xf32>
    %377 = vector.shape_cast %376 : vector<16xf32> to vector<16x1xf32>
    %378 = vector.broadcast %377 : vector<16x1xf32> to vector<16x16xf32>
    %379 = arith.subf %375, %378 : vector<16x16xf32>
    %380 = math.exp %379 : vector<16x16xf32>
    %cst_146 = arith.constant dense<0.000000e+00> : vector<16xf32>
    %381 = vector.multi_reduction <add>, %380, %cst_146 [1] : vector<16x16xf32> to vector<16xf32>
    %382 = vector.shape_cast %381 : vector<16xf32> to vector<16x1xf32>
    %383 = tpu.reciprocal %382 {approx = true} : vector<16x1xf32> -> vector<16x1xf32>
    %384 = vector.broadcast %383 : vector<16x1xf32> to vector<16x16xf32>
    %385 = arith.mulf %380, %384 : vector<16x16xf32>
    %386 = arith.truncf %385 : vector<16x16xf32> to vector<16x16xbf16>
    %cst_147 = arith.constant dense<0.000000e+00> : vector<16x16xf32>
    %387 = tpu.matmul %386, %373, %cst_147 {dimension_numbers = #tpu.dot_dimension_numbers<[1], [0], [0], [1], [0, 0, 1, 1], [], []>} : vector<16x16xbf16>, vector<16x16xbf16>, vector<16x16xf32> -> vector<16x16xf32>
    %388 = vector.extract_strided_slice %364 {offsets = [0, 16], sizes = [16, 16], strides = [1, 1]} : vector<16x64xf32> to vector<16x16xf32>
    %389 = arith.truncf %388 : vector<16x16xf32> to vector<16x16xbf16>
    %390 = vector.extract_strided_slice %366 {offsets = [16, 0], sizes = [16, 16], strides = [1, 1]} : vector<64x16xf32> to vector<16x16xf32>
    %391 = arith.truncf %390 : vector<16x16xf32> to vector<16x16xbf16>
    %392 = vector.extract_strided_slice %367 {offsets = [0, 16], sizes = [16, 16], strides = [1, 1]} : vector<16x64xf32> to vector<16x16xf32>
    %393 = arith.truncf %392 : vector<16x16xf32> to vector<16x16xbf16>
    %cst_148 = arith.constant dense<0.000000e+00> : vector<16x16xf32>
    %394 = tpu.matmul %389, %391, %cst_148 {dimension_numbers = #tpu.dot_dimension_numbers<[1], [0], [0], [1], [0, 0, 1, 1], [], []>} : vector<16x16xbf16>, vector<16x16xbf16>, vector<16x16xf32> -> vector<16x16xf32>
    %395 = arith.addf %394, %9 : vector<16x16xf32>
    %cst_149 = arith.constant dense<0xFF800000> : vector<16xf32>
    %396 = vector.multi_reduction <maximumf>, %395, %cst_149 [1] : vector<16x16xf32> to vector<16xf32>
    %397 = vector.shape_cast %396 : vector<16xf32> to vector<16x1xf32>
    %398 = vector.broadcast %397 : vector<16x1xf32> to vector<16x16xf32>
    %399 = arith.subf %395, %398 : vector<16x16xf32>
    %400 = math.exp %399 : vector<16x16xf32>
    %cst_150 = arith.constant dense<0.000000e+00> : vector<16xf32>
    %401 = vector.multi_reduction <add>, %400, %cst_150 [1] : vector<16x16xf32> to vector<16xf32>
    %402 = vector.shape_cast %401 : vector<16xf32> to vector<16x1xf32>
    %403 = tpu.reciprocal %402 {approx = true} : vector<16x1xf32> -> vector<16x1xf32>
    %404 = vector.broadcast %403 : vector<16x1xf32> to vector<16x16xf32>
    %405 = arith.mulf %400, %404 : vector<16x16xf32>
    %406 = arith.truncf %405 : vector<16x16xf32> to vector<16x16xbf16>
    %cst_151 = arith.constant dense<0.000000e+00> : vector<16x16xf32>
    %407 = tpu.matmul %406, %393, %cst_151 {dimension_numbers = #tpu.dot_dimension_numbers<[1], [0], [0], [1], [0, 0, 1, 1], [], []>} : vector<16x16xbf16>, vector<16x16xbf16>, vector<16x16xf32> -> vector<16x16xf32>
    %408 = vector.extract_strided_slice %364 {offsets = [0, 32], sizes = [16, 16], strides = [1, 1]} : vector<16x64xf32> to vector<16x16xf32>
    %409 = arith.truncf %408 : vector<16x16xf32> to vector<16x16xbf16>
    %410 = vector.extract_strided_slice %366 {offsets = [32, 0], sizes = [16, 16], strides = [1, 1]} : vector<64x16xf32> to vector<16x16xf32>
    %411 = arith.truncf %410 : vector<16x16xf32> to vector<16x16xbf16>
    %412 = vector.extract_strided_slice %367 {offsets = [0, 32], sizes = [16, 16], strides = [1, 1]} : vector<16x64xf32> to vector<16x16xf32>
    %413 = arith.truncf %412 : vector<16x16xf32> to vector<16x16xbf16>
    %cst_152 = arith.constant dense<0.000000e+00> : vector<16x16xf32>
    %414 = tpu.matmul %409, %411, %cst_152 {dimension_numbers = #tpu.dot_dimension_numbers<[1], [0], [0], [1], [0, 0, 1, 1], [], []>} : vector<16x16xbf16>, vector<16x16xbf16>, vector<16x16xf32> -> vector<16x16xf32>
    %415 = arith.addf %414, %9 : vector<16x16xf32>
    %cst_153 = arith.constant dense<0xFF800000> : vector<16xf32>
    %416 = vector.multi_reduction <maximumf>, %415, %cst_153 [1] : vector<16x16xf32> to vector<16xf32>
    %417 = vector.shape_cast %416 : vector<16xf32> to vector<16x1xf32>
    %418 = vector.broadcast %417 : vector<16x1xf32> to vector<16x16xf32>
    %419 = arith.subf %415, %418 : vector<16x16xf32>
    %420 = math.exp %419 : vector<16x16xf32>
    %cst_154 = arith.constant dense<0.000000e+00> : vector<16xf32>
    %421 = vector.multi_reduction <add>, %420, %cst_154 [1] : vector<16x16xf32> to vector<16xf32>
    %422 = vector.shape_cast %421 : vector<16xf32> to vector<16x1xf32>
    %423 = tpu.reciprocal %422 {approx = true} : vector<16x1xf32> -> vector<16x1xf32>
    %424 = vector.broadcast %423 : vector<16x1xf32> to vector<16x16xf32>
    %425 = arith.mulf %420, %424 : vector<16x16xf32>
    %426 = arith.truncf %425 : vector<16x16xf32> to vector<16x16xbf16>
    %cst_155 = arith.constant dense<0.000000e+00> : vector<16x16xf32>
    %427 = tpu.matmul %426, %413, %cst_155 {dimension_numbers = #tpu.dot_dimension_numbers<[1], [0], [0], [1], [0, 0, 1, 1], [], []>} : vector<16x16xbf16>, vector<16x16xbf16>, vector<16x16xf32> -> vector<16x16xf32>
    %428 = vector.extract_strided_slice %364 {offsets = [0, 48], sizes = [16, 16], strides = [1, 1]} : vector<16x64xf32> to vector<16x16xf32>
    %429 = arith.truncf %428 : vector<16x16xf32> to vector<16x16xbf16>
    %430 = vector.extract_strided_slice %366 {offsets = [48, 0], sizes = [16, 16], strides = [1, 1]} : vector<64x16xf32> to vector<16x16xf32>
    %431 = arith.truncf %430 : vector<16x16xf32> to vector<16x16xbf16>
    %432 = vector.extract_strided_slice %367 {offsets = [0, 48], sizes = [16, 16], strides = [1, 1]} : vector<16x64xf32> to vector<16x16xf32>
    %433 = arith.truncf %432 : vector<16x16xf32> to vector<16x16xbf16>
    %cst_156 = arith.constant dense<0.000000e+00> : vector<16x16xf32>
    %434 = tpu.matmul %429, %431, %cst_156 {dimension_numbers = #tpu.dot_dimension_numbers<[1], [0], [0], [1], [0, 0, 1, 1], [], []>} : vector<16x16xbf16>, vector<16x16xbf16>, vector<16x16xf32> -> vector<16x16xf32>
    %435 = arith.addf %434, %9 : vector<16x16xf32>
    %cst_157 = arith.constant dense<0xFF800000> : vector<16xf32>
    %436 = vector.multi_reduction <maximumf>, %435, %cst_157 [1] : vector<16x16xf32> to vector<16xf32>
    %437 = vector.shape_cast %436 : vector<16xf32> to vector<16x1xf32>
    %438 = vector.broadcast %437 : vector<16x1xf32> to vector<16x16xf32>
    %439 = arith.subf %435, %438 : vector<16x16xf32>
    %440 = math.exp %439 : vector<16x16xf32>
    %cst_158 = arith.constant dense<0.000000e+00> : vector<16xf32>
    %441 = vector.multi_reduction <add>, %440, %cst_158 [1] : vector<16x16xf32> to vector<16xf32>
    %442 = vector.shape_cast %441 : vector<16xf32> to vector<16x1xf32>
    %443 = tpu.reciprocal %442 {approx = true} : vector<16x1xf32> -> vector<16x1xf32>
    %444 = vector.broadcast %443 : vector<16x1xf32> to vector<16x16xf32>
    %445 = arith.mulf %440, %444 : vector<16x16xf32>
    %446 = arith.truncf %445 : vector<16x16xf32> to vector<16x16xbf16>
    %cst_159 = arith.constant dense<0.000000e+00> : vector<16x16xf32>
    %447 = tpu.matmul %446, %433, %cst_159 {dimension_numbers = #tpu.dot_dimension_numbers<[1], [0], [0], [1], [0, 0, 1, 1], [], []>} : vector<16x16xbf16>, vector<16x16xbf16>, vector<16x16xf32> -> vector<16x16xf32>
    %448 = tpu.concatenate %387, %407, %427, %447 in 1 : vector<16x16xf32>, vector<16x16xf32>, vector<16x16xf32>, vector<16x16xf32> -> vector<16x64xf32>
    %449 = arith.truncf %448 : vector<16x64xf32> to vector<16x64xbf16>
    %c2_160 = arith.constant 2 : index
    %c0_161 = arith.constant 0 : index
    %c0_162 = arith.constant 0 : index
    %450 = vector.load %arg7[%c2_160, %c0_161, %c0_162] : memref<4x64x64xbf16, #tpu.memory_space<vmem>>, vector<1x64x64xbf16>
    %451 = vector.shape_cast %450 : vector<1x64x64xbf16> to vector<64x64xbf16>
    %cst_163 = arith.constant dense<0.000000e+00> : vector<16x64xf32>
    %452 = tpu.matmul %449, %451, %cst_163 {dimension_numbers = #tpu.dot_dimension_numbers<[1], [0], [0], [1], [0, 0, 1, 1], [], []>} : vector<16x64xbf16>, vector<64x64xbf16>, vector<16x64xf32> -> vector<16x64xf32>
    %c2_164 = arith.constant 2 : index
    %c0_165 = arith.constant 0 : index
    %c0_166 = arith.constant 0 : index
    %453 = vector.load %arg8[%c2_164, %c0_165, %c0_166] : memref<4x1x64xf32, #tpu.memory_space<vmem>>, vector<1x1x64xf32>
    %454 = vector.shape_cast %453 : vector<1x1x64xf32> to vector<1x64xf32>
    %455 = vector.broadcast %454 : vector<1x64xf32> to vector<16x64xf32>
    %456 = arith.addf %452, %455 : vector<16x64xf32>
    %457 = arith.addf %355, %456 : vector<16x64xf32>
    %c2_167 = arith.constant 2 : index
    %c0_168 = arith.constant 0 : index
    %c0_169 = arith.constant 0 : index
    %458 = vector.load %arg9[%c2_167, %c0_168, %c0_169] : memref<4x1x64xf32, #tpu.memory_space<vmem>>, vector<1x1x64xf32>
    %459 = vector.shape_cast %458 : vector<1x1x64xf32> to vector<1x64xf32>
    %c2_170 = arith.constant 2 : index
    %c0_171 = arith.constant 0 : index
    %c0_172 = arith.constant 0 : index
    %460 = vector.load %arg10[%c2_170, %c0_171, %c0_172] : memref<4x1x64xf32, #tpu.memory_space<vmem>>, vector<1x1x64xf32>
    %461 = vector.shape_cast %460 : vector<1x1x64xf32> to vector<1x64xf32>
    %cst_173 = arith.constant dense<0.000000e+00> : vector<16xf32>
    %462 = vector.multi_reduction <add>, %457, %cst_173 [1] : vector<16x64xf32> to vector<16xf32>
    %463 = vector.shape_cast %462 : vector<16xf32> to vector<16x1xf32>
    %cst_174 = arith.constant 6.400000e+01 : f32
    %464 = vector.broadcast %cst_174 : f32 to vector<16x1xf32>
    %465 = arith.divf %463, %464 : vector<16x1xf32>
    %466 = vector.broadcast %465 : vector<16x1xf32> to vector<16x64xf32>
    %467 = arith.subf %457, %466 : vector<16x64xf32>
    %468 = arith.mulf %467, %467 : vector<16x64xf32>
    %cst_175 = arith.constant dense<0.000000e+00> : vector<16xf32>
    %469 = vector.multi_reduction <add>, %468, %cst_175 [1] : vector<16x64xf32> to vector<16xf32>
    %470 = vector.shape_cast %469 : vector<16xf32> to vector<16x1xf32>
    %cst_176 = arith.constant 6.400000e+01 : f32
    %471 = vector.broadcast %cst_176 : f32 to vector<16x1xf32>
    %472 = arith.divf %470, %471 : vector<16x1xf32>
    %473 = vector.broadcast %465 : vector<16x1xf32> to vector<16x64xf32>
    %474 = arith.subf %457, %473 : vector<16x64xf32>
    %cst_177 = arith.constant 9.99999974E-6 : f32
    %475 = vector.broadcast %cst_177 : f32 to vector<16x1xf32>
    %476 = arith.addf %472, %475 : vector<16x1xf32>
    %477 = math.rsqrt %476 : vector<16x1xf32>
    %478 = vector.broadcast %477 : vector<16x1xf32> to vector<16x64xf32>
    %479 = arith.mulf %474, %478 : vector<16x64xf32>
    %480 = vector.broadcast %459 : vector<1x64xf32> to vector<16x64xf32>
    %481 = arith.mulf %479, %480 : vector<16x64xf32>
    %482 = vector.broadcast %461 : vector<1x64xf32> to vector<16x64xf32>
    %483 = arith.addf %481, %482 : vector<16x64xf32>
    %484 = arith.truncf %483 : vector<16x64xf32> to vector<16x64xbf16>
    %c2_178 = arith.constant 2 : index
    %c0_179 = arith.constant 0 : index
    %c0_180 = arith.constant 0 : index
    %485 = vector.load %arg11[%c2_178, %c0_179, %c0_180] : memref<4x64x128xbf16, #tpu.memory_space<vmem>>, vector<1x64x128xbf16>
    %486 = vector.shape_cast %485 : vector<1x64x128xbf16> to vector<64x128xbf16>
    %cst_181 = arith.constant dense<0.000000e+00> : vector<16x128xf32>
    %487 = tpu.matmul %484, %486, %cst_181 {dimension_numbers = #tpu.dot_dimension_numbers<[1], [0], [0], [1], [0, 0, 1, 1], [], []>} : vector<16x64xbf16>, vector<64x128xbf16>, vector<16x128xf32> -> vector<16x128xf32>
    %c2_182 = arith.constant 2 : index
    %c0_183 = arith.constant 0 : index
    %c0_184 = arith.constant 0 : index
    %488 = vector.load %arg12[%c2_182, %c0_183, %c0_184] : memref<4x1x128xf32, #tpu.memory_space<vmem>>, vector<1x1x128xf32>
    %489 = vector.shape_cast %488 : vector<1x1x128xf32> to vector<1x128xf32>
    %490 = vector.broadcast %489 : vector<1x128xf32> to vector<16x128xf32>
    %491 = arith.addf %487, %490 : vector<16x128xf32>
    %cst_185 = arith.constant 0.000000e+00 : f32
    %492 = vector.broadcast %cst_185 : f32 to vector<16x128xf32>
    %493 = arith.maximumf %491, %492 : vector<16x128xf32>
    %494 = arith.truncf %493 : vector<16x128xf32> to vector<16x128xbf16>
    %c2_186 = arith.constant 2 : index
    %c0_187 = arith.constant 0 : index
    %c0_188 = arith.constant 0 : index
    %495 = vector.load %arg13[%c2_186, %c0_187, %c0_188] : memref<4x128x64xbf16, #tpu.memory_space<vmem>>, vector<1x128x64xbf16>
    %496 = vector.shape_cast %495 : vector<1x128x64xbf16> to vector<128x64xbf16>
    %cst_189 = arith.constant dense<0.000000e+00> : vector<16x64xf32>
    %497 = tpu.matmul %494, %496, %cst_189 {dimension_numbers = #tpu.dot_dimension_numbers<[1], [0], [0], [1], [0, 0, 1, 1], [], []>} : vector<16x128xbf16>, vector<128x64xbf16>, vector<16x64xf32> -> vector<16x64xf32>
    %c2_190 = arith.constant 2 : index
    %c0_191 = arith.constant 0 : index
    %c0_192 = arith.constant 0 : index
    %498 = vector.load %arg14[%c2_190, %c0_191, %c0_192] : memref<4x1x64xf32, #tpu.memory_space<vmem>>, vector<1x1x64xf32>
    %499 = vector.shape_cast %498 : vector<1x1x64xf32> to vector<1x64xf32>
    %500 = vector.broadcast %499 : vector<1x64xf32> to vector<16x64xf32>
    %501 = arith.addf %497, %500 : vector<16x64xf32>
    %502 = arith.addf %483, %501 : vector<16x64xf32>
    %c2_193 = arith.constant 2 : index
    %c0_194 = arith.constant 0 : index
    %c0_195 = arith.constant 0 : index
    %503 = vector.load %arg15[%c2_193, %c0_194, %c0_195] : memref<4x1x64xf32, #tpu.memory_space<vmem>>, vector<1x1x64xf32>
    %504 = vector.shape_cast %503 : vector<1x1x64xf32> to vector<1x64xf32>
    %c2_196 = arith.constant 2 : index
    %c0_197 = arith.constant 0 : index
    %c0_198 = arith.constant 0 : index
    %505 = vector.load %arg16[%c2_196, %c0_197, %c0_198] : memref<4x1x64xf32, #tpu.memory_space<vmem>>, vector<1x1x64xf32>
    %506 = vector.shape_cast %505 : vector<1x1x64xf32> to vector<1x64xf32>
    %cst_199 = arith.constant dense<0.000000e+00> : vector<16xf32>
    %507 = vector.multi_reduction <add>, %502, %cst_199 [1] : vector<16x64xf32> to vector<16xf32>
    %508 = vector.shape_cast %507 : vector<16xf32> to vector<16x1xf32>
    %cst_200 = arith.constant 6.400000e+01 : f32
    %509 = vector.broadcast %cst_200 : f32 to vector<16x1xf32>
    %510 = arith.divf %508, %509 : vector<16x1xf32>
    %511 = vector.broadcast %510 : vector<16x1xf32> to vector<16x64xf32>
    %512 = arith.subf %502, %511 : vector<16x64xf32>
    %513 = arith.mulf %512, %512 : vector<16x64xf32>
    %cst_201 = arith.constant dense<0.000000e+00> : vector<16xf32>
    %514 = vector.multi_reduction <add>, %513, %cst_201 [1] : vector<16x64xf32> to vector<16xf32>
    %515 = vector.shape_cast %514 : vector<16xf32> to vector<16x1xf32>
    %cst_202 = arith.constant 6.400000e+01 : f32
    %516 = vector.broadcast %cst_202 : f32 to vector<16x1xf32>
    %517 = arith.divf %515, %516 : vector<16x1xf32>
    %518 = vector.broadcast %510 : vector<16x1xf32> to vector<16x64xf32>
    %519 = arith.subf %502, %518 : vector<16x64xf32>
    %cst_203 = arith.constant 9.99999974E-6 : f32
    %520 = vector.broadcast %cst_203 : f32 to vector<16x1xf32>
    %521 = arith.addf %517, %520 : vector<16x1xf32>
    %522 = math.rsqrt %521 : vector<16x1xf32>
    %523 = vector.broadcast %522 : vector<16x1xf32> to vector<16x64xf32>
    %524 = arith.mulf %519, %523 : vector<16x64xf32>
    %525 = vector.broadcast %504 : vector<1x64xf32> to vector<16x64xf32>
    %526 = arith.mulf %524, %525 : vector<16x64xf32>
    %527 = vector.broadcast %506 : vector<1x64xf32> to vector<16x64xf32>
    %528 = arith.addf %526, %527 : vector<16x64xf32>
    %529 = arith.truncf %528 : vector<16x64xf32> to vector<16x64xbf16>
    %c3 = arith.constant 3 : index
    %c0_204 = arith.constant 0 : index
    %c0_205 = arith.constant 0 : index
    %530 = vector.load %arg5[%c3, %c0_204, %c0_205] : memref<4x64x192xbf16, #tpu.memory_space<vmem>>, vector<1x64x192xbf16>
    %531 = vector.shape_cast %530 : vector<1x64x192xbf16> to vector<64x192xbf16>
    %cst_206 = arith.constant dense<0.000000e+00> : vector<16x192xf32>
    %532 = tpu.matmul %529, %531, %cst_206 {dimension_numbers = #tpu.dot_dimension_numbers<[1], [0], [0], [1], [0, 0, 1, 1], [], []>} : vector<16x64xbf16>, vector<64x192xbf16>, vector<16x192xf32> -> vector<16x192xf32>
    %c3_207 = arith.constant 3 : index
    %c0_208 = arith.constant 0 : index
    %c0_209 = arith.constant 0 : index
    %533 = vector.load %arg6[%c3_207, %c0_208, %c0_209] : memref<4x1x192xf32, #tpu.memory_space<vmem>>, vector<1x1x192xf32>
    %534 = vector.shape_cast %533 : vector<1x1x192xf32> to vector<1x192xf32>
    %535 = vector.broadcast %534 : vector<1x192xf32> to vector<16x192xf32>
    %536 = arith.addf %532, %535 : vector<16x192xf32>
    %537 = vector.extract_strided_slice %536 {offsets = [0, 0], sizes = [16, 64], strides = [1, 1]} : vector<16x192xf32> to vector<16x64xf32>
    %538 = vector.extract_strided_slice %536 {offsets = [0, 64], sizes = [16, 64], strides = [1, 1]} : vector<16x192xf32> to vector<16x64xf32>
    %539 = tpu.transpose %538, [1, 0] : vector<16x64xf32> -> vector<64x16xf32>
    %540 = vector.extract_strided_slice %536 {offsets = [0, 128], sizes = [16, 64], strides = [1, 1]} : vector<16x192xf32> to vector<16x64xf32>
    %541 = vector.extract_strided_slice %537 {offsets = [0, 0], sizes = [16, 16], strides = [1, 1]} : vector<16x64xf32> to vector<16x16xf32>
    %542 = arith.truncf %541 : vector<16x16xf32> to vector<16x16xbf16>
    %543 = vector.extract_strided_slice %539 {offsets = [0, 0], sizes = [16, 16], strides = [1, 1]} : vector<64x16xf32> to vector<16x16xf32>
    %544 = arith.truncf %543 : vector<16x16xf32> to vector<16x16xbf16>
    %545 = vector.extract_strided_slice %540 {offsets = [0, 0], sizes = [16, 16], strides = [1, 1]} : vector<16x64xf32> to vector<16x16xf32>
    %546 = arith.truncf %545 : vector<16x16xf32> to vector<16x16xbf16>
    %cst_210 = arith.constant dense<0.000000e+00> : vector<16x16xf32>
    %547 = tpu.matmul %542, %544, %cst_210 {dimension_numbers = #tpu.dot_dimension_numbers<[1], [0], [0], [1], [0, 0, 1, 1], [], []>} : vector<16x16xbf16>, vector<16x16xbf16>, vector<16x16xf32> -> vector<16x16xf32>
    %548 = arith.addf %547, %9 : vector<16x16xf32>
    %cst_211 = arith.constant dense<0xFF800000> : vector<16xf32>
    %549 = vector.multi_reduction <maximumf>, %548, %cst_211 [1] : vector<16x16xf32> to vector<16xf32>
    %550 = vector.shape_cast %549 : vector<16xf32> to vector<16x1xf32>
    %551 = vector.broadcast %550 : vector<16x1xf32> to vector<16x16xf32>
    %552 = arith.subf %548, %551 : vector<16x16xf32>
    %553 = math.exp %552 : vector<16x16xf32>
    %cst_212 = arith.constant dense<0.000000e+00> : vector<16xf32>
    %554 = vector.multi_reduction <add>, %553, %cst_212 [1] : vector<16x16xf32> to vector<16xf32>
    %555 = vector.shape_cast %554 : vector<16xf32> to vector<16x1xf32>
    %556 = tpu.reciprocal %555 {approx = true} : vector<16x1xf32> -> vector<16x1xf32>
    %557 = vector.broadcast %556 : vector<16x1xf32> to vector<16x16xf32>
    %558 = arith.mulf %553, %557 : vector<16x16xf32>
    %559 = arith.truncf %558 : vector<16x16xf32> to vector<16x16xbf16>
    %cst_213 = arith.constant dense<0.000000e+00> : vector<16x16xf32>
    %560 = tpu.matmul %559, %546, %cst_213 {dimension_numbers = #tpu.dot_dimension_numbers<[1], [0], [0], [1], [0, 0, 1, 1], [], []>} : vector<16x16xbf16>, vector<16x16xbf16>, vector<16x16xf32> -> vector<16x16xf32>
    %561 = vector.extract_strided_slice %537 {offsets = [0, 16], sizes = [16, 16], strides = [1, 1]} : vector<16x64xf32> to vector<16x16xf32>
    %562 = arith.truncf %561 : vector<16x16xf32> to vector<16x16xbf16>
    %563 = vector.extract_strided_slice %539 {offsets = [16, 0], sizes = [16, 16], strides = [1, 1]} : vector<64x16xf32> to vector<16x16xf32>
    %564 = arith.truncf %563 : vector<16x16xf32> to vector<16x16xbf16>
    %565 = vector.extract_strided_slice %540 {offsets = [0, 16], sizes = [16, 16], strides = [1, 1]} : vector<16x64xf32> to vector<16x16xf32>
    %566 = arith.truncf %565 : vector<16x16xf32> to vector<16x16xbf16>
    %cst_214 = arith.constant dense<0.000000e+00> : vector<16x16xf32>
    %567 = tpu.matmul %562, %564, %cst_214 {dimension_numbers = #tpu.dot_dimension_numbers<[1], [0], [0], [1], [0, 0, 1, 1], [], []>} : vector<16x16xbf16>, vector<16x16xbf16>, vector<16x16xf32> -> vector<16x16xf32>
    %568 = arith.addf %567, %9 : vector<16x16xf32>
    %cst_215 = arith.constant dense<0xFF800000> : vector<16xf32>
    %569 = vector.multi_reduction <maximumf>, %568, %cst_215 [1] : vector<16x16xf32> to vector<16xf32>
    %570 = vector.shape_cast %569 : vector<16xf32> to vector<16x1xf32>
    %571 = vector.broadcast %570 : vector<16x1xf32> to vector<16x16xf32>
    %572 = arith.subf %568, %571 : vector<16x16xf32>
    %573 = math.exp %572 : vector<16x16xf32>
    %cst_216 = arith.constant dense<0.000000e+00> : vector<16xf32>
    %574 = vector.multi_reduction <add>, %573, %cst_216 [1] : vector<16x16xf32> to vector<16xf32>
    %575 = vector.shape_cast %574 : vector<16xf32> to vector<16x1xf32>
    %576 = tpu.reciprocal %575 {approx = true} : vector<16x1xf32> -> vector<16x1xf32>
    %577 = vector.broadcast %576 : vector<16x1xf32> to vector<16x16xf32>
    %578 = arith.mulf %573, %577 : vector<16x16xf32>
    %579 = arith.truncf %578 : vector<16x16xf32> to vector<16x16xbf16>
    %cst_217 = arith.constant dense<0.000000e+00> : vector<16x16xf32>
    %580 = tpu.matmul %579, %566, %cst_217 {dimension_numbers = #tpu.dot_dimension_numbers<[1], [0], [0], [1], [0, 0, 1, 1], [], []>} : vector<16x16xbf16>, vector<16x16xbf16>, vector<16x16xf32> -> vector<16x16xf32>
    %581 = vector.extract_strided_slice %537 {offsets = [0, 32], sizes = [16, 16], strides = [1, 1]} : vector<16x64xf32> to vector<16x16xf32>
    %582 = arith.truncf %581 : vector<16x16xf32> to vector<16x16xbf16>
    %583 = vector.extract_strided_slice %539 {offsets = [32, 0], sizes = [16, 16], strides = [1, 1]} : vector<64x16xf32> to vector<16x16xf32>
    %584 = arith.truncf %583 : vector<16x16xf32> to vector<16x16xbf16>
    %585 = vector.extract_strided_slice %540 {offsets = [0, 32], sizes = [16, 16], strides = [1, 1]} : vector<16x64xf32> to vector<16x16xf32>
    %586 = arith.truncf %585 : vector<16x16xf32> to vector<16x16xbf16>
    %cst_218 = arith.constant dense<0.000000e+00> : vector<16x16xf32>
    %587 = tpu.matmul %582, %584, %cst_218 {dimension_numbers = #tpu.dot_dimension_numbers<[1], [0], [0], [1], [0, 0, 1, 1], [], []>} : vector<16x16xbf16>, vector<16x16xbf16>, vector<16x16xf32> -> vector<16x16xf32>
    %588 = arith.addf %587, %9 : vector<16x16xf32>
    %cst_219 = arith.constant dense<0xFF800000> : vector<16xf32>
    %589 = vector.multi_reduction <maximumf>, %588, %cst_219 [1] : vector<16x16xf32> to vector<16xf32>
    %590 = vector.shape_cast %589 : vector<16xf32> to vector<16x1xf32>
    %591 = vector.broadcast %590 : vector<16x1xf32> to vector<16x16xf32>
    %592 = arith.subf %588, %591 : vector<16x16xf32>
    %593 = math.exp %592 : vector<16x16xf32>
    %cst_220 = arith.constant dense<0.000000e+00> : vector<16xf32>
    %594 = vector.multi_reduction <add>, %593, %cst_220 [1] : vector<16x16xf32> to vector<16xf32>
    %595 = vector.shape_cast %594 : vector<16xf32> to vector<16x1xf32>
    %596 = tpu.reciprocal %595 {approx = true} : vector<16x1xf32> -> vector<16x1xf32>
    %597 = vector.broadcast %596 : vector<16x1xf32> to vector<16x16xf32>
    %598 = arith.mulf %593, %597 : vector<16x16xf32>
    %599 = arith.truncf %598 : vector<16x16xf32> to vector<16x16xbf16>
    %cst_221 = arith.constant dense<0.000000e+00> : vector<16x16xf32>
    %600 = tpu.matmul %599, %586, %cst_221 {dimension_numbers = #tpu.dot_dimension_numbers<[1], [0], [0], [1], [0, 0, 1, 1], [], []>} : vector<16x16xbf16>, vector<16x16xbf16>, vector<16x16xf32> -> vector<16x16xf32>
    %601 = vector.extract_strided_slice %537 {offsets = [0, 48], sizes = [16, 16], strides = [1, 1]} : vector<16x64xf32> to vector<16x16xf32>
    %602 = arith.truncf %601 : vector<16x16xf32> to vector<16x16xbf16>
    %603 = vector.extract_strided_slice %539 {offsets = [48, 0], sizes = [16, 16], strides = [1, 1]} : vector<64x16xf32> to vector<16x16xf32>
    %604 = arith.truncf %603 : vector<16x16xf32> to vector<16x16xbf16>
    %605 = vector.extract_strided_slice %540 {offsets = [0, 48], sizes = [16, 16], strides = [1, 1]} : vector<16x64xf32> to vector<16x16xf32>
    %606 = arith.truncf %605 : vector<16x16xf32> to vector<16x16xbf16>
    %cst_222 = arith.constant dense<0.000000e+00> : vector<16x16xf32>
    %607 = tpu.matmul %602, %604, %cst_222 {dimension_numbers = #tpu.dot_dimension_numbers<[1], [0], [0], [1], [0, 0, 1, 1], [], []>} : vector<16x16xbf16>, vector<16x16xbf16>, vector<16x16xf32> -> vector<16x16xf32>
    %608 = arith.addf %607, %9 : vector<16x16xf32>
    %cst_223 = arith.constant dense<0xFF800000> : vector<16xf32>
    %609 = vector.multi_reduction <maximumf>, %608, %cst_223 [1] : vector<16x16xf32> to vector<16xf32>
    %610 = vector.shape_cast %609 : vector<16xf32> to vector<16x1xf32>
    %611 = vector.broadcast %610 : vector<16x1xf32> to vector<16x16xf32>
    %612 = arith.subf %608, %611 : vector<16x16xf32>
    %613 = math.exp %612 : vector<16x16xf32>
    %cst_224 = arith.constant dense<0.000000e+00> : vector<16xf32>
    %614 = vector.multi_reduction <add>, %613, %cst_224 [1] : vector<16x16xf32> to vector<16xf32>
    %615 = vector.shape_cast %614 : vector<16xf32> to vector<16x1xf32>
    %616 = tpu.reciprocal %615 {approx = true} : vector<16x1xf32> -> vector<16x1xf32>
    %617 = vector.broadcast %616 : vector<16x1xf32> to vector<16x16xf32>
    %618 = arith.mulf %613, %617 : vector<16x16xf32>
    %619 = arith.truncf %618 : vector<16x16xf32> to vector<16x16xbf16>
    %cst_225 = arith.constant dense<0.000000e+00> : vector<16x16xf32>
    %620 = tpu.matmul %619, %606, %cst_225 {dimension_numbers = #tpu.dot_dimension_numbers<[1], [0], [0], [1], [0, 0, 1, 1], [], []>} : vector<16x16xbf16>, vector<16x16xbf16>, vector<16x16xf32> -> vector<16x16xf32>
    %621 = tpu.concatenate %560, %580, %600, %620 in 1 : vector<16x16xf32>, vector<16x16xf32>, vector<16x16xf32>, vector<16x16xf32> -> vector<16x64xf32>
    %622 = arith.truncf %621 : vector<16x64xf32> to vector<16x64xbf16>
    %c3_226 = arith.constant 3 : index
    %c0_227 = arith.constant 0 : index
    %c0_228 = arith.constant 0 : index
    %623 = vector.load %arg7[%c3_226, %c0_227, %c0_228] : memref<4x64x64xbf16, #tpu.memory_space<vmem>>, vector<1x64x64xbf16>
    %624 = vector.shape_cast %623 : vector<1x64x64xbf16> to vector<64x64xbf16>
    %cst_229 = arith.constant dense<0.000000e+00> : vector<16x64xf32>
    %625 = tpu.matmul %622, %624, %cst_229 {dimension_numbers = #tpu.dot_dimension_numbers<[1], [0], [0], [1], [0, 0, 1, 1], [], []>} : vector<16x64xbf16>, vector<64x64xbf16>, vector<16x64xf32> -> vector<16x64xf32>
    %c3_230 = arith.constant 3 : index
    %c0_231 = arith.constant 0 : index
    %c0_232 = arith.constant 0 : index
    %626 = vector.load %arg8[%c3_230, %c0_231, %c0_232] : memref<4x1x64xf32, #tpu.memory_space<vmem>>, vector<1x1x64xf32>
    %627 = vector.shape_cast %626 : vector<1x1x64xf32> to vector<1x64xf32>
    %628 = vector.broadcast %627 : vector<1x64xf32> to vector<16x64xf32>
    %629 = arith.addf %625, %628 : vector<16x64xf32>
    %630 = arith.addf %528, %629 : vector<16x64xf32>
    %c3_233 = arith.constant 3 : index
    %c0_234 = arith.constant 0 : index
    %c0_235 = arith.constant 0 : index
    %631 = vector.load %arg9[%c3_233, %c0_234, %c0_235] : memref<4x1x64xf32, #tpu.memory_space<vmem>>, vector<1x1x64xf32>
    %632 = vector.shape_cast %631 : vector<1x1x64xf32> to vector<1x64xf32>
    %c3_236 = arith.constant 3 : index
    %c0_237 = arith.constant 0 : index
    %c0_238 = arith.constant 0 : index
    %633 = vector.load %arg10[%c3_236, %c0_237, %c0_238] : memref<4x1x64xf32, #tpu.memory_space<vmem>>, vector<1x1x64xf32>
    %634 = vector.shape_cast %633 : vector<1x1x64xf32> to vector<1x64xf32>
    %cst_239 = arith.constant dense<0.000000e+00> : vector<16xf32>
    %635 = vector.multi_reduction <add>, %630, %cst_239 [1] : vector<16x64xf32> to vector<16xf32>
    %636 = vector.shape_cast %635 : vector<16xf32> to vector<16x1xf32>
    %cst_240 = arith.constant 6.400000e+01 : f32
    %637 = vector.broadcast %cst_240 : f32 to vector<16x1xf32>
    %638 = arith.divf %636, %637 : vector<16x1xf32>
    %639 = vector.broadcast %638 : vector<16x1xf32> to vector<16x64xf32>
    %640 = arith.subf %630, %639 : vector<16x64xf32>
    %641 = arith.mulf %640, %640 : vector<16x64xf32>
    %cst_241 = arith.constant dense<0.000000e+00> : vector<16xf32>
    %642 = vector.multi_reduction <add>, %641, %cst_241 [1] : vector<16x64xf32> to vector<16xf32>
    %643 = vector.shape_cast %642 : vector<16xf32> to vector<16x1xf32>
    %cst_242 = arith.constant 6.400000e+01 : f32
    %644 = vector.broadcast %cst_242 : f32 to vector<16x1xf32>
    %645 = arith.divf %643, %644 : vector<16x1xf32>
    %646 = vector.broadcast %638 : vector<16x1xf32> to vector<16x64xf32>
    %647 = arith.subf %630, %646 : vector<16x64xf32>
    %cst_243 = arith.constant 9.99999974E-6 : f32
    %648 = vector.broadcast %cst_243 : f32 to vector<16x1xf32>
    %649 = arith.addf %645, %648 : vector<16x1xf32>
    %650 = math.rsqrt %649 : vector<16x1xf32>
    %651 = vector.broadcast %650 : vector<16x1xf32> to vector<16x64xf32>
    %652 = arith.mulf %647, %651 : vector<16x64xf32>
    %653 = vector.broadcast %632 : vector<1x64xf32> to vector<16x64xf32>
    %654 = arith.mulf %652, %653 : vector<16x64xf32>
    %655 = vector.broadcast %634 : vector<1x64xf32> to vector<16x64xf32>
    %656 = arith.addf %654, %655 : vector<16x64xf32>
    %657 = arith.truncf %656 : vector<16x64xf32> to vector<16x64xbf16>
    %c3_244 = arith.constant 3 : index
    %c0_245 = arith.constant 0 : index
    %c0_246 = arith.constant 0 : index
    %658 = vector.load %arg11[%c3_244, %c0_245, %c0_246] : memref<4x64x128xbf16, #tpu.memory_space<vmem>>, vector<1x64x128xbf16>
    %659 = vector.shape_cast %658 : vector<1x64x128xbf16> to vector<64x128xbf16>
    %cst_247 = arith.constant dense<0.000000e+00> : vector<16x128xf32>
    %660 = tpu.matmul %657, %659, %cst_247 {dimension_numbers = #tpu.dot_dimension_numbers<[1], [0], [0], [1], [0, 0, 1, 1], [], []>} : vector<16x64xbf16>, vector<64x128xbf16>, vector<16x128xf32> -> vector<16x128xf32>
    %c3_248 = arith.constant 3 : index
    %c0_249 = arith.constant 0 : index
    %c0_250 = arith.constant 0 : index
    %661 = vector.load %arg12[%c3_248, %c0_249, %c0_250] : memref<4x1x128xf32, #tpu.memory_space<vmem>>, vector<1x1x128xf32>
    %662 = vector.shape_cast %661 : vector<1x1x128xf32> to vector<1x128xf32>
    %663 = vector.broadcast %662 : vector<1x128xf32> to vector<16x128xf32>
    %664 = arith.addf %660, %663 : vector<16x128xf32>
    %cst_251 = arith.constant 0.000000e+00 : f32
    %665 = vector.broadcast %cst_251 : f32 to vector<16x128xf32>
    %666 = arith.maximumf %664, %665 : vector<16x128xf32>
    %667 = arith.truncf %666 : vector<16x128xf32> to vector<16x128xbf16>
    %c3_252 = arith.constant 3 : index
    %c0_253 = arith.constant 0 : index
    %c0_254 = arith.constant 0 : index
    %668 = vector.load %arg13[%c3_252, %c0_253, %c0_254] : memref<4x128x64xbf16, #tpu.memory_space<vmem>>, vector<1x128x64xbf16>
    %669 = vector.shape_cast %668 : vector<1x128x64xbf16> to vector<128x64xbf16>
    %cst_255 = arith.constant dense<0.000000e+00> : vector<16x64xf32>
    %670 = tpu.matmul %667, %669, %cst_255 {dimension_numbers = #tpu.dot_dimension_numbers<[1], [0], [0], [1], [0, 0, 1, 1], [], []>} : vector<16x128xbf16>, vector<128x64xbf16>, vector<16x64xf32> -> vector<16x64xf32>
    %c3_256 = arith.constant 3 : index
    %c0_257 = arith.constant 0 : index
    %c0_258 = arith.constant 0 : index
    %671 = vector.load %arg14[%c3_256, %c0_257, %c0_258] : memref<4x1x64xf32, #tpu.memory_space<vmem>>, vector<1x1x64xf32>
    %672 = vector.shape_cast %671 : vector<1x1x64xf32> to vector<1x64xf32>
    %673 = vector.broadcast %672 : vector<1x64xf32> to vector<16x64xf32>
    %674 = arith.addf %670, %673 : vector<16x64xf32>
    %675 = arith.addf %656, %674 : vector<16x64xf32>
    %c3_259 = arith.constant 3 : index
    %c0_260 = arith.constant 0 : index
    %c0_261 = arith.constant 0 : index
    %676 = vector.load %arg15[%c3_259, %c0_260, %c0_261] : memref<4x1x64xf32, #tpu.memory_space<vmem>>, vector<1x1x64xf32>
    %677 = vector.shape_cast %676 : vector<1x1x64xf32> to vector<1x64xf32>
    %c3_262 = arith.constant 3 : index
    %c0_263 = arith.constant 0 : index
    %c0_264 = arith.constant 0 : index
    %678 = vector.load %arg16[%c3_262, %c0_263, %c0_264] : memref<4x1x64xf32, #tpu.memory_space<vmem>>, vector<1x1x64xf32>
    %679 = vector.shape_cast %678 : vector<1x1x64xf32> to vector<1x64xf32>
    %cst_265 = arith.constant dense<0.000000e+00> : vector<16xf32>
    %680 = vector.multi_reduction <add>, %675, %cst_265 [1] : vector<16x64xf32> to vector<16xf32>
    %681 = vector.shape_cast %680 : vector<16xf32> to vector<16x1xf32>
    %cst_266 = arith.constant 6.400000e+01 : f32
    %682 = vector.broadcast %cst_266 : f32 to vector<16x1xf32>
    %683 = arith.divf %681, %682 : vector<16x1xf32>
    %684 = vector.broadcast %683 : vector<16x1xf32> to vector<16x64xf32>
    %685 = arith.subf %675, %684 : vector<16x64xf32>
    %686 = arith.mulf %685, %685 : vector<16x64xf32>
    %cst_267 = arith.constant dense<0.000000e+00> : vector<16xf32>
    %687 = vector.multi_reduction <add>, %686, %cst_267 [1] : vector<16x64xf32> to vector<16xf32>
    %688 = vector.shape_cast %687 : vector<16xf32> to vector<16x1xf32>
    %cst_268 = arith.constant 6.400000e+01 : f32
    %689 = vector.broadcast %cst_268 : f32 to vector<16x1xf32>
    %690 = arith.divf %688, %689 : vector<16x1xf32>
    %691 = vector.broadcast %683 : vector<16x1xf32> to vector<16x64xf32>
    %692 = arith.subf %675, %691 : vector<16x64xf32>
    %cst_269 = arith.constant 9.99999974E-6 : f32
    %693 = vector.broadcast %cst_269 : f32 to vector<16x1xf32>
    %694 = arith.addf %690, %693 : vector<16x1xf32>
    %695 = math.rsqrt %694 : vector<16x1xf32>
    %696 = vector.broadcast %695 : vector<16x1xf32> to vector<16x64xf32>
    %697 = arith.mulf %692, %696 : vector<16x64xf32>
    %698 = vector.broadcast %677 : vector<1x64xf32> to vector<16x64xf32>
    %699 = arith.mulf %697, %698 : vector<16x64xf32>
    %700 = vector.broadcast %679 : vector<1x64xf32> to vector<16x64xf32>
    %701 = arith.addf %699, %700 : vector<16x64xf32>
    %c0_270 = arith.constant 0 : index
    %c0_271 = arith.constant 0 : index
    %702 = vector.load %arg3[%c0_270, %c0_271] : memref<2x16xbf16, #tpu.memory_space<vmem>>, vector<2x16xbf16>
    %703 = arith.truncf %701 : vector<16x64xf32> to vector<16x64xbf16>
    %cst_272 = arith.constant dense<0.000000e+00> : vector<2x64xf32>
    %704 = tpu.matmul %702, %703, %cst_272 {dimension_numbers = #tpu.dot_dimension_numbers<[1], [0], [0], [1], [0, 0, 1, 1], [], []>} : vector<2x16xbf16>, vector<16x64xbf16>, vector<2x64xf32> -> vector<2x64xf32>
    %705 = arith.truncf %704 : vector<2x64xf32> to vector<2x64xbf16>
    %c0_273 = arith.constant 0 : index
    %c0_274 = arith.constant 0 : index
    %706 = vector.load %arg17[%c0_273, %c0_274] : memref<64x128xbf16, #tpu.memory_space<vmem>>, vector<64x128xbf16>
    %cst_275 = arith.constant dense<0.000000e+00> : vector<2x128xf32>
    %707 = tpu.matmul %705, %706, %cst_275 {dimension_numbers = #tpu.dot_dimension_numbers<[1], [0], [0], [1], [0, 0, 1, 1], [], []>} : vector<2x64xbf16>, vector<64x128xbf16>, vector<2x128xf32> -> vector<2x128xf32>
    %c0_276 = arith.constant 0 : index
    %c0_277 = arith.constant 0 : index
    %708 = vector.load %arg18[%c0_276, %c0_277] : memref<1x128xf32, #tpu.memory_space<vmem>>, vector<1x128xf32>
    %709 = vector.broadcast %708 : vector<1x128xf32> to vector<2x128xf32>
    %710 = arith.addf %707, %709 : vector<2x128xf32>
    %c0_278 = arith.constant 0 : index
    %c0_279 = arith.constant 0 : index
    %711 = vector.load %arg19[%c0_278, %c0_279] : memref<2x128xf32, #tpu.memory_space<vmem>>, vector<2x128xf32>
    tpu.vector_store %arg19[%c0_278, %c0_279], %710 {strides = array<i32>} : memref<2x128xf32, #tpu.memory_space<vmem>>, vector<2x128xf32>,
    return
  }
  func.func @transform_0(%arg0: i32) -> (i32, i32) {
    %c0_i32 = arith.constant 0 : i32
    %c0_i32_0 = arith.constant 0 : i32
    %c0_i32_1 = arith.constant 0 : i32
    return %c0_i32, %c0_i32_0 : i32, i32
  }
  func.func @transform_1(%arg0: i32) -> (i32, i32) {
    %c0_i32 = arith.constant 0 : i32
    %c0_i32_0 = arith.constant 0 : i32
    %c0_i32_1 = arith.constant 0 : i32
    return %c0_i32, %c0_i32_0 : i32, i32
  }
  func.func @transform_2(%arg0: i32) -> (i32, i32) {
    %c0_i32 = arith.constant 0 : i32
    %c0_i32_0 = arith.constant 0 : i32
    %c0_i32_1 = arith.constant 0 : i32
    return %c0_i32, %c0_i32_0 : i32, i32
  }
  func.func @transform_3(%arg0: i32) -> (i32, i32) {
    %c0_i32 = arith.constant 0 : i32
    %c0_i32_0 = arith.constant 0 : i32
    %c0_i32_1 = arith.constant 0 : i32
    return %c0_i32, %c0_i32_0 : i32, i32
  }
  func.func @transform_4(%arg0: i32) -> (i32, i32, i32) {
    %c0_i32 = arith.constant 0 : i32
    %c0_i32_0 = arith.constant 0 : i32
    %c0_i32_1 = arith.constant 0 : i32
    %c0_i32_2 = arith.constant 0 : i32
    return %c0_i32, %c0_i32_0, %c0_i32_1 : i32, i32, i32
  }
  func.func @transform_5(%arg0: i32) -> (i32, i32, i32) {
    %c0_i32 = arith.constant 0 : i32
    %c0_i32_0 = arith.constant 0 : i32
    %c0_i32_1 = arith.constant 0 : i32
    %c0_i32_2 = arith.constant 0 : i32
    return %c0_i32, %c0_i32_0, %c0_i32_1 : i32, i32, i32
  }
  func.func @transform_6(%arg0: i32) -> (i32, i32, i32) {
    %c0_i32 = arith.constant 0 : i32
    %c0_i32_0 = arith.constant 0 : i32
    %c0_i32_1 = arith.constant 0 : i32
    %c0_i32_2 = arith.constant 0 : i32
    return %c0_i32, %c0_i32_0, %c0_i32_1 : i32, i32, i32
  }
  func.func @transform_7(%arg0: i32) -> (i32, i32, i32) {
    %c0_i32 = arith.constant 0 : i32
    %c0_i32_0 = arith.constant 0 : i32
    %c0_i32_1 = arith.constant 0 : i32
    %c0_i32_2 = arith.constant 0 : i32
    return %c0_i32, %c0_i32_0, %c0_i32_1 : i32, i32, i32
  }
  func.func @transform_8(%arg0: i32) -> (i32, i32, i32) {
    %c0_i32 = arith.constant 0 : i32
    %c0_i32_0 = arith.constant 0 : i32
    %c0_i32_1 = arith.constant 0 : i32
    %c0_i32_2 = arith.constant 0 : i32
    return %c0_i32, %c0_i32_0, %c0_i32_1 : i32, i32, i32
  }
  func.func @transform_9(%arg0: i32) -> (i32, i32, i32) {
    %c0_i32 = arith.constant 0 : i32
    %c0_i32_0 = arith.constant 0 : i32
    %c0_i32_1 = arith.constant 0 : i32
    %c0_i32_2 = arith.constant 0 : i32
    return %c0_i32, %c0_i32_0, %c0_i32_1 : i32, i32, i32
  }
  func.func @transform_10(%arg0: i32) -> (i32, i32, i32) {
    %c0_i32 = arith.constant 0 : i32
    %c0_i32_0 = arith.constant 0 : i32
    %c0_i32_1 = arith.constant 0 : i32
    %c0_i32_2 = arith.constant 0 : i32
    return %c0_i32, %c0_i32_0, %c0_i32_1 : i32, i32, i32
  }
  func.func @transform_11(%arg0: i32) -> (i32, i32, i32) {
    %c0_i32 = arith.constant 0 : i32
    %c0_i32_0 = arith.constant 0 : i32
    %c0_i32_1 = arith.constant 0 : i32
    %c0_i32_2 = arith.constant 0 : i32
    return %c0_i32, %c0_i32_0, %c0_i32_1 : i32, i32, i32
  }
  func.func @transform_12(%arg0: i32) -> (i32, i32, i32) {
    %c0_i32 = arith.constant 0 : i32
    %c0_i32_0 = arith.constant 0 : i32
    %c0_i32_1 = arith.constant 0 : i32
    %c0_i32_2 = arith.constant 0 : i32
    return %c0_i32, %c0_i32_0, %c0_i32_1 : i32, i32, i32
  }
  func.func @transform_13(%arg0: i32) -> (i32, i32, i32) {
    %c0_i32 = arith.constant 0 : i32
    %c0_i32_0 = arith.constant 0 : i32
    %c0_i32_1 = arith.constant 0 : i32
    %c0_i32_2 = arith.constant 0 : i32
    return %c0_i32, %c0_i32_0, %c0_i32_1 : i32, i32, i32
  }
  func.func @transform_14(%arg0: i32) -> (i32, i32, i32) {
    %c0_i32 = arith.constant 0 : i32
    %c0_i32_0 = arith.constant 0 : i32
    %c0_i32_1 = arith.constant 0 : i32
    %c0_i32_2 = arith.constant 0 : i32
    return %c0_i32, %c0_i32_0, %c0_i32_1 : i32, i32, i32
  }
  func.func @transform_15(%arg0: i32) -> (i32, i32, i32) {
    %c0_i32 = arith.constant 0 : i32
    %c0_i32_0 = arith.constant 0 : i32
    %c0_i32_1 = arith.constant 0 : i32
    %c0_i32_2 = arith.constant 0 : i32
    return %c0_i32, %c0_i32_0, %c0_i32_1 : i32, i32, i32
  }
  func.func @transform_16(%arg0: i32) -> (i32, i32) {
    %c0_i32 = arith.constant 0 : i32
    %c0_i32_0 = arith.constant 0 : i32
    %c0_i32_1 = arith.constant 0 : i32
    return %c0_i32, %c0_i32_0 : i32, i32
  }
  func.func @transform_17(%arg0: i32) -> (i32, i32) {
    %c0_i32 = arith.constant 0 : i32
    %c0_i32_0 = arith.constant 0 : i32
    %c0_i32_1 = arith.constant 0 : i32
    return %c0_i32, %c0_i32_0 : i32, i32
  }
  func.func @transform_18(%arg0: i32) -> (i32, i32) {
    %c0_i32 = arith.constant 0 : i32
    %c0_i32_0 = arith.constant 0 : i32
    %c0_i32_1 = arith.constant 0 : i32
    return %c0_i32, %c0_i32_0 : i32, i32
  }
}

</mosaic_0001>

<bundles_post_ra>
// kernel: transformer_forward.1
= control target key start
LH: loop header
LB: loop body
LE: loop exit
PB: predicated region body
PF: predicated region fallthrough
CT: control target
= control target key end

     0   :  { %s6796_s0 = inlined_call_operand.vmem [shape: s32[16,1], index: 0, kind: input, shape index: {}]   ;;  %s6797_s1 = inlined_call_operand.vmem [shape: f32[16,16], index: 1, kind: input, shape index: {}]   ;;  %s6798_s2 = inlined_call_operand.vmem [shape: bf16[2,16], index: 2, kind: input, shape index: {}]   ;;  %s6799_s3 = inlined_call_operand.hbm [shape: bf16[50,64], index: 3, kind: input, shape index: {}]   ;;  %s6800_s4 = inlined_call_operand.vmem [shape: bf16[4,64,192], index: 4, kind: input, shape index: {}]   ;;  %s6801_s5 = inlined_call_operand.vmem [shape: f32[4,1,192], index: 5, kind: input, shape index: {}]   ;;  %s6802_s6 = inlined_call_operand.vmem [shape: bf16[4,64,64], index: 6, kind: input, shape index: {}]   ;;  %s6803_s7 = inlined_call_operand.vmem [shape: f32[4,1,64], index: 7, kind: input, shape index: {}]   ;;  %s6804_s8 = inlined_call_operand.vmem [shape: f32[4,1,64], index: 8, kind: input, shape index: {}]   ;;  %s6805_s9 = inlined_call_operand.vmem [shape: f32[4,1,64], index: 9, kind: input, shape index: {}]   ;;  %s6806_s10 = inlined_call_operand.hbm [shape: bf16[4,64,128], index: 10, kind: input, shape index: {}]   ;;  %s6807_s11 = inlined_call_operand.vmem [shape: f32[4,1,128], index: 11, kind: input, shape index: {}]   ;;  %s6808_s12 = inlined_call_operand.vmem [shape: bf16[4,128,64], index: 12, kind: input, shape index: {}]   ;;  %s6809_s13 = inlined_call_operand.hbm [shape: f32[4,1,64], index: 13, kind: input, shape index: {}]   ;;  %s6810_s14 = inlined_call_operand.vmem [shape: f32[4,1,64], index: 14, kind: input, shape index: {}]   ;;  %s6811_s15 = inlined_call_operand.hbm [shape: f32[4,1,64], index: 15, kind: input, shape index: {}]   ;;  %s6812_s16 = inlined_call_operand.vmem [shape: bf16[64,128], index: 16, kind: input, shape index: {}]   ;;  %s6813_s17 = inlined_call_operand.vmem [shape: f32[1,128], index: 17, kind: input, shape index: {}]   ;;  %s6814_s18 = inlined_call_operand.hbm [shape: f32[2,128], index: 18, kind: output, shape index: {}]  }
   0x1   :  { %6817 = sst [smem:[#allocation15_spill]] %s6796_s0 }
   0x2   :  { %6818 = sst [smem:[#allocation16_spill]] %s6797_s1 }
   0x3   :  { %6819 = sst [smem:[#allocation17_spill]] %s6798_s2 }
   0x4   :  { %23 = vsyncpa [#allocation3], 0 }
   0x5   :  { %24 = vsyncpa [#allocation6], 0 }
   0x6   :  { %25 = vsyncpa [#allocation9], 0 }
   0x7   :  { %26 = vsyncpa [#allocation4], 0  ;;  %s5789_s27 = smov [#allocation5]   ;;  %s5790_s29 = smov [#allocation2]  }
   0x8   :  { %s62_s28 = sshll.u32 %s5789_s27, 4  ;;  %s38_s30 = sshll.u32 %s5790_s29, 4  ;;  %s63_s28 = int_to_ptr.vmem [resolvable:$true] %s62_s28  ;;  %s39_s30 = int_to_ptr.vmem [resolvable:$true] %s38_s30 }
   0x9   :  { %s5689_s0 = scalar_lea.vmem %s63_s28, 2048  ;;  %p5694_p1 = scmp.lt.s32.totalorder %s63_s28, %s63_s28 }
   0xa   :  { %p5690_p0 = scmp.ne.s32.totalorder %s63_s28, %s5689_s0  ;;  %p5695_p2 = scmp.lt.s32.totalorder %s5689_s0, %s5689_s0 }
   0xc   :  { %p5696_p3 = por %p5695_p2, %p5694_p1 }
   0xe   :  { %p5697_p4 = pnand %p5696_p3, %p5690_p0 }
  0x10   :  { %5700 = shalt.err (!%p5697_p4)
}
  0x11   :  { %s5791_s19 = smov 64   ;;  %s5792_s1 = smov 4  }
  0x12   :  { %68 = dma.hbm_to_vmem [thread:$0]  %s6806_s10, 2048, %s63_s28, [#allocation6], %s5791_s19, %s5791_s19, %s5792_s1  }
  0x13   :  { %s5709_s22 = scalar_lea.vmem %s39_s30, 448  ;;  %p5714_p6 = scmp.lt.s32.totalorder %s39_s30, %s39_s30 }
  0x14   :  { %p5710_p5 = scmp.ne.s32.totalorder %s39_s30, %s5709_s22  ;;  %p5715_p7 = scmp.lt.s32.totalorder %s5709_s22, %s5709_s22 }
  0x16   :  { %p5716_p8 = por %p5715_p7, %p5714_p6 }
  0x18   :  { %p5717_p9 = pnand %p5716_p8, %p5710_p5 }
  0x1a   :  { %5720 = shalt.err (!%p5717_p9)
}
  0x1b   :  { %44 = dma.hbm_to_vmem [thread:$0]  %s6799_s3, 448, %s39_s30, [#allocation3], %s5791_s19, %s5791_s19, %s5792_s1  }
  0x1c   :  { %s5793_s24 = smov [#allocation7]  }
  0x1d   :  { %s78_s25 = sshll.u32 %s5793_s24, 4  ;;  %s79_s25 = int_to_ptr.vmem [resolvable:$true] %s78_s25 }
  0x1e   :  { %s5729_s26 = scalar_lea.vmem %s79_s25, 64  ;;  %p5734_p11 = scmp.lt.s32.totalorder %s79_s25, %s79_s25 }
  0x1f   :  { %p5730_p10 = scmp.ne.s32.totalorder %s79_s25, %s5729_s26  ;;  %p5735_p12 = scmp.lt.s32.totalorder %s5729_s26, %s5729_s26 }
  0x21   :  { %p5736_p13 = por %p5735_p12, %p5734_p11 }
  0x23   :  { %p5737_p0 = pnand %p5736_p13, %p5730_p10 }
  0x25   :  { %5740 = shalt.err (!%p5737_p0)
}
  0x26   :  { %s5794_s10 = smov 16   ;;  %s5795_s27 = smov 1  }
  0x27   :  { %84 = dma.hbm_to_vmem [thread:$0]  %s6809_s13, 64, %s79_s25, [#allocation6], %s5794_s10, %s5794_s10, %s5795_s27  }
  0x28   :  { %s5796_s0 = smov [#allocation8]  }
  0x29   :  { %s92_s3 = sshll.u32 %s5796_s0, 4  ;;  %s93_s3 = int_to_ptr.vmem [resolvable:$true] %s92_s3 }
  0x2a   :  { %s5749_s30 = scalar_lea.vmem %s93_s3, 64  ;;  %p5754_p2 = scmp.lt.s32.totalorder %s93_s3, %s93_s3 }
  0x2b   :  { %p5750_p1 = scmp.ne.s32.totalorder %s93_s3, %s5749_s30  ;;  %p5755_p3 = scmp.lt.s32.totalorder %s5749_s30, %s5749_s30 }
  0x2d   :  { %p5756_p4 = por %p5755_p3, %p5754_p2 }
  0x2f   :  { %p5757_p5 = pnand %p5756_p4, %p5750_p1 }
  0x31   :  { %5760 = shalt.err (!%p5757_p5)
}
  0x32   :  { %98 = dma.hbm_to_vmem [thread:$0]  %s6811_s15, 64, %s93_s3, [#allocation9], %s5794_s10, %s5794_s10, %s5795_s27  }
  0x33   :  { %5781 = dma.done.wait [#allocation3], 448  }
  0x34   :  { %5782 = vsyncadd [#allocation3], 4294966848 }
  0x35   :  { %5783 = dma.done.wait [#allocation6], 2112  }
  0x36   :  { %5784 = vsyncadd [#allocation6], 4294965184 }
  0x37   :  { %5785 = dma.done.wait [#allocation9], 64  }
  0x38   :  { %5786 = vsyncadd [#allocation9], 4294967232  ;;  %v5797_v0 = vmov 0   ;;  %v5798_v1 = vmov 0.0   ;;  %s6820_s22 = sld [smem:[#allocation15_spill]]  ;;  %vm165_vm0 = vcmask 1040384   ;;  %v118_v14 = vlaneseq }
  0x39   :  { %5338 = vset.pattern.permute.xlu0 %v5797_v0  ;;  %4923 = vmatprep.subr.bf16.mxu0 %v5798_v1  ;;  %v5399_v4 = vld [vmem:[#allocation2 + $0x18] ss:$0 sps:$4 sm:$0x11]   ;;  %v5400_v6 = vld [vmem:[#allocation2 + $0x10] sm:$0xff]   ;;  %v5401_v9 = vld [vmem:[#allocation2 + $0x8] sm:$0xff]   ;;  %vm5799_vm1 = vmmov 0  }
  0x3a   :  { %309 = vmatprep.mubr.bf16.mxu1 %v5797_v0  ;;  %v167_v5 = vsel %vm165_vm0, %v5399_v4, 0  ;;  %v5403_v7 = vld [vmem:[%s6800_s4 + $0x34] ss:$8 sps:$4 sm:$0xff]   ;;  %v5405_v8 = vld [vmem:[%s6800_s4 + $0x30] ss:$8 sps:$4 sm:$0xff]   ;;  %4931 = vmatprep.mubr.msk.bf16.mxu0 %vm5799_vm1, %v5798_v1  ;;  %v5402_v13 = vld [vmem:[#allocation2] sm:$0xff]  }
  0x3b   :  { %4924 = vmatpush3.bf16.msra.mxu0 %v167_v5  ;;  %v5406_v10 = vld [vmem:[%s6800_s4 + $0x24] ss:$8 sps:$4 sm:$0xff]   ;;  %v5408_v11 = vld [vmem:[%s6800_s4 + $0x20] ss:$8 sps:$4 sm:$0xff]   ;;  %285 = vmatprep.subr.bf16.mxu1 %v5403_v7  ;;  %v5409_v12 = vld [vmem:[%s6800_s4 + $0x14] ss:$8 sps:$4 sm:$0xff]  }
  0x3c   :  { %4925 = vmatprep.subr.bf16.mxu0 %v5798_v1  ;;  %286 = vmatpush1.bf16.msra.mxu1 %v5405_v8  ;;  %v119_v15 = vand.u32 127, %v118_v14  ;;  %vm161_vm4 = vcmask 408576   ;;  %v5411_v21 = vld [vmem:[%s6800_s4 + $0x10] ss:$8 sps:$4 sm:$0xff]   ;;  %v5412_v22 = vld [vmem:[%s6800_s4 + $0x4] ss:$8 sps:$4 sm:$0xff]  }
  0x3d   :  { %287 = vmatprep.subr.bf16.mxu1 %v5406_v10  ;;  %v5414_v23 = vld [vmem:[%s6800_s4] ss:$8 sps:$4 sm:$0xff]   ;;  %vm273_vm5 = vcmask 523264   ;;  %v224_v29 = vshrl.u32 %v118_v14, 7  ;;  %s5800_s24 = smov 112   ;;  %s5801_s25 = smov 96  }
  0x3e   :  { %v116_v2 = vld [vmem:[%s6820_s22] sm:$0xff]  ;;  %v117_v3 = vld [vmem:[%s6820_s22 + $0x8] sm:$0xff]  ;;  %s5802_s26 = smov 80   ;;  %vm363_vm6 = vcmask 130048   ;;  %s6821_s29 = sld [smem:[#allocation16_spill]]  ;;  %vm854_vm7 = vcmask 261120  }
  0x3f   :  { %121 = vperm.xlu0 %5338, %v116_v2   ;;  %4926 = vmatpush3.bf16.msra.mxu0 %v5400_v6  ;;  %v5974_v30 = vsub.s32 0, %v224_v29  ;;  %v221_v31 = vld [vmem:[%s6801_s5] sm:$0x3]  ;;  %v5980_v33 = vsub.s32 1, %v224_v29  ;;  %s5803_s23 = smov 32   ;;  %s5804_s27 = smov 48  }
  0x40   :  { %4927 = vmatprep.subr.bf16.mxu0 %v5798_v1  ;;  %288 = vmatpush1.bf16.msra.mxu1 %v5408_v11  ;;  %vm857_vm8 = vcmask 392192  }
  0x41   :  { %289 = vmatprep.subr.bf16.mxu1 %v5409_v12  ;;  %v226_v32 = vrot.slane %v221_v31, %v5974_v30  ;;  %v230_v37 = vrot.slane %v221_v31, %v5980_v33 }
  0x43   :  { %124 = vperm.xlu0 %5338, %v117_v3   ;;  %4928 = vmatpush3.bf16.msra.mxu0 %v5401_v9 }
  0x44   :  { %4929 = vmatprep.subr.bf16.mxu0 %v5798_v1  ;;  %290 = vmatpush1.bf16.msra.mxu1 %v5411_v21  ;;  %v6011_v62 = vld [vmem:[%s6821_s29] sm:$0xff]  ;;  %v6017_v4 = vld [vmem:[%s6821_s29 + $0x8] sm:$0xff] }
  0x45   :  { %291 = vmatprep.subr.bf16.mxu1 %v5412_v22 }
  0x47   :  { %4930 = vmatpush3.bf16.msra.mxu0 %v5402_v13 }
  0x48   :  { %4935 = vmatprep.subr.bf16.mxu0 %v5798_v1  ;;  %292 = vmatpush1.bf16.msra.mxu1 %v5414_v23 }
  0x49   :  { %4941 = vmatprep.subr.bf16.mxu1 %v5798_v1 }
  0xba   :  { %v122_v16 = vpop.permute.xlu0 %121 }
  0xbb   :  { %vm126_vm2 = vcmp.eq.s32.totalorder %v122_v16, %v119_v15 }
  0xbc   :  { %v4475_v18 = vsel %vm126_vm2, 1.0, %v5798_v1 }
  0xbe   :  { %v125_v17 = vpop.permute.xlu0 %124 }
  0xbf   :  { %vm127_vm3 = vcmp.eq.s32.totalorder %v125_v17, %v119_v15 }
  0xc0   :  { %v4476_v19 = vsel %vm127_vm3, 1.0, %v5798_v1 }
  0xc1   :  { %v132_v20 = vpack.c.bf16 %v4476_v19, %v4475_v18 }
  0xc3   :  { %4932 = vmatmul.mubr.msk.bf16.vlgmr.msra.gmra.mxu0 %vm161_vm4, %v132_v20 }
  0xc4   :  { %4937 = vmatprep.mubr.msk.bf16.mxu0 %vm5799_vm1, %v5798_v1 }
 0x183   :  { %v5965_v24 = vpop.f32.mrf.mxu0 }
 0x185   :  { %v4933_v25 = vpop.f32.mrf.mxu0 }
 0x187   :  { %v5967_v26 = vpop.f32.mrf.mxu0 }
 0x188   :  { %v212_v27 = vpack.c.bf16 %v5967_v26, %v5965_v24 }
 0x189   :  { %v4934_v28 = vpop.f32.mrf.mxu0 }
 0x18a   :  { %4490 = vmatmul.mubr.msk.bf16.vlgmr.msra.gmra.mxu1 %vm273_vm5, %v212_v27 }
 0x18b   :  { %4943 = vmatprep.mubr.msk.bf16.mxu1 %vm5799_vm1, %v5798_v1 }
 0x24a   :  { %v311_v34 = vpop.f32.mrf.mxu1 }
 0x24b   :  { %v312_v35 = vadd.f32 %v311_v34, %v226_v32 }
 0x24c   :  { %v313_v36 = vpop.f32.mrf.mxu1 }
 0x24d   :  { %322 = vrot.lane.b32.xlu1 %v312_v35, %s5791_s19  ;;  %v314_v41 = vadd.f32 %v313_v36, %v230_v37 }
 0x24e   :  { %v315_v38 = vpop.f32.mrf.mxu1 }
 0x24f   :  { %v316_v39 = vadd.f32 %v315_v38, %v226_v32 }
 0x250   :  { %v317_v40 = vpop.f32.mrf.mxu1 }
 0x251   :  { %v360_v42 = vpack.c.bf16 %v316_v39, %v312_v35  ;;  %v318_v43 = vadd.f32 %v317_v40, %v230_v37  ;;  %324 = vrot.lane.b32.xlu1 %v316_v39, %s5791_s19 }
 0x253   :  { %v5985_v44 = vpack.c.bf16 %v318_v43, %v314_v41  ;;  %477 = vrot.lane.b32.xlu0 %v360_v42, %s5800_s24 }
 0x255   :  { %4942 = vmatpush3.bf16.msra.mxu1 %v5985_v44  ;;  %595 = vrot.lane.b32.xlu1 %v360_v42, %s5801_s25 }
 0x256   :  { %4953 = vmatprep.subr.bf16.mxu1 %v5798_v1 }
 0x259   :  { %712 = vrot.lane.b32.xlu1 %v360_v42, %s5802_s26 }
 0x2bf   :  { %v323_v45 = vpop.permute.xlu1 %322 }
 0x2c0   :  { %328 = vxpose.xlu0.b32.start [1/2] (short) (narrow) %v323_v45, 64 }
 0x2c3   :  { %v325_v46 = vpop.permute.xlu1 %324 }
 0x2c4   :  { %329 = vxpose.xlu0.b32.end [2/2] (short) (narrow) %v325_v46, 64 }
 0x2c5   :  { %v478_v47 = vpop.permute.xlu0 %477 }
 0x2c7   :  { %v596_v58 = vpop.permute.xlu1 %595 }
 0x2cb   :  { %v713_v61 = vpop.permute.xlu1 %712 }
 0x33c   :  { %v344_v48 = vpop.trf.xlu0 }
 0x340   :  { %v345_v49 = vpop.trf.xlu0 }
 0x341   :  { %v361_v50 = vpack.c.bf16 %v345_v49, %v344_v48 }
 0x343   :  { %4936 = vmatpush3.bf16.msra.mxu0 %v361_v50 }
 0x344   :  { %v346_v51 = vpop.trf.xlu0  ;;  %4947 = vmatprep.subr.bf16.mxu0 %v5798_v1 }
 0x346   :  { %4938 = vmatmul.mubr.msk.bf16.vlgmr.msra.gmra.mxu0 %vm363_vm6, %v360_v42 }
 0x347   :  { %4949 = vmatprep.mubr.msk.bf16.mxu0 %vm5799_vm1, %v5798_v1 }
 0x348   :  { %v347_v52 = vpop.trf.xlu0 }
 0x349   :  { %v475_v53 = vpack.c.bf16 %v347_v52, %v346_v51 }
 0x34b   :  { %4948 = vmatpush3.bf16.msra.mxu0 %v475_v53 }
 0x34c   :  { %v348_v54 = vpop.trf.xlu0  ;;  %4959 = vmatprep.subr.bf16.mxu0 %v5798_v1 }
 0x34e   :  { %4950 = vmatmul.mubr.msk.bf16.vlgmr.msra.gmra.mxu0 %vm363_vm6, %v478_v47 }
 0x34f   :  { %4961 = vmatprep.mubr.msk.bf16.mxu0 %vm5799_vm1, %v5798_v1 }
 0x350   :  { %v349_v55 = vpop.trf.xlu0 }
 0x351   :  { %v594_v56 = vpack.c.bf16 %v349_v55, %v348_v54 }
 0x353   :  { %4960 = vmatpush3.bf16.msra.mxu0 %v594_v56 }
 0x354   :  { %v350_v57 = vpop.trf.xlu0  ;;  %4971 = vmatprep.subr.bf16.mxu0 %v5798_v1 }
 0x356   :  { %4962 = vmatmul.mubr.msk.bf16.vlgmr.msra.gmra.mxu0 %vm363_vm6, %v596_v58 }
 0x357   :  { %4973 = vmatprep.mubr.msk.bf16.mxu0 %vm5799_vm1, %v5798_v1 }
 0x358   :  { %v351_v59 = vpop.trf.xlu0 }
 0x359   :  { %v711_v60 = vpack.c.bf16 %v351_v59, %v350_v57 }
 0x35b   :  { %4972 = vmatpush3.bf16.msra.mxu0 %v711_v60 }
 0x35c   :  { %4983 = vmatprep.subr.bf16.mxu0 %v5798_v1 }
 0x35e   :  { %4974 = vmatmul.mubr.msk.bf16.vlgmr.msra.gmra.mxu0 %vm363_vm6, %v713_v61 }
 0x35f   :  { %4991 = vmatprep.mubr.msk.bf16.mxu0 %vm5799_vm1, %v5798_v1 }
 0x406   :  { %v401_v63 = vpop.f32.mrf.mxu0 }
 0x407   :  { %v402_v2 = vadd.f32 %v401_v63, %v6011_v62 }
 0x408   :  { %v4939_v3 = vpop.f32.mrf.mxu0 }
 0x409   :  { %v408_v5 = vsel %vm363_vm6, %v402_v2, -inf }
 0x40a   :  { %409 = vmax.xlane.f32.xlu1 %v408_v5  ;;  %v404_v6 = vpop.f32.mrf.mxu0 }
 0x40b   :  { %v405_v7 = vadd.f32 %v404_v6, %v6017_v4 }
 0x40c   :  { %v4940_v8 = vpop.f32.mrf.mxu0 }
 0x40d   :  { %v411_v9 = vsel %vm363_vm6, %v405_v7, -inf }
 0x40e   :  { %412 = vmax.xlane.f32.xlu0 %v411_v9  ;;  %v516_v10 = vpop.f32.mrf.mxu0 }
 0x40f   :  { %v517_v11 = vadd.f32 %v516_v10, %v6011_v62 }
 0x410   :  { %v4951_v12 = vpop.f32.mrf.mxu0 }
 0x411   :  { %v523_v13 = vsel %vm363_vm6, %v517_v11, -inf }
 0x412   :  { %524 = vmax.xlane.f32.xlu1 %v523_v13  ;;  %v519_v14 = vpop.f32.mrf.mxu0 }
 0x413   :  { %v520_v15 = vadd.f32 %v519_v14, %v6017_v4 }
 0x414   :  { %v4952_v16 = vpop.f32.mrf.mxu0 }
 0x415   :  { %v526_v17 = vsel %vm363_vm6, %v520_v15, -inf }
 0x416   :  { %527 = vmax.xlane.f32.xlu1 %v526_v17  ;;  %v634_v18 = vpop.f32.mrf.mxu0 }
 0x417   :  { %v635_v19 = vadd.f32 %v634_v18, %v6011_v62 }
 0x418   :  { %v4963_v20 = vpop.f32.mrf.mxu0 }
 0x419   :  { %v641_v21 = vsel %vm363_vm6, %v635_v19, -inf }
 0x41a   :  { %642 = vmax.xlane.f32.xlu1 %v641_v21  ;;  %v637_v22 = vpop.f32.mrf.mxu0 }
 0x41b   :  { %v638_v23 = vadd.f32 %v637_v22, %v6017_v4 }
 0x41c   :  { %v4964_v25 = vpop.f32.mrf.mxu0 }
 0x41d   :  { %v644_v27 = vsel %vm363_vm6, %v638_v23, -inf }
 0x41e   :  { %645 = vmax.xlane.f32.xlu1 %v644_v27  ;;  %v751_v28 = vpop.f32.mrf.mxu0 }
 0x41f   :  { %v752_v29 = vadd.f32 %v751_v28, %v6011_v62 }
 0x420   :  { %v4975_v31 = vpop.f32.mrf.mxu0 }
 0x421   :  { %v758_v32 = vsel %vm363_vm6, %v752_v29, -inf }
 0x422   :  { %759 = vmax.xlane.f32.xlu1 %v758_v32  ;;  %v754_v34 = vpop.f32.mrf.mxu0 }
 0x423   :  { %v755_v35 = vadd.f32 %v754_v34, %v6017_v4 }
 0x424   :  { %664 = vrot.lane.b32.xlu0 %v5985_v44, %s5801_s25  ;;  %v4976_v36 = vpop.f32.mrf.mxu0 }
 0x425   :  { %v761_v37 = vsel %vm363_vm6, %v755_v35, -inf }
 0x426   :  { %762 = vmax.xlane.f32.xlu1 %v761_v37 }
 0x437   :  { %547 = vrot.lane.b32.xlu1 %v5985_v44, %s5800_s24 }
 0x493   :  { %v410_v38 = vpop.xlane.xlu1 %409 }
 0x494   :  { %v414_v39 = vsub.f32 %v402_v2, %v410_v38 }
 0x496   :  { %v416_v40 = vmul.f32 1.442695, %v414_v39 }
 0x497   :  { %v413_v41 = vpop.xlane.xlu0 %412 }
 0x498   :  { %5519 = vpow2.f32 %v416_v40  ;;  %v415_v42 = vsub.f32 %v405_v7, %v413_v41 }
 0x49a   :  { %v418_v43 = vmul.f32 1.442695, %v415_v42 }
 0x49b   :  { %v525_v45 = vpop.xlane.xlu1 %524  ;;  %v665_v41 = vpop.permute.xlu0 %664 }
 0x49c   :  { %5521 = vpow2.f32 %v418_v43  ;;  %v529_v46 = vsub.f32 %v517_v11, %v525_v45 }
 0x49e   :  { %v531_v47 = vmul.f32 1.442695, %v529_v46 }
 0x49f   :  { %v528_v48 = vpop.xlane.xlu1 %527 }
 0x4a0   :  { %5523 = vpow2.f32 %v531_v47  ;;  %v530_v49 = vsub.f32 %v520_v15, %v528_v48 }
 0x4a2   :  { %v533_v50 = vmul.f32 1.442695, %v530_v49 }
 0x4a3   :  { %v643_v51 = vpop.xlane.xlu1 %642 }
 0x4a4   :  { %5525 = vpow2.f32 %v533_v50  ;;  %v647_v52 = vsub.f32 %v635_v19, %v643_v51 }
 0x4a5   :  { %v5520_v53 = vpop.eup %5519 }
 0x4a6   :  { %v649_v54 = vmul.f32 1.442695, %v647_v52  ;;  %v420_v55 = vsel %vm363_vm6, %v5520_v53, 0.0 }
 0x4a7   :  { %v646_v56 = vpop.xlane.xlu1 %645  ;;  %421 = vadd.xlane.f32.xlu1 %v420_v55 }
 0x4a8   :  { %5527 = vpow2.f32 %v649_v54  ;;  %v648_v57 = vsub.f32 %v638_v23, %v646_v56 }
 0x4a9   :  { %v5522_v58 = vpop.eup %5521 }
 0x4aa   :  { %v651_v59 = vmul.f32 1.442695, %v648_v57  ;;  %v423_v60 = vsel %vm363_vm6, %v5522_v58, 0.0  ;;  %v5415_v57 = vld [vmem:[%s6802_s6 + $0x18] sm:$0xff]  }
 0x4ab   :  { %v760_v61 = vpop.xlane.xlu1 %759  ;;  %424 = vadd.xlane.f32.xlu1 %v423_v60  ;;  %4984 = vmatpush3.bf16.msra.mxu0 %v5415_v57  ;;  %v5419_v57 = vld [vmem:[#allocation5 + $0x18] sm:$0xff]  }
 0x4ac   :  { %5529 = vpow2.f32 %v651_v59  ;;  %v764_v63 = vsub.f32 %v752_v29, %v760_v61  ;;  %4985 = vmatprep.subr.bf16.mxu0 %v5798_v1  ;;  %v5416_v61 = vld [vmem:[%s6802_s6 + $0x10] sm:$0xff]  }
 0x4ad   :  { %v5524_v2 = vpop.eup %5523 }
 0x4ae   :  { %v766_v3 = vmul.f32 1.442695, %v764_v63  ;;  %v535_v5 = vsel %vm363_vm6, %v5524_v2, 0.0 }
 0x4af   :  { %536 = vadd.xlane.f32.xlu1 %v535_v5  ;;  %v763_v6 = vpop.xlane.xlu1 %762  ;;  %4986 = vmatpush3.bf16.msra.mxu0 %v5416_v61  ;;  %v5424_v61 = vld [vmem:[%s6808_s12 + $0x30] sm:$0xff]  }
 0x4b0   :  { %5531 = vpow2.f32 %v766_v3  ;;  %v765_v7 = vsub.f32 %v755_v35, %v763_v6  ;;  %v5417_v3 = vld [vmem:[%s6802_s6 + $0x8] sm:$0xff]   ;;  %4987 = vmatprep.subr.bf16.mxu0 %v5798_v1 }
 0x4b1   :  { %v5526_v8 = vpop.eup %5525 }
 0x4b2   :  { %v768_v9 = vmul.f32 1.442695, %v765_v7  ;;  %v538_v10 = vsel %vm363_vm6, %v5526_v8, 0.0 }
 0x4b3   :  { %539 = vadd.xlane.f32.xlu1 %v538_v10  ;;  %v548_v19 = vpop.permute.xlu1 %547  ;;  %4988 = vmatpush3.bf16.msra.mxu0 %v5417_v3  ;;  %v5427_v3 = vld [vmem:[%s6808_s12 + $0x18] sm:$0xff]  }
 0x4b4   :  { %5533 = vpow2.f32 %v768_v9  ;;  %4989 = vmatprep.subr.bf16.mxu0 %v5798_v1 }
 0x4b5   :  { %v5528_v11 = vpop.eup %5527 }
 0x4b6   :  { %v653_v12 = vsel %vm363_vm6, %v5528_v11, 0.0 }
 0x4b7   :  { %654 = vadd.xlane.f32.xlu1 %v653_v12 }
 0x4b9   :  { %v5530_v13 = vpop.eup %5529 }
 0x4ba   :  { %v656_v14 = vsel %vm363_vm6, %v5530_v13, 0.0 }
 0x4bb   :  { %657 = vadd.xlane.f32.xlu1 %v656_v14 }
 0x4bd   :  { %v5532_v15 = vpop.eup %5531 }
 0x4be   :  { %v770_v16 = vsel %vm363_vm6, %v5532_v15, 0.0 }
 0x4bf   :  { %771 = vadd.xlane.f32.xlu1 %v770_v16 }
 0x4c1   :  { %v5534_v17 = vpop.eup %5533 }
 0x4c2   :  { %v773_v18 = vsel %vm363_vm6, %v5534_v17, 0.0 }
 0x4c3   :  { %774 = vadd.xlane.f32.xlu1 %v773_v18 }
 0x4d4   :  { %781 = vrot.lane.b32.xlu1 %v5985_v44, %s5802_s26 }
 0x530   :  { %v422_v20 = vpop.xlane.xlu1 %421 }
 0x531   :  { %5535 = vrcp.f32 %v422_v20 }
 0x534   :  { %v425_v21 = vpop.xlane.xlu1 %424 }
 0x535   :  { %5537 = vrcp.f32 %v425_v21 }
 0x538   :  { %v537_v22 = vpop.xlane.xlu1 %536 }
 0x539   :  { %5539 = vrcp.f32 %v537_v22 }
 0x53c   :  { %v540_v23 = vpop.xlane.xlu1 %539 }
 0x53d   :  { %5541 = vrcp.f32 %v540_v23 }
 0x53e   :  { %v5536_v25 = vpop.eup %5535 }
 0x53f   :  { %v428_v29 = vmul.f32 %v5536_v25, %v5520_v53 }
 0x540   :  { %v655_v27 = vpop.xlane.xlu1 %654 }
 0x541   :  { %5543 = vrcp.f32 %v655_v27 }
 0x542   :  { %v5538_v28 = vpop.eup %5537 }
 0x543   :  { %v429_v31 = vmul.f32 %v5538_v28, %v5522_v58 }
 0x544   :  { %v658_v32 = vpop.xlane.xlu1 %657 }
 0x545   :  { %5545 = vrcp.f32 %v658_v32  ;;  %v430_v34 = vpack.c.bf16 %v429_v31, %v428_v29 }
 0x546   :  { %v5540_v44 = vpop.eup %5539 }
 0x547   :  { %4944 = vmatmul.mubr.msk.bf16.vlgmr.msra.gmra.mxu1 %vm363_vm6, %v430_v34  ;;  %v543_v37 = vmul.f32 %v5540_v44, %v5524_v2 }
 0x548   :  { %4954 = vmatpush3.bf16.msra.mxu1 %v548_v19  ;;  %v772_v35 = vpop.xlane.xlu1 %771  ;;  %4955 = vmatprep.mubr.msk.bf16.mxu1 %vm5799_vm1, %v5798_v1 }
 0x549   :  { %4965 = vmatprep.subr.bf16.mxu1 %v5798_v1  ;;  %5547 = vrcp.f32 %v772_v35 }
 0x54a   :  { %v5542_v36 = vpop.eup %5541 }
 0x54b   :  { %v544_v38 = vmul.f32 %v5542_v36, %v5526_v8  ;;  %v5418_v8 = vld [vmem:[%s6802_s6] sm:$0xff]  }
 0x54c   :  { %v775_v39 = vpop.xlane.xlu1 %774  ;;  %4990 = vmatpush3.bf16.msra.mxu0 %v5418_v8  ;;  %v4499_v36 = vld [vmem:[%s6803_s7] ss:$0 sm:$0xff] }
 0x54d   :  { %5549 = vrcp.f32 %v775_v39  ;;  %v545_v40 = vpack.c.bf16 %v544_v38, %v543_v37  ;;  %5007 = vmatprep.subr.bf16.mxu0 %v5798_v1 }
 0x54e   :  { %v5544_v42 = vpop.eup %5543 }
 0x54f   :  { %4956 = vmatmul.mubr.msk.bf16.vlgmr.msra.gmra.mxu1 %vm363_vm6, %v545_v40  ;;  %v661_v45 = vmul.f32 %v5544_v42, %v5528_v11 }
 0x550   :  { %4966 = vmatpush3.bf16.msra.mxu1 %v665_v41  ;;  %4967 = vmatprep.mubr.msk.bf16.mxu1 %vm5799_vm1, %v5798_v1  ;;  %v782_v48 = vpop.permute.xlu1 %781 }
 0x551   :  { %4977 = vmatprep.subr.bf16.mxu1 %v5798_v1 }
 0x552   :  { %v5546_v43 = vpop.eup %5545 }
 0x553   :  { %v662_v46 = vmul.f32 %v5546_v43, %v5530_v13 }
 0x555   :  { %v663_v47 = vpack.c.bf16 %v662_v46, %v661_v45 }
 0x556   :  { %v5548_v49 = vpop.eup %5547 }
 0x557   :  { %4968 = vmatmul.mubr.msk.bf16.vlgmr.msra.gmra.mxu1 %vm363_vm6, %v663_v47  ;;  %v778_v51 = vmul.f32 %v5548_v49, %v5532_v15 }
 0x558   :  { %4978 = vmatpush3.bf16.msra.mxu1 %v782_v48  ;;  %4979 = vmatprep.mubr.msk.bf16.mxu1 %vm5799_vm1, %v5798_v1 }
 0x559   :  { %4995 = vmatprep.subr.bf16.mxu1 %v5798_v1 }
 0x55a   :  { %v5550_v50 = vpop.eup %5549 }
 0x55b   :  { %v779_v52 = vmul.f32 %v5550_v50, %v5534_v17 }
 0x55d   :  { %v780_v53 = vpack.c.bf16 %v779_v52, %v778_v51 }
 0x55f   :  { %4980 = vmatmul.mubr.msk.bf16.vlgmr.msra.gmra.mxu1 %vm363_vm6, %v780_v53 }
 0x560   :  { %5003 = vmatprep.mubr.msk.bf16.mxu1 %vm5799_vm1, %v5798_v1  ;;  %4996 = vmatpush3.bf16.msra.mxu1 %v5419_v57 }
 0x561   :  { %4997 = vmatprep.subr.bf16.mxu1 %v5798_v1 }
 0x607   :  { %v468_v54 = vpop.f32.mrf.mxu1 }
 0x609   :  { %v4945_v55 = vpop.f32.mrf.mxu1 }
 0x60b   :  { %v471_v56 = vpop.f32.mrf.mxu1 }
 0x60d   :  { %v4946_v58 = vpop.f32.mrf.mxu1 }
 0x60e   :  { %v5421_v58 = vld [vmem:[#allocation5 + $0x8] sm:$0xff]  }
 0x60f   :  { %v587_v59 = vpop.f32.mrf.mxu1 }
 0x611   :  { %v4957_v60 = vpop.f32.mrf.mxu1 }
 0x612   :  { %v5423_v60 = vld [vmem:[%s6808_s12 + $0x38] sm:$0xff]  }
 0x613   :  { %v590_v63 = vpop.f32.mrf.mxu1 }
 0x614   :  { %v5339_v2 = vpack.i.bf16 %v590_v63, %v587_v59  ;;  %v5422_v59 = vld [vmem:[#allocation5] sm:$0xff]   ;;  %v5425_v63 = vld [vmem:[%s6808_s12 + $0x28] sm:$0xff]  }
 0x615   :  { %v4958_v5 = vpop.f32.mrf.mxu1 }
 0x616   :  { %5340 = vrot.lane.b32.xlu1 %v5339_v2, %s5794_s10  ;;  %v5426_v2 = vld [vmem:[%s6808_s12 + $0x20] sm:$0xff]  }
 0x617   :  { %v704_v6 = vpop.f32.mrf.mxu1 }
 0x619   :  { %v4969_v7 = vpop.f32.mrf.mxu1 }
 0x61b   :  { %v707_v9 = vpop.f32.mrf.mxu1 }
 0x61c   :  { %v5344_v10 = vpack.i.bf16 %v707_v9, %v704_v6 }
 0x61d   :  { %v4970_v11 = vpop.f32.mrf.mxu1 }
 0x61e   :  { %5345 = vrot.lane.b32.xlu1 %v5344_v10, %s5803_s23 }
 0x61f   :  { %v821_v12 = vpop.f32.mrf.mxu1 }
 0x621   :  { %v4981_v13 = vpop.f32.mrf.mxu1 }
 0x622   :  { %v4505_v13 = vld [vmem:[%s6804_s8] ss:$0 sm:$0xff] }
 0x623   :  { %v824_v14 = vpop.f32.mrf.mxu1 }
 0x624   :  { %v5349_v15 = vpack.i.bf16 %v824_v14, %v821_v12 }
 0x625   :  { %v4982_v16 = vpop.f32.mrf.mxu1 }
 0x626   :  { %5350 = vrot.lane.b32.xlu0 %v5349_v15, %s5804_s27 }
 0x688   :  { %v5341_v17 = vpop.permute.xlu1 %5340 }
 0x689   :  { %v5343_v19 = vunpack.i.h.bf16 %v5341_v17  ;;  %v5342_v20 = vunpack.i.l.bf16 %v5341_v17  ;;  %v4506_v17 = vld [vmem:[%s6805_s9] ss:$0 sm:$0xff] }
 0x68b   :  { %v853_v25 = vsel %vm363_vm6, %v471_v56, %v5343_v19  ;;  %v852_v27 = vsel %vm363_vm6, %v468_v54, %v5342_v20 }
 0x690   :  { %v5346_v18 = vpop.permute.xlu1 %5345 }
 0x691   :  { %v5348_v21 = vunpack.i.h.bf16 %v5346_v18  ;;  %v5347_v22 = vunpack.i.l.bf16 %v5346_v18 }
 0x693   :  { %v855_v31 = vsel %vm854_vm7, %v852_v27, %v5347_v22  ;;  %v856_v32 = vsel %vm854_vm7, %v853_v25, %v5348_v21  ;;  %v5428_v22 = vld [vmem:[%s6808_s12 + $0x10] sm:$0xff]   ;;  %v5430_v25 = vld [vmem:[%s6808_s12] sm:$0xff]  }
 0x694   :  { %v4507_v27 = vld [vmem:[%s6807_s11] ss:$0 sm:$0xff] }
 0x698   :  { %v5351_v23 = vpop.permute.xlu0 %5350 }
 0x699   :  { %v5353_v28 = vunpack.i.h.bf16 %v5351_v23  ;;  %v5352_v29 = vunpack.i.l.bf16 %v5351_v23  ;;  %v5429_v23 = vld [vmem:[%s6808_s12 + $0x8] sm:$0xff]  }
 0x69b   :  { %v858_v34 = vsel %vm857_vm8, %v855_v31, %v5352_v29  ;;  %v859_v44 = vsel %vm857_vm8, %v856_v32, %v5353_v28 }
 0x69c   :  { %v860_v35 = vpack.c.bf16 %v859_v44, %v858_v34 }
 0x69e   :  { %4992 = vmatmul.mubr.msk.bf16.vlgmr.msra.gmra.mxu0 %vm273_vm5, %v860_v35 }
 0x69f   :  { %5023 = vmatprep.mubr.msk.bf16.mxu0 %vm5799_vm1, %v5798_v1  ;;  %5008 = vmatpush3.bf16.msra.mxu0 %v5423_v60  ;;  %v5436_v60 = vld [vmem:[%s6800_s4 + $0x64] ss:$8 sps:$4 sm:$0xff]  }
 0x6a0   :  { %5009 = vmatprep.subr.bf16.mxu0 %v5798_v1 }
 0x6a3   :  { %5010 = vmatpush3.bf16.msra.mxu0 %v5424_v61  ;;  %v5434_v61 = vld [vmem:[%s6800_s4 + $0x60] ss:$8 sps:$4 sm:$0xff]  }
 0x6a4   :  { %5011 = vmatprep.subr.bf16.mxu0 %v5798_v1 }
 0x6a7   :  { %5012 = vmatpush3.bf16.msra.mxu0 %v5425_v63  ;;  %v5439_v63 = vld [vmem:[%s6800_s4 + $0x54] ss:$8 sps:$4 sm:$0xff]  }
 0x6a8   :  { %5013 = vmatprep.subr.bf16.mxu0 %v5798_v1 }
 0x6ab   :  { %5014 = vmatpush3.bf16.msra.mxu0 %v5426_v2  ;;  %v5437_v2 = vld [vmem:[%s6800_s4 + $0x50] ss:$8 sps:$4 sm:$0xff]  }
 0x6ac   :  { %5015 = vmatprep.subr.bf16.mxu0 %v5798_v1 }
 0x6af   :  { %5016 = vmatpush3.bf16.msra.mxu0 %v5427_v3  ;;  %v5442_v3 = vld [vmem:[%s6800_s4 + $0x44] ss:$8 sps:$4 sm:$0xff]  }
 0x6b0   :  { %5017 = vmatprep.subr.bf16.mxu0 %v5798_v1 }
 0x6b3   :  { %5018 = vmatpush3.bf16.msra.mxu0 %v5428_v22 }
 0x6b4   :  { %5019 = vmatprep.subr.bf16.mxu0 %v5798_v1 }
 0x6b7   :  { %5020 = vmatpush3.bf16.msra.mxu0 %v5429_v23  ;;  %v4532_v23 = vld [vmem:[%s6801_s5 + $0x2] sm:$0x3] }
 0x6b8   :  { %5021 = vmatprep.subr.bf16.mxu0 %v5798_v1 }
 0x6bb   :  { %5022 = vmatpush3.bf16.msra.mxu0 %v5430_v25  ;;  %v1252_v25 = vrot.slane %v4532_v23, %v5974_v30 }
 0x6bc   :  { %5039 = vmatprep.subr.bf16.mxu0 %v5798_v1 }
 0x75e   :  { %v937_v37 = vpop.f32.mrf.mxu0 }
 0x75f   :  { %v938_v38 = vadd.f32 %v4499_v36, %v937_v37 }
 0x760   :  { %v4993_v39 = vpop.f32.mrf.mxu0 }
 0x761   :  { %v944_v40 = vadd.f32 %v938_v38, %v5965_v24  ;;  %v4513_v38 = vld [vmem:[#allocation7] ss:$0 sm:$0xff] }
 0x762   :  { %v940_v41 = vpop.f32.mrf.mxu0 }
 0x763   :  { %v941_v42 = vadd.f32 %v4499_v36, %v940_v41  ;;  %v948_v43 = vsel %vm273_vm5, %v944_v40, 0.0 }
 0x764   :  { %949 = vadd.xlane.f32.xlu1 %v948_v43  ;;  %v4994_v45 = vpop.f32.mrf.mxu0 }
 0x765   :  { %v945_v46 = vadd.f32 %v941_v42, %v5967_v26  ;;  %v5420_v26 = vld [vmem:[#allocation5 + $0x10] sm:$0xff]  }
 0x766   :  { %4998 = vmatpush3.bf16.msra.mxu1 %v5420_v26 }
 0x767   :  { %v951_v47 = vsel %vm273_vm5, %v945_v46, 0.0  ;;  %4999 = vmatprep.subr.bf16.mxu1 %v5798_v1 }
 0x768   :  { %952 = vadd.xlane.f32.xlu0 %v951_v47 }
 0x76a   :  { %5000 = vmatpush3.bf16.msra.mxu1 %v5421_v58  ;;  %v5433_v58 = vld [vmem:[%s6800_s4 + $0x74] ss:$8 sps:$4 sm:$0xff]  }
 0x76b   :  { %5001 = vmatprep.subr.bf16.mxu1 %v5798_v1 }
 0x76e   :  { %5002 = vmatpush3.bf16.msra.mxu1 %v5422_v59  ;;  %v5431_v59 = vld [vmem:[%s6800_s4 + $0x70] ss:$8 sps:$4 sm:$0xff]  }
 0x76f   :  { %1310 = vmatprep.subr.bf16.mxu1 %v5433_v58 }
 0x7ed   :  { %v950_v48 = vpop.xlane.xlu1 %949 }
 0x7ee   :  { %v955_v49 = vmul.f32 0.015625, %v950_v48 }
 0x7f0   :  { %v957_v50 = vsub.f32 %v944_v40, %v955_v49 }
 0x7f1   :  { %v953_v51 = vpop.xlane.xlu0 %952 }
 0x7f2   :  { %v956_v52 = vmul.f32 0.015625, %v953_v51  ;;  %v959_v53 = vmul.f32 %v957_v50, %v957_v50 }
 0x7f4   :  { %v958_v54 = vsub.f32 %v945_v46, %v956_v52  ;;  %v961_v24 = vsel %vm273_vm5, %v959_v53, 0.0 }
 0x7f5   :  { %962 = vadd.xlane.f32.xlu0 %v961_v24 }
 0x7f6   :  { %v960_v55 = vmul.f32 %v958_v54, %v958_v54 }
 0x7f8   :  { %v964_v56 = vsel %vm273_vm5, %v960_v55, 0.0 }
 0x7f9   :  { %965 = vadd.xlane.f32.xlu1 %v964_v56 }
 0x87e   :  { %v963_v5 = vpop.xlane.xlu0 %962 }
 0x87f   :  { %v967_v6 = vmul.f32 0.015625, %v963_v5  ;;  %v5440_v5 = vld [vmem:[%s6800_s4 + $0x40] ss:$8 sps:$4 sm:$0xff]  }
 0x881   :  { %v969_v7 = vadd.f32 1e-05, %v967_v6 }
 0x882   :  { %v966_v8 = vpop.xlane.xlu1 %965 }
 0x883   :  { %5551 = vrsqrt.f32 %v969_v7  ;;  %v968_v9 = vmul.f32 0.015625, %v966_v8 }
 0x885   :  { %v970_v10 = vadd.f32 1e-05, %v968_v9 }
 0x887   :  { %5553 = vrsqrt.f32 %v970_v10 }
 0x890   :  { %v5552_v11 = vpop.eup %5551 }
 0x891   :  { %v973_v12 = vmul.f32 %v5552_v11, %v957_v50 }
 0x893   :  { %v981_v16 = vmul.f32 %v4505_v13, %v973_v12 }
 0x894   :  { %v5554_v14 = vpop.eup %5553 }
 0x895   :  { %v974_v15 = vmul.f32 %v5554_v14, %v958_v54  ;;  %v989_v19 = vadd.f32 %v4506_v17, %v981_v16  ;;  %v4522_v14 = vld [vmem:[%s6810_s14] ss:$0 sm:$0xff] }
 0x897   :  { %v982_v18 = vmul.f32 %v4505_v13, %v974_v15 }
 0x899   :  { %v990_v20 = vadd.f32 %v4506_v17, %v982_v18  ;;  %v4523_v18 = vld [vmem:[#allocation8] ss:$0 sm:$0xff] }
 0x89b   :  { %v991_v21 = vpack.c.bf16 %v990_v20, %v989_v19 }
 0x89d   :  { %5004 = vmatmul.mubr.msk.bf16.vlgmr.msra.gmra.mxu1 %vm273_vm5, %v991_v21 }
 0x89e   :  { %1334 = vmatprep.mubr.bf16.mxu1 %v5797_v0  ;;  %1311 = vmatpush1.bf16.msra.mxu1 %v5431_v59 }
 0x89f   :  { %1312 = vmatprep.subr.bf16.mxu1 %v5436_v60 }
 0x8a2   :  { %1313 = vmatpush1.bf16.msra.mxu1 %v5434_v61 }
 0x8a3   :  { %1314 = vmatprep.subr.bf16.mxu1 %v5439_v63 }
 0x8a6   :  { %1315 = vmatpush1.bf16.msra.mxu1 %v5437_v2 }
 0x8a7   :  { %1316 = vmatprep.subr.bf16.mxu1 %v5442_v3 }
 0x8aa   :  { %1317 = vmatpush1.bf16.msra.mxu1 %v5440_v5 }
 0x8ab   :  { %5027 = vmatprep.subr.bf16.mxu1 %v5798_v1 }
 0x95d   :  { %v1068_v28 = vpop.f32.mrf.mxu1 }
 0x95e   :  { %v1069_v31 = vadd.f32 %v4507_v27, %v1068_v28 }
 0x95f   :  { %v5005_v29 = vpop.f32.mrf.mxu1 }
 0x960   :  { %v1075_v35 = vmax.f32 %v1069_v31, 0.0 }
 0x961   :  { %v1071_v32 = vpop.f32.mrf.mxu1 }
 0x962   :  { %v1072_v34 = vadd.f32 %v4507_v27, %v1071_v32 }
 0x963   :  { %v5006_v44 = vpop.f32.mrf.mxu1 }
 0x964   :  { %v1076_v36 = vmax.f32 %v1072_v34, 0.0 }
 0x966   :  { %v1077_v37 = vpack.c.bf16 %v1076_v36, %v1075_v35 }
 0x968   :  { %5024 = vmatmul.mubr.bf16.vlgmr.msra.gmra.mxu0 %v1077_v37 }
 0x969   :  { %5041 = vmatprep.mubr.msk.bf16.mxu0 %vm5799_vm1, %v5798_v1 }
 0xa28   :  { %v1183_v39 = vpop.f32.mrf.mxu0 }
 0xa29   :  { %v1184_v40 = vadd.f32 %v4513_v38, %v1183_v39  ;;  %v1256_v39 = vrot.slane %v4532_v23, %v5980_v33 }
 0xa2a   :  { %v5025_v41 = vpop.f32.mrf.mxu0 }
 0xa2b   :  { %v1190_v42 = vadd.f32 %v1184_v40, %v989_v19 }
 0xa2c   :  { %v1186_v43 = vpop.f32.mrf.mxu0 }
 0xa2d   :  { %v1187_v45 = vadd.f32 %v4513_v38, %v1186_v43  ;;  %v1194_v46 = vsel %vm273_vm5, %v1190_v42, 0.0 }
 0xa2e   :  { %1195 = vadd.xlane.f32.xlu0 %v1194_v46  ;;  %v5026_v47 = vpop.f32.mrf.mxu0 }
 0xa2f   :  { %v1191_v48 = vadd.f32 %v1187_v45, %v990_v20 }
 0xa31   :  { %v1197_v49 = vsel %vm273_vm5, %v1191_v48, 0.0 }
 0xa32   :  { %1198 = vadd.xlane.f32.xlu1 %v1197_v49 }
 0xab7   :  { %v1196_v50 = vpop.xlane.xlu0 %1195 }
 0xab8   :  { %v1200_v51 = vmul.f32 0.015625, %v1196_v50 }
 0xaba   :  { %v1202_v52 = vsub.f32 %v1190_v42, %v1200_v51 }
 0xabb   :  { %v1199_v53 = vpop.xlane.xlu1 %1198 }
 0xabc   :  { %v1201_v54 = vmul.f32 0.015625, %v1199_v53  ;;  %v1204_v24 = vmul.f32 %v1202_v52, %v1202_v52 }
 0xabe   :  { %v1203_v55 = vsub.f32 %v1191_v48, %v1201_v54  ;;  %v1206_v56 = vsel %vm273_vm5, %v1204_v24, 0.0 }
 0xabf   :  { %1207 = vadd.xlane.f32.xlu0 %v1206_v56 }
 0xac0   :  { %v1205_v57 = vmul.f32 %v1203_v55, %v1203_v55 }
 0xac2   :  { %v1209_v26 = vsel %vm273_vm5, %v1205_v57, 0.0 }
 0xac3   :  { %1210 = vadd.xlane.f32.xlu1 %v1209_v26 }
 0xb48   :  { %v1208_v6 = vpop.xlane.xlu0 %1207 }
 0xb49   :  { %v1212_v7 = vmul.f32 0.015625, %v1208_v6 }
 0xb4b   :  { %v1214_v8 = vadd.f32 1e-05, %v1212_v7 }
 0xb4c   :  { %v1211_v9 = vpop.xlane.xlu1 %1210 }
 0xb4d   :  { %5555 = vrsqrt.f32 %v1214_v8  ;;  %v1213_v10 = vmul.f32 0.015625, %v1211_v9 }
 0xb4f   :  { %v1215_v11 = vadd.f32 1e-05, %v1213_v10 }
 0xb51   :  { %5557 = vrsqrt.f32 %v1215_v11 }
 0xb5a   :  { %v5556_v12 = vpop.eup %5555 }
 0xb5b   :  { %v1218_v13 = vmul.f32 %v5556_v12, %v1202_v52 }
 0xb5d   :  { %v1226_v17 = vmul.f32 %v4522_v14, %v1218_v13 }
 0xb5e   :  { %v5558_v15 = vpop.eup %5557 }
 0xb5f   :  { %v1219_v16 = vmul.f32 %v5558_v15, %v1203_v55  ;;  %v6180_v20 = vadd.f32 %v4523_v18, %v1226_v17 }
 0xb61   :  { %v1227_v19 = vmul.f32 %v4522_v14, %v1219_v16 }
 0xb63   :  { %v6182_v21 = vadd.f32 %v4523_v18, %v1227_v19 }
 0xb65   :  { %v1236_v22 = vpack.c.bf16 %v6182_v21, %v6180_v20 }
 0xb67   :  { %4541 = vmatmul.mubr.msk.bf16.vlgmr.msra.gmra.mxu1 %vm273_vm5, %v1236_v22 }
 0xb68   :  { %5029 = vmatprep.mubr.msk.bf16.mxu1 %vm5799_vm1, %v5798_v1 }
 0xc27   :  { %v1336_v27 = vpop.f32.mrf.mxu1 }
 0xc28   :  { %v1337_v28 = vadd.f32 %v1336_v27, %v1252_v25 }
 0xc29   :  { %v1338_v29 = vpop.f32.mrf.mxu1 }
 0xc2a   :  { %1347 = vrot.lane.b32.xlu0 %v1337_v28, %s5791_s19  ;;  %v1339_v43 = vadd.f32 %v1338_v29, %v1256_v39 }
 0xc2b   :  { %v1340_v31 = vpop.f32.mrf.mxu1 }
 0xc2c   :  { %v1341_v32 = vadd.f32 %v1340_v31, %v1252_v25 }
 0xc2d   :  { %v1342_v38 = vpop.f32.mrf.mxu1 }
 0xc2e   :  { %v1385_v34 = vpack.c.bf16 %v1341_v32, %v1337_v28  ;;  %1349 = vrot.lane.b32.xlu1 %v1341_v32, %s5791_s19  ;;  %v1343_v41 = vadd.f32 %v1342_v38, %v1256_v39 }
 0xc30   :  { %1619 = vrot.lane.b32.xlu0 %v1385_v34, %s5801_s25  ;;  %v6200_v46 = vpack.c.bf16 %v1343_v41, %v1339_v43 }
 0xc32   :  { %1501 = vrot.lane.b32.xlu1 %v1385_v34, %s5800_s24 }
 0xc34   :  { %1736 = vrot.lane.b32.xlu0 %v1385_v34, %s5802_s26 }
 0xc9c   :  { %v1348_v44 = vpop.permute.xlu0 %1347 }
 0xc9d   :  { %1353 = vxpose.xlu1.b32.start [1/2] (short) (narrow) %v1348_v44, 64 }
 0xca0   :  { %v1350_v35 = vpop.permute.xlu1 %1349 }
 0xca1   :  { %1354 = vxpose.xlu1.b32.end [2/2] (short) (narrow) %v1350_v35, 64 }
 0xca2   :  { %v1620_v53 = vpop.permute.xlu0 %1619 }
 0xca4   :  { %v1502_v36 = vpop.permute.xlu1 %1501 }
 0xca6   :  { %v1737_v55 = vpop.permute.xlu0 %1736 }
 0xd19   :  { %v1369_v37 = vpop.trf.xlu1 }
 0xd1d   :  { %v1370_v40 = vpop.trf.xlu1 }
 0xd1e   :  { %v1386_v42 = vpack.c.bf16 %v1370_v40, %v1369_v37 }
 0xd20   :  { %5028 = vmatpush3.bf16.msra.mxu1 %v1386_v42 }
 0xd21   :  { %v1371_v45 = vpop.trf.xlu1  ;;  %5033 = vmatprep.subr.bf16.mxu1 %v5798_v1 }
 0xd23   :  { %5030 = vmatmul.mubr.msk.bf16.vlgmr.msra.gmra.mxu1 %vm363_vm6, %v1385_v34 }
 0xd24   :  { %5034 = vmatpush3.bf16.msra.mxu1 %v6200_v46  ;;  %5035 = vmatprep.mubr.msk.bf16.mxu1 %vm5799_vm1, %v5798_v1 }
 0xd25   :  { %v1372_v47 = vpop.trf.xlu1  ;;  %5045 = vmatprep.subr.bf16.mxu1 %v5798_v1 }
 0xd26   :  { %v1499_v48 = vpack.c.bf16 %v1372_v47, %v1371_v45 }
 0xd28   :  { %5040 = vmatpush3.bf16.msra.mxu0 %v1499_v48 }
 0xd29   :  { %v1373_v49 = vpop.trf.xlu1  ;;  %5051 = vmatprep.subr.bf16.mxu0 %v5798_v1 }
 0xd2b   :  { %5042 = vmatmul.mubr.msk.bf16.vlgmr.msra.gmra.mxu0 %vm363_vm6, %v1502_v36 }
 0xd2c   :  { %5053 = vmatprep.mubr.msk.bf16.mxu0 %vm5799_vm1, %v5798_v1 }
 0xd2d   :  { %v1374_v50 = vpop.trf.xlu1 }
 0xd2e   :  { %v1618_v51 = vpack.c.bf16 %v1374_v50, %v1373_v49 }
 0xd30   :  { %5052 = vmatpush3.bf16.msra.mxu0 %v1618_v51 }
 0xd31   :  { %v1375_v52 = vpop.trf.xlu1  ;;  %5063 = vmatprep.subr.bf16.mxu0 %v5798_v1 }
 0xd33   :  { %5054 = vmatmul.mubr.msk.bf16.vlgmr.msra.gmra.mxu0 %vm363_vm6, %v1620_v53 }
 0xd34   :  { %5065 = vmatprep.mubr.msk.bf16.mxu0 %vm5799_vm1, %v5798_v1 }
 0xd35   :  { %v1376_v54 = vpop.trf.xlu1 }
 0xd36   :  { %v1735_v24 = vpack.c.bf16 %v1376_v54, %v1375_v52 }
 0xd38   :  { %5064 = vmatpush3.bf16.msra.mxu0 %v1735_v24 }
 0xd39   :  { %5075 = vmatprep.subr.bf16.mxu0 %v5798_v1 }
 0xd3b   :  { %5066 = vmatmul.mubr.msk.bf16.vlgmr.msra.gmra.mxu0 %vm363_vm6, %v1737_v55 }
 0xd3c   :  { %5083 = vmatprep.mubr.msk.bf16.mxu0 %vm5799_vm1, %v5798_v1 }
 0xde3   :  { %v1425_v56 = vpop.f32.mrf.mxu1 }
 0xde4   :  { %v1426_v57 = vadd.f32 %v1425_v56, %v6011_v62 }
 0xde5   :  { %v5031_v26 = vpop.f32.mrf.mxu1 }
 0xde6   :  { %v1432_v58 = vsel %vm363_vm6, %v1426_v57, -inf }
 0xde7   :  { %1433 = vmax.xlane.f32.xlu0 %v1432_v58  ;;  %v1428_v59 = vpop.f32.mrf.mxu1 }
 0xde8   :  { %v1429_v60 = vadd.f32 %v1428_v59, %v6017_v4 }
 0xde9   :  { %v5032_v61 = vpop.f32.mrf.mxu1 }
 0xdea   :  { %v1435_v63 = vsel %vm363_vm6, %v1429_v60, -inf }
 0xdeb   :  { %1436 = vmax.xlane.f32.xlu0 %v1435_v63  ;;  %v1540_v2 = vpop.f32.mrf.mxu0 }
 0xdec   :  { %v1541_v3 = vadd.f32 %v1540_v2, %v6011_v62 }
 0xded   :  { %v5043_v5 = vpop.f32.mrf.mxu0 }
 0xdee   :  { %v1547_v6 = vsel %vm363_vm6, %v1541_v3, -inf }
 0xdef   :  { %1548 = vmax.xlane.f32.xlu0 %v1547_v6  ;;  %v1543_v7 = vpop.f32.mrf.mxu0 }
 0xdf0   :  { %v1544_v8 = vadd.f32 %v1543_v7, %v6017_v4 }
 0xdf1   :  { %v5044_v9 = vpop.f32.mrf.mxu0 }
 0xdf2   :  { %v1550_v10 = vsel %vm363_vm6, %v1544_v8, -inf }
 0xdf3   :  { %1551 = vmax.xlane.f32.xlu1 %v1550_v10  ;;  %v1658_v11 = vpop.f32.mrf.mxu0 }
 0xdf4   :  { %v1659_v12 = vadd.f32 %v1658_v11, %v6011_v62 }
 0xdf5   :  { %v5055_v13 = vpop.f32.mrf.mxu0 }
 0xdf6   :  { %v1665_v14 = vsel %vm363_vm6, %v1659_v12, -inf }
 0xdf7   :  { %1666 = vmax.xlane.f32.xlu0 %v1665_v14  ;;  %v1661_v15 = vpop.f32.mrf.mxu0 }
 0xdf8   :  { %v1662_v16 = vadd.f32 %v1661_v15, %v6017_v4 }
 0xdf9   :  { %v5056_v17 = vpop.f32.mrf.mxu0 }
 0xdfa   :  { %v1668_v18 = vsel %vm363_vm6, %v1662_v16, -inf }
 0xdfb   :  { %1669 = vmax.xlane.f32.xlu0 %v1668_v18  ;;  %v1775_v19 = vpop.f32.mrf.mxu0 }
 0xdfc   :  { %v1776_v22 = vadd.f32 %v1775_v19, %v6011_v62 }
 0xdfd   :  { %v5067_v23 = vpop.f32.mrf.mxu0 }
 0xdfe   :  { %v1782_v25 = vsel %vm363_vm6, %v1776_v22, -inf }
 0xdff   :  { %1783 = vmax.xlane.f32.xlu0 %v1782_v25  ;;  %v1778_v27 = vpop.f32.mrf.mxu0 }
 0xe00   :  { %v1779_v28 = vadd.f32 %v1778_v27, %v6017_v4 }
 0xe01   :  { %v5068_v29 = vpop.f32.mrf.mxu0 }
 0xe02   :  { %v1785_v31 = vsel %vm363_vm6, %v1779_v28, -inf }
 0xe03   :  { %1786 = vmax.xlane.f32.xlu0 %v1785_v31 }
 0xe04   :  { %1688 = vrot.lane.b32.xlu1 %v6200_v46, %s5801_s25 }
 0xe19   :  { %1571 = vrot.lane.b32.xlu0 %v6200_v46, %s5800_s24 }
 0xe70   :  { %v1434_v32 = vpop.xlane.xlu0 %1433 }
 0xe71   :  { %v1438_v34 = vsub.f32 %v1426_v57, %v1434_v32 }
 0xe73   :  { %v1440_v62 = vmul.f32 1.442695, %v1438_v34 }
 0xe74   :  { %v1437_v44 = vpop.xlane.xlu0 %1436 }
 0xe75   :  { %5559 = vpow2.f32 %v1440_v62  ;;  %v1439_v35 = vsub.f32 %v1429_v60, %v1437_v44 }
 0xe77   :  { %v1442_v36 = vmul.f32 1.442695, %v1439_v35 }
 0xe78   :  { %v1549_v37 = vpop.xlane.xlu0 %1548 }
 0xe79   :  { %5561 = vpow2.f32 %v1442_v36  ;;  %v1553_v4 = vsub.f32 %v1541_v3, %v1549_v37 }
 0xe7b   :  { %v1555_v38 = vmul.f32 1.442695, %v1553_v4 }
 0xe7c   :  { %v1552_v39 = vpop.xlane.xlu1 %1551 }
 0xe7d   :  { %5563 = vpow2.f32 %v1555_v38  ;;  %v1554_v40 = vsub.f32 %v1544_v8, %v1552_v39 }
 0xe7f   :  { %v1557_v41 = vmul.f32 1.442695, %v1554_v40 }
 0xe80   :  { %v1667_v42 = vpop.xlane.xlu0 %1666  ;;  %v1689_v34 = vpop.permute.xlu1 %1688 }
 0xe81   :  { %5565 = vpow2.f32 %v1557_v41  ;;  %v1671_v43 = vsub.f32 %v1659_v12, %v1667_v42 }
 0xe82   :  { %v5560_v45 = vpop.eup %5559 }
 0xe83   :  { %v1673_v47 = vmul.f32 1.442695, %v1671_v43  ;;  %v1444_v48 = vsel %vm363_vm6, %v5560_v45, 0.0 }
 0xe84   :  { %v1670_v49 = vpop.xlane.xlu0 %1669  ;;  %1445 = vadd.xlane.f32.xlu0 %v1444_v48  ;;  %v5443_v48 = vld [vmem:[%s6802_s6 + $0x38] sm:$0xff]  }
 0xe85   :  { %5567 = vpow2.f32 %v1673_v47  ;;  %v1672_v50 = vsub.f32 %v1662_v16, %v1670_v49  ;;  %5076 = vmatpush3.bf16.msra.mxu0 %v5443_v48  ;;  %v5450_v48 = vld [vmem:[#allocation5 + $0x20] sm:$0xff]  }
 0xe86   :  { %v5562_v51 = vpop.eup %5561  ;;  %5077 = vmatprep.subr.bf16.mxu0 %v5798_v1 }
 0xe87   :  { %v1675_v52 = vmul.f32 1.442695, %v1672_v50  ;;  %v1447_v53 = vsel %vm363_vm6, %v5562_v51, 0.0 }
 0xe88   :  { %v1784_v54 = vpop.xlane.xlu0 %1783  ;;  %1448 = vadd.xlane.f32.xlu0 %v1447_v53 }
 0xe89   :  { %5569 = vpow2.f32 %v1675_v52  ;;  %v1788_v24 = vsub.f32 %v1776_v22, %v1784_v54  ;;  %v5444_v52 = vld [vmem:[%s6802_s6 + $0x30] sm:$0xff]  }
 0xe8a   :  { %v5564_v55 = vpop.eup %5563  ;;  %5078 = vmatpush3.bf16.msra.mxu0 %v5444_v52  ;;  %v5454_v52 = vld [vmem:[%s6808_s12 + $0x60] sm:$0xff]  }
 0xe8b   :  { %v1790_v56 = vmul.f32 1.442695, %v1788_v24  ;;  %v1559_v57 = vsel %vm363_vm6, %v5564_v55, 0.0  ;;  %v5445_v24 = vld [vmem:[%s6802_s6 + $0x28] sm:$0xff]   ;;  %5079 = vmatprep.subr.bf16.mxu0 %v5798_v1 }
 0xe8c   :  { %1560 = vadd.xlane.f32.xlu0 %v1559_v57  ;;  %v1787_v26 = vpop.xlane.xlu0 %1786 }
 0xe8d   :  { %5571 = vpow2.f32 %v1790_v56  ;;  %v1789_v58 = vsub.f32 %v1779_v28, %v1787_v26  ;;  %v5446_v26 = vld [vmem:[%s6802_s6 + $0x20] sm:$0xff]  }
 0xe8e   :  { %v5566_v59 = vpop.eup %5565  ;;  %5080 = vmatpush3.bf16.msra.mxu0 %v5445_v24 }
 0xe8f   :  { %v1792_v60 = vmul.f32 1.442695, %v1789_v58  ;;  %v1562_v61 = vsel %vm363_vm6, %v5566_v59, 0.0  ;;  %5081 = vmatprep.subr.bf16.mxu0 %v5798_v1 }
 0xe90   :  { %1563 = vadd.xlane.f32.xlu0 %v1562_v61  ;;  %v1572_v10 = vpop.permute.xlu0 %1571 }
 0xe91   :  { %5573 = vpow2.f32 %v1792_v60 }
 0xe92   :  { %v5568_v63 = vpop.eup %5567  ;;  %5082 = vmatpush3.bf16.msra.mxu0 %v5446_v26 }
 0xe93   :  { %v1677_v2 = vsel %vm363_vm6, %v5568_v63, 0.0  ;;  %5099 = vmatprep.subr.bf16.mxu0 %v5798_v1 }
 0xe94   :  { %1678 = vadd.xlane.f32.xlu0 %v1677_v2 }
 0xe96   :  { %v5570_v3 = vpop.eup %5569 }
 0xe97   :  { %v1680_v5 = vsel %vm363_vm6, %v5570_v3, 0.0 }
 0xe98   :  { %1681 = vadd.xlane.f32.xlu0 %v1680_v5 }
 0xe9a   :  { %v5572_v6 = vpop.eup %5571 }
 0xe9b   :  { %v1794_v7 = vsel %vm363_vm6, %v5572_v6, 0.0 }
 0xe9c   :  { %1795 = vadd.xlane.f32.xlu0 %v1794_v7 }
 0xe9e   :  { %v5574_v8 = vpop.eup %5573 }
 0xe9f   :  { %v1797_v9 = vsel %vm363_vm6, %v5574_v8, 0.0 }
 0xea0   :  { %1798 = vadd.xlane.f32.xlu0 %v1797_v9 }
 0xeb6   :  { %1805 = vrot.lane.b32.xlu0 %v6200_v46, %s5802_s26 }
 0xf0d   :  { %v1446_v11 = vpop.xlane.xlu0 %1445 }
 0xf0e   :  { %5575 = vrcp.f32 %v1446_v11 }
 0xf11   :  { %v1449_v12 = vpop.xlane.xlu0 %1448 }
 0xf12   :  { %5577 = vrcp.f32 %v1449_v12 }
 0xf15   :  { %v1561_v13 = vpop.xlane.xlu0 %1560 }
 0xf16   :  { %5579 = vrcp.f32 %v1561_v13 }
 0xf19   :  { %v1564_v14 = vpop.xlane.xlu0 %1563 }
 0xf1a   :  { %5581 = vrcp.f32 %v1564_v14 }
 0xf1b   :  { %v5576_v15 = vpop.eup %5575 }
 0xf1c   :  { %v1452_v18 = vmul.f32 %v5576_v15, %v5560_v45 }
 0xf1d   :  { %v1679_v16 = vpop.xlane.xlu0 %1678 }
 0xf1e   :  { %5583 = vrcp.f32 %v1679_v16 }
 0xf1f   :  { %v5578_v17 = vpop.eup %5577 }
 0xf20   :  { %v1453_v19 = vmul.f32 %v5578_v17, %v5562_v51 }
 0xf21   :  { %v1682_v22 = vpop.xlane.xlu0 %1681 }
 0xf22   :  { %5585 = vrcp.f32 %v1682_v22  ;;  %v1454_v23 = vpack.c.bf16 %v1453_v19, %v1452_v18 }
 0xf23   :  { %v5580_v46 = vpop.eup %5579 }
 0xf24   :  { %5036 = vmatmul.mubr.msk.bf16.vlgmr.msra.gmra.mxu1 %vm363_vm6, %v1454_v23  ;;  %v1567_v28 = vmul.f32 %v5580_v46, %v5564_v55  ;;  %v4559_v46 = vld [vmem:[%s6803_s7 + $0x1] ss:$0 sm:$0xff] }
 0xf25   :  { %5046 = vmatpush3.bf16.msra.mxu1 %v1572_v10  ;;  %v1796_v25 = vpop.xlane.xlu0 %1795  ;;  %5047 = vmatprep.mubr.msk.bf16.mxu1 %vm5799_vm1, %v5798_v1 }
 0xf26   :  { %5057 = vmatprep.subr.bf16.mxu1 %v5798_v1  ;;  %5587 = vrcp.f32 %v1796_v25 }
 0xf27   :  { %v5582_v27 = vpop.eup %5581 }
 0xf28   :  { %v1568_v29 = vmul.f32 %v5582_v27, %v5566_v59 }
 0xf29   :  { %v1799_v31 = vpop.xlane.xlu0 %1798 }
 0xf2a   :  { %5589 = vrcp.f32 %v1799_v31  ;;  %v1569_v32 = vpack.c.bf16 %v1568_v29, %v1567_v28 }
 0xf2b   :  { %v5584_v62 = vpop.eup %5583 }
 0xf2c   :  { %5048 = vmatmul.mubr.msk.bf16.vlgmr.msra.gmra.mxu1 %vm363_vm6, %v1569_v32  ;;  %v1685_v35 = vmul.f32 %v5584_v62, %v5568_v63 }
 0xf2d   :  { %5058 = vmatpush3.bf16.msra.mxu1 %v1689_v34  ;;  %5059 = vmatprep.mubr.msk.bf16.mxu1 %vm5799_vm1, %v5798_v1  ;;  %v1806_v4 = vpop.permute.xlu0 %1805 }
 0xf2e   :  { %5069 = vmatprep.subr.bf16.mxu1 %v5798_v1 }
 0xf2f   :  { %v5586_v44 = vpop.eup %5585 }
 0xf30   :  { %v1686_v36 = vmul.f32 %v5586_v44, %v5570_v3 }
 0xf32   :  { %v1687_v37 = vpack.c.bf16 %v1686_v36, %v1685_v35 }
 0xf33   :  { %v5588_v38 = vpop.eup %5587 }
 0xf34   :  { %5060 = vmatmul.mubr.msk.bf16.vlgmr.msra.gmra.mxu1 %vm363_vm6, %v1687_v37  ;;  %v1802_v40 = vmul.f32 %v5588_v38, %v5572_v6 }
 0xf35   :  { %5070 = vmatpush3.bf16.msra.mxu1 %v1806_v4  ;;  %5071 = vmatprep.mubr.msk.bf16.mxu1 %vm5799_vm1, %v5798_v1 }
 0xf36   :  { %5087 = vmatprep.subr.bf16.mxu1 %v5798_v1 }
 0xf37   :  { %v5590_v39 = vpop.eup %5589 }
 0xf38   :  { %v1803_v41 = vmul.f32 %v5590_v39, %v5574_v8 }
 0xf3a   :  { %v1804_v42 = vpack.c.bf16 %v1803_v41, %v1802_v40 }
 0xf3c   :  { %5072 = vmatmul.mubr.msk.bf16.vlgmr.msra.gmra.mxu1 %vm363_vm6, %v1804_v42 }
 0xf3d   :  { %5095 = vmatprep.mubr.msk.bf16.mxu1 %vm5799_vm1, %v5798_v1 }
 0xfe4   :  { %v1492_v43 = vpop.f32.mrf.mxu1 }
 0xfe6   :  { %v5037_v45 = vpop.f32.mrf.mxu1 }
 0xfe7   :  { %v5447_v45 = vld [vmem:[#allocation5 + $0x38] sm:$0xff]  }
 0xfe8   :  { %v1495_v47 = vpop.f32.mrf.mxu1  ;;  %5088 = vmatpush3.bf16.msra.mxu1 %v5447_v45  ;;  %v5461_v45 = vld [vmem:[%s6800_s4 + $0xb4] ss:$8 sps:$4 sm:$0xff]  }
 0xfe9   :  { %5089 = vmatprep.subr.bf16.mxu1 %v5798_v1 }
 0xfea   :  { %v5038_v49 = vpop.f32.mrf.mxu1 }
 0xfeb   :  { %v5451_v49 = vld [vmem:[%s6808_s12 + $0x78] sm:$0xff]  }
 0xfec   :  { %v1611_v50 = vpop.f32.mrf.mxu1 }
 0xfee   :  { %v5049_v51 = vpop.f32.mrf.mxu1 }
 0xfef   :  { %v5453_v51 = vld [vmem:[%s6808_s12 + $0x68] sm:$0xff]  }
 0xff0   :  { %v1614_v53 = vpop.f32.mrf.mxu1 }
 0xff1   :  { %v5354_v54 = vpack.i.bf16 %v1614_v53, %v1611_v50  ;;  %v5452_v50 = vld [vmem:[%s6808_s12 + $0x70] sm:$0xff]   ;;  %v5455_v53 = vld [vmem:[%s6808_s12 + $0x58] sm:$0xff]  }
 0xff2   :  { %v5050_v55 = vpop.f32.mrf.mxu1 }
 0xff3   :  { %5355 = vrot.lane.b32.xlu0 %v5354_v54, %s5794_s10 }
 0xff4   :  { %v1728_v56 = vpop.f32.mrf.mxu1 }
 0xff6   :  { %v5061_v57 = vpop.f32.mrf.mxu1 }
 0xff8   :  { %v1731_v58 = vpop.f32.mrf.mxu1 }
 0xff9   :  { %v5359_v59 = vpack.i.bf16 %v1731_v58, %v1728_v56 }
 0xffa   :  { %v5062_v60 = vpop.f32.mrf.mxu1 }
 0xffb   :  { %5360 = vrot.lane.b32.xlu0 %v5359_v59, %s5803_s23  ;;  %v4567_v60 = vld [vmem:[%s6804_s8 + $0x1] ss:$0 sm:$0xff] }
 0xffc   :  { %v1845_v61 = vpop.f32.mrf.mxu1 }
 0xffe   :  { %v5073_v63 = vpop.f32.mrf.mxu1 }
0x1000   :  { %v1848_v2 = vpop.f32.mrf.mxu1 }
0x1001   :  { %v5364_v3 = vpack.i.bf16 %v1848_v2, %v1845_v61 }
0x1002   :  { %v5074_v5 = vpop.f32.mrf.mxu1 }
0x1003   :  { %5365 = vrot.lane.b32.xlu1 %v5364_v3, %s5804_s27  ;;  %v4568_v3 = vld [vmem:[%s6805_s9 + $0x1] ss:$0 sm:$0xff] }
0x1065   :  { %v5356_v6 = vpop.permute.xlu0 %5355 }
0x1066   :  { %v5358_v8 = vunpack.i.h.bf16 %v5356_v6  ;;  %v5357_v9 = vunpack.i.l.bf16 %v5356_v6 }
0x1068   :  { %v1877_v13 = vsel %vm363_vm6, %v1495_v47, %v5358_v8  ;;  %v1876_v14 = vsel %vm363_vm6, %v1492_v43, %v5357_v9  ;;  %v5449_v47 = vld [vmem:[#allocation5 + $0x28] sm:$0xff]   ;;  %v5456_v9 = vld [vmem:[%s6808_s12 + $0x50] sm:$0xff]  }
0x106d   :  { %v5361_v7 = vpop.permute.xlu0 %5360 }
0x106e   :  { %v5363_v10 = vunpack.i.h.bf16 %v5361_v7  ;;  %v5362_v11 = vunpack.i.l.bf16 %v5361_v7 }
0x1070   :  { %v1878_v17 = vsel %vm854_vm7, %v1876_v14, %v5362_v11  ;;  %v1879_v18 = vsel %vm854_vm7, %v1877_v13, %v5363_v10  ;;  %v5457_v10 = vld [vmem:[%s6808_s12 + $0x48] sm:$0xff]   ;;  %v5458_v11 = vld [vmem:[%s6808_s12 + $0x40] sm:$0xff]  }
0x1075   :  { %v5366_v12 = vpop.permute.xlu1 %5365 }
0x1076   :  { %v5368_v15 = vunpack.i.h.bf16 %v5366_v12  ;;  %v5367_v16 = vunpack.i.l.bf16 %v5366_v12  ;;  %v4570_v12 = vld [vmem:[%s6807_s11 + $0x1] ss:$0 sm:$0xff] }
0x1078   :  { %v1880_v19 = vsel %vm857_vm8, %v1878_v17, %v5367_v16  ;;  %v1881_v22 = vsel %vm857_vm8, %v1879_v18, %v5368_v15 }
0x1079   :  { %v1882_v23 = vpack.c.bf16 %v1881_v22, %v1880_v19 }
0x107b   :  { %5084 = vmatmul.mubr.msk.bf16.vlgmr.msra.gmra.mxu0 %vm273_vm5, %v1882_v23 }
0x107c   :  { %5115 = vmatprep.mubr.msk.bf16.mxu0 %vm5799_vm1, %v5798_v1  ;;  %5100 = vmatpush3.bf16.msra.mxu0 %v5451_v49  ;;  %v5467_v49 = vld [vmem:[%s6800_s4 + $0x94] ss:$8 sps:$4 sm:$0xff]  }
0x107d   :  { %5101 = vmatprep.subr.bf16.mxu0 %v5798_v1 }
0x1080   :  { %5102 = vmatpush3.bf16.msra.mxu0 %v5452_v50  ;;  %v5465_v50 = vld [vmem:[%s6800_s4 + $0x90] ss:$8 sps:$4 sm:$0xff]  }
0x1081   :  { %5103 = vmatprep.subr.bf16.mxu0 %v5798_v1 }
0x1084   :  { %5104 = vmatpush3.bf16.msra.mxu0 %v5453_v51  ;;  %v5470_v51 = vld [vmem:[%s6800_s4 + $0x84] ss:$8 sps:$4 sm:$0xff]  }
0x1085   :  { %5105 = vmatprep.subr.bf16.mxu0 %v5798_v1 }
0x1088   :  { %5106 = vmatpush3.bf16.msra.mxu0 %v5454_v52  ;;  %v5468_v52 = vld [vmem:[%s6800_s4 + $0x80] ss:$8 sps:$4 sm:$0xff]  }
0x1089   :  { %5107 = vmatprep.subr.bf16.mxu0 %v5798_v1 }
0x108c   :  { %5108 = vmatpush3.bf16.msra.mxu0 %v5455_v53 }
0x108d   :  { %5109 = vmatprep.subr.bf16.mxu0 %v5798_v1 }
0x1090   :  { %5110 = vmatpush3.bf16.msra.mxu0 %v5456_v9 }
0x1091   :  { %5111 = vmatprep.subr.bf16.mxu0 %v5798_v1 }
0x1094   :  { %5112 = vmatpush3.bf16.msra.mxu0 %v5457_v10 }
0x1095   :  { %5113 = vmatprep.subr.bf16.mxu0 %v5798_v1 }
0x1098   :  { %5114 = vmatpush3.bf16.msra.mxu0 %v5458_v11 }
0x1099   :  { %5131 = vmatprep.subr.bf16.mxu0 %v5798_v1 }
0x113b   :  { %v1961_v25 = vpop.f32.mrf.mxu0 }
0x113c   :  { %v1962_v27 = vadd.f32 %v4559_v46, %v1961_v25 }
0x113d   :  { %v5085_v28 = vpop.f32.mrf.mxu0 }
0x113e   :  { %v1968_v29 = vadd.f32 %v1962_v27, %v6180_v20 }
0x113f   :  { %v1964_v31 = vpop.f32.mrf.mxu0 }
0x1140   :  { %v1965_v32 = vadd.f32 %v4559_v46, %v1964_v31  ;;  %v1974_v34 = vsel %vm273_vm5, %v1968_v29, 0.0  ;;  %v4592_v46 = vld [vmem:[#allocation7 + $0x1] ss:$0 sm:$0xff] }
0x1141   :  { %1975 = vadd.xlane.f32.xlu0 %v1974_v34  ;;  %v5086_v62 = vpop.f32.mrf.mxu0 }
0x1142   :  { %v1969_v44 = vadd.f32 %v1965_v32, %v6182_v21  ;;  %v5448_v21 = vld [vmem:[#allocation5 + $0x30] sm:$0xff]  }
0x1143   :  { %5090 = vmatpush3.bf16.msra.mxu1 %v5448_v21  ;;  %v5459_v21 = vld [vmem:[%s6800_s4 + $0xb0] ss:$8 sps:$4 sm:$0xff]  }
0x1144   :  { %v1977_v35 = vsel %vm273_vm5, %v1969_v44, 0.0  ;;  %5091 = vmatprep.subr.bf16.mxu1 %v5798_v1 }
0x1145   :  { %1978 = vadd.xlane.f32.xlu1 %v1977_v35 }
0x1147   :  { %5092 = vmatpush3.bf16.msra.mxu1 %v5449_v47  ;;  %v5464_v47 = vld [vmem:[%s6800_s4 + $0xa4] ss:$8 sps:$4 sm:$0xff]  }
0x1148   :  { %5093 = vmatprep.subr.bf16.mxu1 %v5798_v1 }
0x114b   :  { %5094 = vmatpush3.bf16.msra.mxu1 %v5450_v48  ;;  %v5462_v48 = vld [vmem:[%s6800_s4 + $0xa0] ss:$8 sps:$4 sm:$0xff]  }
0x114c   :  { %2341 = vmatprep.subr.bf16.mxu1 %v5461_v45 }
0x11ca   :  { %v1976_v36 = vpop.xlane.xlu0 %1975 }
0x11cb   :  { %v1980_v37 = vmul.f32 0.015625, %v1976_v36 }
0x11cd   :  { %v1982_v4 = vsub.f32 %v1968_v29, %v1980_v37 }
0x11ce   :  { %v1979_v38 = vpop.xlane.xlu1 %1978 }
0x11cf   :  { %v1981_v39 = vmul.f32 0.015625, %v1979_v38  ;;  %v1984_v40 = vmul.f32 %v1982_v4, %v1982_v4 }
0x11d1   :  { %v1983_v41 = vsub.f32 %v1969_v44, %v1981_v39  ;;  %v1986_v20 = vsel %vm273_vm5, %v1984_v40, 0.0 }
0x11d2   :  { %1987 = vadd.xlane.f32.xlu0 %v1986_v20 }
0x11d3   :  { %v1985_v42 = vmul.f32 %v1983_v41, %v1983_v41 }
0x11d5   :  { %v1989_v43 = vsel %vm273_vm5, %v1985_v42, 0.0 }
0x11d6   :  { %1990 = vadd.xlane.f32.xlu0 %v1989_v43 }
0x125b   :  { %v1988_v54 = vpop.xlane.xlu0 %1987 }
0x125c   :  { %v1992_v24 = vmul.f32 0.015625, %v1988_v54 }
0x125e   :  { %v1994_v55 = vadd.f32 1e-05, %v1992_v24 }
0x125f   :  { %v1991_v56 = vpop.xlane.xlu0 %1990 }
0x1260   :  { %5591 = vrsqrt.f32 %v1994_v55  ;;  %v1993_v57 = vmul.f32 0.015625, %v1991_v56 }
0x1262   :  { %v1995_v26 = vadd.f32 1e-05, %v1993_v57 }
0x1264   :  { %5593 = vrsqrt.f32 %v1995_v26 }
0x126d   :  { %v5592_v58 = vpop.eup %5591 }
0x126e   :  { %v1998_v59 = vmul.f32 %v5592_v58, %v1982_v4 }
0x1270   :  { %v2006_v2 = vmul.f32 %v4567_v60, %v1998_v59  ;;  %v4602_v59 = vld [vmem:[%s6810_s14 + $0x1] ss:$0 sm:$0xff] }
0x1271   :  { %v5594_v61 = vpop.eup %5593 }
0x1272   :  { %v1999_v63 = vmul.f32 %v5594_v61, %v1983_v41  ;;  %v2014_v6 = vadd.f32 %v4568_v3, %v2006_v2  ;;  %v4603_v2 = vld [vmem:[#allocation8 + $0x1] ss:$0 sm:$0xff] }
0x1274   :  { %v2007_v5 = vmul.f32 %v4567_v60, %v1999_v63 }
0x1276   :  { %v2015_v7 = vadd.f32 %v4568_v3, %v2007_v5 }
0x1278   :  { %v2016_v8 = vpack.c.bf16 %v2015_v7, %v2014_v6 }
0x127a   :  { %5096 = vmatmul.mubr.msk.bf16.vlgmr.msra.gmra.mxu1 %vm273_vm5, %v2016_v8  ;;  %v4612_v8 = vld [vmem:[%s6801_s5 + $0x4] sm:$0x3] }
0x127b   :  { %2365 = vmatprep.mubr.bf16.mxu1 %v5797_v0  ;;  %2342 = vmatpush1.bf16.msra.mxu1 %v5459_v21  ;;  %v2283_v9 = vrot.slane %v4612_v8, %v5974_v30  ;;  %v6430_v21 = vld [vmem:[%s6821_s29 + $0x8] sm:$0xff] }
0x127c   :  { %2343 = vmatprep.subr.bf16.mxu1 %v5464_v47 }
0x127f   :  { %2344 = vmatpush1.bf16.msra.mxu1 %v5462_v48 }
0x1280   :  { %2345 = vmatprep.subr.bf16.mxu1 %v5467_v49 }
0x1283   :  { %2346 = vmatpush1.bf16.msra.mxu1 %v5465_v50 }
0x1284   :  { %2347 = vmatprep.subr.bf16.mxu1 %v5470_v51 }
0x1287   :  { %2348 = vmatpush1.bf16.msra.mxu1 %v5468_v52 }
0x1288   :  { %5119 = vmatprep.subr.bf16.mxu1 %v5798_v1 }
0x133a   :  { %v2095_v13 = vpop.f32.mrf.mxu1 }
0x133b   :  { %v2096_v15 = vadd.f32 %v4570_v12, %v2095_v13 }
0x133c   :  { %v5097_v14 = vpop.f32.mrf.mxu1 }
0x133d   :  { %v2102_v19 = vmax.f32 %v2096_v15, 0.0 }
0x133e   :  { %v2098_v16 = vpop.f32.mrf.mxu1 }
0x133f   :  { %v2099_v17 = vadd.f32 %v4570_v12, %v2098_v16 }
0x1340   :  { %v5098_v18 = vpop.f32.mrf.mxu1 }
0x1341   :  { %v2103_v22 = vmax.f32 %v2099_v17, 0.0 }
0x1343   :  { %v2104_v23 = vpack.c.bf16 %v2103_v22, %v2102_v19  ;;  %v2287_v22 = vrot.slane %v4612_v8, %v5980_v33 }
0x1345   :  { %5116 = vmatmul.mubr.bf16.vlgmr.msra.gmra.mxu0 %v2104_v23 }
0x1346   :  { %5133 = vmatprep.mubr.msk.bf16.mxu0 %vm5799_vm1, %v5798_v1 }
0x1405   :  { %v2212_v25 = vpop.f32.mrf.mxu0 }
0x1406   :  { %v2213_v27 = vadd.f32 %v4592_v46, %v2212_v25 }
0x1407   :  { %v5117_v28 = vpop.f32.mrf.mxu0 }
0x1408   :  { %v2219_v29 = vadd.f32 %v2213_v27, %v2014_v6 }
0x1409   :  { %v2215_v31 = vpop.f32.mrf.mxu0 }
0x140a   :  { %v2216_v32 = vadd.f32 %v4592_v46, %v2215_v31  ;;  %v2225_v34 = vsel %vm273_vm5, %v2219_v29, 0.0 }
0x140b   :  { %2226 = vadd.xlane.f32.xlu1 %v2225_v34  ;;  %v5118_v62 = vpop.f32.mrf.mxu0 }
0x140c   :  { %v2220_v44 = vadd.f32 %v2216_v32, %v2015_v7 }
0x140e   :  { %v2228_v35 = vsel %vm273_vm5, %v2220_v44, 0.0 }
0x140f   :  { %2229 = vadd.xlane.f32.xlu0 %v2228_v35 }
0x1494   :  { %v2227_v36 = vpop.xlane.xlu1 %2226 }
0x1495   :  { %v2231_v37 = vmul.f32 0.015625, %v2227_v36 }
0x1497   :  { %v2233_v4 = vsub.f32 %v2219_v29, %v2231_v37 }
0x1498   :  { %v2230_v38 = vpop.xlane.xlu0 %2229 }
0x1499   :  { %v2232_v39 = vmul.f32 0.015625, %v2230_v38  ;;  %v2235_v40 = vmul.f32 %v2233_v4, %v2233_v4 }
0x149b   :  { %v2234_v41 = vsub.f32 %v2220_v44, %v2232_v39  ;;  %v2237_v20 = vsel %vm273_vm5, %v2235_v40, 0.0 }
0x149c   :  { %2238 = vadd.xlane.f32.xlu1 %v2237_v20 }
0x149d   :  { %v2236_v42 = vmul.f32 %v2234_v41, %v2234_v41 }
0x149f   :  { %v2240_v43 = vsel %vm273_vm5, %v2236_v42, 0.0 }
0x14a0   :  { %2241 = vadd.xlane.f32.xlu0 %v2240_v43 }
0x1525   :  { %v2239_v53 = vpop.xlane.xlu1 %2238 }
0x1526   :  { %v2243_v54 = vmul.f32 0.015625, %v2239_v53 }
0x1528   :  { %v2245_v24 = vadd.f32 1e-05, %v2243_v54 }
0x1529   :  { %v2242_v55 = vpop.xlane.xlu0 %2241 }
0x152a   :  { %5595 = vrsqrt.f32 %v2245_v24  ;;  %v2244_v56 = vmul.f32 0.015625, %v2242_v55 }
0x152c   :  { %v2246_v57 = vadd.f32 1e-05, %v2244_v56 }
0x152e   :  { %5597 = vrsqrt.f32 %v2246_v57 }
0x1537   :  { %v5596_v26 = vpop.eup %5595 }
0x1538   :  { %v2249_v58 = vmul.f32 %v5596_v26, %v2233_v4 }
0x153a   :  { %v2257_v63 = vmul.f32 %v4602_v59, %v2249_v58 }
0x153b   :  { %v5598_v60 = vpop.eup %5597 }
0x153c   :  { %v2250_v61 = vmul.f32 %v5598_v60, %v2234_v41  ;;  %v6381_v5 = vadd.f32 %v4603_v2, %v2257_v63  ;;  %v6423_v41 = vld [vmem:[%s6821_s29] sm:$0xff]  ;;  %s5805_s29 = smov [#allocation10]  }
0x153d   :  { %s4464_s0 = sshll.u32 %s5805_s29, 4  ;;  %s4465_s0 = int_to_ptr.vmem [resolvable:$true] %s4464_s0 }
0x153e   :  { %v2258_v3 = vmul.f32 %v4602_v59, %v2250_v61  ;;  %p5766_p7 = scmp.lt.s32.totalorder %s4465_s0, %s4465_s0 }
0x1540   :  { %v6383_v6 = vadd.f32 %v4603_v2, %v2258_v3 }
0x1542   :  { %v2267_v7 = vpack.c.bf16 %v6383_v6, %v6381_v5 }
0x1544   :  { %4621 = vmatmul.mubr.msk.bf16.vlgmr.msra.gmra.mxu1 %vm273_vm5, %v2267_v7 }
0x1545   :  { %5121 = vmatprep.mubr.msk.bf16.mxu1 %vm5799_vm1, %v5798_v1 }
0x1604   :  { %v2367_v10 = vpop.f32.mrf.mxu1 }
0x1605   :  { %v2368_v11 = vadd.f32 %v2367_v10, %v2283_v9 }
0x1606   :  { %v2369_v12 = vpop.f32.mrf.mxu1 }
0x1607   :  { %2378 = vrot.lane.b32.xlu1 %v2368_v11, %s5791_s19  ;;  %v2370_v27 = vadd.f32 %v2369_v12, %v2287_v22 }
0x1608   :  { %v2371_v13 = vpop.f32.mrf.mxu1 }
0x1609   :  { %v2372_v14 = vadd.f32 %v2371_v13, %v2283_v9 }
0x160a   :  { %v2373_v19 = vpop.f32.mrf.mxu1 }
0x160b   :  { %v2416_v15 = vpack.c.bf16 %v2372_v14, %v2368_v11  ;;  %2380 = vrot.lane.b32.xlu0 %v2372_v14, %s5791_s19  ;;  %v2374_v46 = vadd.f32 %v2373_v19, %v2287_v22 }
0x160d   :  { %2532 = vrot.lane.b32.xlu1 %v2416_v15, %s5800_s24  ;;  %v6401_v29 = vpack.c.bf16 %v2374_v46, %v2370_v27 }
0x1611   :  { %2650 = vrot.lane.b32.xlu1 %v2416_v15, %s5801_s25 }
0x1615   :  { %2767 = vrot.lane.b32.xlu1 %v2416_v15, %s5802_s26 }
0x1679   :  { %v2379_v16 = vpop.permute.xlu1 %2378 }
0x167a   :  { %2384 = vxpose.xlu0.b32.start [1/2] (short) (narrow) %v2379_v16, 64 }
0x167d   :  { %v2381_v17 = vpop.permute.xlu0 %2380 }
0x167e   :  { %2385 = vxpose.xlu0.b32.end [2/2] (short) (narrow) %v2381_v17, 64 }
0x167f   :  { %v2533_v62 = vpop.permute.xlu1 %2532 }
0x1683   :  { %v2651_v37 = vpop.permute.xlu1 %2650 }
0x1687   :  { %v2768_v39 = vpop.permute.xlu1 %2767 }
0x16f6   :  { %v2400_v18 = vpop.trf.xlu0 }
0x16fa   :  { %v2401_v23 = vpop.trf.xlu0 }
0x16fb   :  { %v2417_v25 = vpack.c.bf16 %v2401_v23, %v2400_v18 }
0x16fd   :  { %5120 = vmatpush3.bf16.msra.mxu1 %v2417_v25 }
0x16fe   :  { %v2402_v28 = vpop.trf.xlu0  ;;  %5125 = vmatprep.subr.bf16.mxu1 %v5798_v1 }
0x1700   :  { %5122 = vmatmul.mubr.msk.bf16.vlgmr.msra.gmra.mxu1 %vm363_vm6, %v2416_v15 }
0x1701   :  { %5126 = vmatpush3.bf16.msra.mxu1 %v6401_v29  ;;  %5127 = vmatprep.mubr.msk.bf16.mxu1 %vm5799_vm1, %v5798_v1 }
0x1702   :  { %v2403_v31 = vpop.trf.xlu0  ;;  %5137 = vmatprep.subr.bf16.mxu1 %v5798_v1 }
0x1703   :  { %v2530_v32 = vpack.c.bf16 %v2403_v31, %v2402_v28 }
0x1705   :  { %5132 = vmatpush3.bf16.msra.mxu0 %v2530_v32 }
0x1706   :  { %v2404_v34 = vpop.trf.xlu0  ;;  %5143 = vmatprep.subr.bf16.mxu0 %v5798_v1 }
0x1708   :  { %5134 = vmatmul.mubr.msk.bf16.vlgmr.msra.gmra.mxu0 %vm363_vm6, %v2533_v62 }
0x1709   :  { %5145 = vmatprep.mubr.msk.bf16.mxu0 %vm5799_vm1, %v5798_v1 }
0x170a   :  { %v2405_v44 = vpop.trf.xlu0 }
0x170b   :  { %v2649_v35 = vpack.c.bf16 %v2405_v44, %v2404_v34 }
0x170d   :  { %5144 = vmatpush3.bf16.msra.mxu0 %v2649_v35 }
0x170e   :  { %v2406_v36 = vpop.trf.xlu0  ;;  %5155 = vmatprep.subr.bf16.mxu0 %v5798_v1 }
0x1710   :  { %5146 = vmatmul.mubr.msk.bf16.vlgmr.msra.gmra.mxu0 %vm363_vm6, %v2651_v37 }
0x1711   :  { %5157 = vmatprep.mubr.msk.bf16.mxu0 %vm5799_vm1, %v5798_v1 }
0x1712   :  { %v2407_v4 = vpop.trf.xlu0 }
0x1713   :  { %v2766_v38 = vpack.c.bf16 %v2407_v4, %v2406_v36 }
0x1715   :  { %5156 = vmatpush3.bf16.msra.mxu0 %v2766_v38 }
0x1716   :  { %5167 = vmatprep.subr.bf16.mxu0 %v5798_v1 }
0x1718   :  { %5158 = vmatmul.mubr.msk.bf16.vlgmr.msra.gmra.mxu0 %vm363_vm6, %v2768_v39 }
0x1719   :  { %5175 = vmatprep.mubr.msk.bf16.mxu0 %vm5799_vm1, %v5798_v1 }
0x17c0   :  { %v2456_v40 = vpop.f32.mrf.mxu1 }
0x17c1   :  { %v2457_v20 = vadd.f32 %v6423_v41, %v2456_v40 }
0x17c2   :  { %v5123_v42 = vpop.f32.mrf.mxu1 }
0x17c3   :  { %v2463_v43 = vsel %vm363_vm6, %v2457_v20, -inf }
0x17c4   :  { %2464 = vmax.xlane.f32.xlu1 %v2463_v43  ;;  %v2459_v45 = vpop.f32.mrf.mxu1 }
0x17c5   :  { %v2460_v47 = vadd.f32 %v6430_v21, %v2459_v45 }
0x17c6   :  { %v5124_v48 = vpop.f32.mrf.mxu1 }
0x17c7   :  { %v2466_v49 = vsel %vm363_vm6, %v2460_v47, -inf }
0x17c8   :  { %2467 = vmax.xlane.f32.xlu0 %v2466_v49  ;;  %v2571_v50 = vpop.f32.mrf.mxu0 }
0x17c9   :  { %v2572_v51 = vadd.f32 %v6423_v41, %v2571_v50 }
0x17ca   :  { %v5135_v52 = vpop.f32.mrf.mxu0 }
0x17cb   :  { %v2578_v53 = vsel %vm363_vm6, %v2572_v51, -inf }
0x17cc   :  { %2579 = vmax.xlane.f32.xlu1 %v2578_v53  ;;  %v2574_v54 = vpop.f32.mrf.mxu0 }
0x17cd   :  { %v2575_v24 = vadd.f32 %v6430_v21, %v2574_v54 }
0x17ce   :  { %v5136_v55 = vpop.f32.mrf.mxu0 }
0x17cf   :  { %v2581_v56 = vsel %vm363_vm6, %v2575_v24, -inf }
0x17d0   :  { %2582 = vmax.xlane.f32.xlu1 %v2581_v56  ;;  %v2689_v57 = vpop.f32.mrf.mxu0 }
0x17d1   :  { %v2690_v26 = vadd.f32 %v6423_v41, %v2689_v57 }
0x17d2   :  { %v5147_v58 = vpop.f32.mrf.mxu0 }
0x17d3   :  { %v2696_v59 = vsel %vm363_vm6, %v2690_v26, -inf }
0x17d4   :  { %2697 = vmax.xlane.f32.xlu1 %v2696_v59  ;;  %v2692_v60 = vpop.f32.mrf.mxu0 }
0x17d5   :  { %v2693_v61 = vadd.f32 %v6430_v21, %v2692_v60 }
0x17d6   :  { %v5148_v63 = vpop.f32.mrf.mxu0 }
0x17d7   :  { %v2699_v2 = vsel %vm363_vm6, %v2693_v61, -inf }
0x17d8   :  { %2700 = vmax.xlane.f32.xlu1 %v2699_v2  ;;  %v2806_v3 = vpop.f32.mrf.mxu0 }
0x17d9   :  { %v2807_v7 = vadd.f32 %v6423_v41, %v2806_v3 }
0x17da   :  { %v5159_v8 = vpop.f32.mrf.mxu0 }
0x17db   :  { %v2813_v9 = vsel %vm363_vm6, %v2807_v7, -inf }
0x17dc   :  { %2814 = vmax.xlane.f32.xlu1 %v2813_v9  ;;  %v2809_v10 = vpop.f32.mrf.mxu0 }
0x17dd   :  { %v2810_v11 = vadd.f32 %v6430_v21, %v2809_v10 }
0x17de   :  { %2719 = vrot.lane.b32.xlu0 %v6401_v29, %s5801_s25  ;;  %v5160_v12 = vpop.f32.mrf.mxu0 }
0x17df   :  { %v2816_v13 = vsel %vm363_vm6, %v2810_v11, -inf }
0x17e0   :  { %2817 = vmax.xlane.f32.xlu1 %v2816_v13 }
0x17f1   :  { %2602 = vrot.lane.b32.xlu1 %v6401_v29, %s5800_s24 }
0x184d   :  { %v2465_v14 = vpop.xlane.xlu1 %2464 }
0x184e   :  { %v2469_v15 = vsub.f32 %v2457_v20, %v2465_v14 }
0x1850   :  { %v2471_v16 = vmul.f32 1.442695, %v2469_v15 }
0x1851   :  { %v2468_v17 = vpop.xlane.xlu0 %2467 }
0x1852   :  { %5599 = vpow2.f32 %v2471_v16  ;;  %v2470_v18 = vsub.f32 %v2460_v47, %v2468_v17 }
0x1854   :  { %v2473_v19 = vmul.f32 1.442695, %v2470_v18 }
0x1855   :  { %v2580_v22 = vpop.xlane.xlu1 %2579  ;;  %v2720_v17 = vpop.permute.xlu0 %2719 }
0x1856   :  { %5601 = vpow2.f32 %v2473_v19  ;;  %v2584_v23 = vsub.f32 %v2572_v51, %v2580_v22 }
0x1858   :  { %v2586_v46 = vmul.f32 1.442695, %v2584_v23 }
0x1859   :  { %v2583_v25 = vpop.xlane.xlu1 %2582 }
0x185a   :  { %5603 = vpow2.f32 %v2586_v46  ;;  %v2585_v27 = vsub.f32 %v2575_v24, %v2583_v25 }
0x185c   :  { %v2588_v28 = vmul.f32 1.442695, %v2585_v27 }
0x185d   :  { %v2698_v31 = vpop.xlane.xlu1 %2697 }
0x185e   :  { %5605 = vpow2.f32 %v2588_v28  ;;  %v2702_v32 = vsub.f32 %v2690_v26, %v2698_v31 }
0x185f   :  { %v5600_v34 = vpop.eup %5599 }
0x1860   :  { %v2704_v62 = vmul.f32 1.442695, %v2702_v32  ;;  %v2475_v44 = vsel %vm363_vm6, %v5600_v34, 0.0 }
0x1861   :  { %v2701_v35 = vpop.xlane.xlu1 %2700  ;;  %2476 = vadd.xlane.f32.xlu1 %v2475_v44 }
0x1862   :  { %5607 = vpow2.f32 %v2704_v62  ;;  %v2703_v36 = vsub.f32 %v2693_v61, %v2701_v35 }
0x1863   :  { %v5602_v37 = vpop.eup %5601 }
0x1864   :  { %v2706_v4 = vmul.f32 1.442695, %v2703_v36  ;;  %v2478_v38 = vsel %vm363_vm6, %v5602_v37, 0.0  ;;  %v5471_v36 = vld [vmem:[%s6802_s6 + $0x58] sm:$0xff]  }
0x1865   :  { %v2815_v39 = vpop.xlane.xlu1 %2814  ;;  %2479 = vadd.xlane.f32.xlu1 %v2478_v38  ;;  %5168 = vmatpush3.bf16.msra.mxu0 %v5471_v36  ;;  %v5475_v36 = vld [vmem:[#allocation5 + $0x58] sm:$0xff]  }
0x1866   :  { %5609 = vpow2.f32 %v2706_v4  ;;  %v2819_v40 = vsub.f32 %v2807_v7, %v2815_v39  ;;  %5169 = vmatprep.subr.bf16.mxu0 %v5798_v1  ;;  %v5472_v39 = vld [vmem:[%s6802_s6 + $0x50] sm:$0xff]  }
0x1867   :  { %v5604_v20 = vpop.eup %5603 }
0x1868   :  { %v2821_v42 = vmul.f32 1.442695, %v2819_v40  ;;  %v2590_v43 = vsel %vm363_vm6, %v5604_v20, 0.0 }
0x1869   :  { %2591 = vadd.xlane.f32.xlu1 %v2590_v43  ;;  %v2818_v45 = vpop.xlane.xlu1 %2817  ;;  %5170 = vmatpush3.bf16.msra.mxu0 %v5472_v39  ;;  %v5480_v39 = vld [vmem:[%s6808_s12 + $0xb0] sm:$0xff]  }
0x186a   :  { %5611 = vpow2.f32 %v2821_v42  ;;  %v2820_v47 = vsub.f32 %v2810_v11, %v2818_v45  ;;  %v5473_v42 = vld [vmem:[%s6802_s6 + $0x48] sm:$0xff]   ;;  %5171 = vmatprep.subr.bf16.mxu0 %v5798_v1 }
0x186b   :  { %v5606_v48 = vpop.eup %5605 }
0x186c   :  { %v2823_v49 = vmul.f32 1.442695, %v2820_v47  ;;  %v2593_v50 = vsel %vm363_vm6, %v5606_v48, 0.0 }
0x186d   :  { %2594 = vadd.xlane.f32.xlu1 %v2593_v50  ;;  %v2603_v26 = vpop.permute.xlu1 %2602  ;;  %5172 = vmatpush3.bf16.msra.mxu0 %v5473_v42  ;;  %v5483_v42 = vld [vmem:[%s6808_s12 + $0x98] sm:$0xff]  }
0x186e   :  { %5613 = vpow2.f32 %v2823_v49  ;;  %5173 = vmatprep.subr.bf16.mxu0 %v5798_v1 }
0x186f   :  { %v5608_v51 = vpop.eup %5607 }
0x1870   :  { %v2708_v52 = vsel %vm363_vm6, %v5608_v51, 0.0 }
0x1871   :  { %2709 = vadd.xlane.f32.xlu1 %v2708_v52 }
0x1873   :  { %v5610_v53 = vpop.eup %5609 }
0x1874   :  { %v2711_v54 = vsel %vm363_vm6, %v5610_v53, 0.0 }
0x1875   :  { %2712 = vadd.xlane.f32.xlu1 %v2711_v54 }
0x1877   :  { %v5612_v24 = vpop.eup %5611 }
0x1878   :  { %v2825_v55 = vsel %vm363_vm6, %v5612_v24, 0.0 }
0x1879   :  { %2826 = vadd.xlane.f32.xlu1 %v2825_v55 }
0x187b   :  { %v5614_v56 = vpop.eup %5613 }
0x187c   :  { %v2828_v57 = vsel %vm363_vm6, %v5614_v56, 0.0 }
0x187d   :  { %2829 = vadd.xlane.f32.xlu1 %v2828_v57 }
0x188e   :  { %2836 = vrot.lane.b32.xlu1 %v6401_v29, %s5802_s26 }
0x18ea   :  { %v2477_v58 = vpop.xlane.xlu1 %2476 }
0x18eb   :  { %5615 = vrcp.f32 %v2477_v58 }
0x18ee   :  { %v2480_v59 = vpop.xlane.xlu1 %2479 }
0x18ef   :  { %5617 = vrcp.f32 %v2480_v59 }
0x18f2   :  { %v2592_v60 = vpop.xlane.xlu1 %2591 }
0x18f3   :  { %5619 = vrcp.f32 %v2592_v60 }
0x18f6   :  { %v2595_v61 = vpop.xlane.xlu1 %2594 }
0x18f7   :  { %5621 = vrcp.f32 %v2595_v61 }
0x18f8   :  { %v5616_v63 = vpop.eup %5615 }
0x18f9   :  { %v2483_v7 = vmul.f32 %v5616_v63, %v5600_v34 }
0x18fa   :  { %v2710_v2 = vpop.xlane.xlu1 %2709 }
0x18fb   :  { %5623 = vrcp.f32 %v2710_v2 }
0x18fc   :  { %v5618_v3 = vpop.eup %5617 }
0x18fd   :  { %v2484_v8 = vmul.f32 %v5618_v3, %v5602_v37 }
0x18fe   :  { %v2713_v9 = vpop.xlane.xlu1 %2712 }
0x18ff   :  { %5625 = vrcp.f32 %v2713_v9  ;;  %v2485_v10 = vpack.c.bf16 %v2484_v8, %v2483_v7 }
0x1900   :  { %v5620_v29 = vpop.eup %5619 }
0x1901   :  { %5128 = vmatmul.mubr.msk.bf16.vlgmr.msra.gmra.mxu1 %vm363_vm6, %v2485_v10  ;;  %v2598_v13 = vmul.f32 %v5620_v29, %v5604_v20 }
0x1902   :  { %5138 = vmatpush3.bf16.msra.mxu1 %v2603_v26  ;;  %v2827_v11 = vpop.xlane.xlu1 %2826  ;;  %5139 = vmatprep.mubr.msk.bf16.mxu1 %vm5799_vm1, %v5798_v1 }
0x1903   :  { %5149 = vmatprep.subr.bf16.mxu1 %v5798_v1  ;;  %5627 = vrcp.f32 %v2827_v11 }
0x1904   :  { %v5622_v12 = vpop.eup %5621 }
0x1905   :  { %v2599_v14 = vmul.f32 %v5622_v12, %v5606_v48  ;;  %v5474_v48 = vld [vmem:[%s6802_s6 + $0x40] sm:$0xff]  }
0x1906   :  { %v2830_v15 = vpop.xlane.xlu1 %2829  ;;  %5174 = vmatpush3.bf16.msra.mxu0 %v5474_v48  ;;  %v4639_v12 = vld [vmem:[%s6803_s7 + $0x2] ss:$0 sm:$0xff] }
0x1907   :  { %5629 = vrcp.f32 %v2830_v15  ;;  %v2600_v16 = vpack.c.bf16 %v2599_v14, %v2598_v13  ;;  %5191 = vmatprep.subr.bf16.mxu0 %v5798_v1 }
0x1908   :  { %v5624_v18 = vpop.eup %5623 }
0x1909   :  { %5140 = vmatmul.mubr.msk.bf16.vlgmr.msra.gmra.mxu1 %vm363_vm6, %v2600_v16  ;;  %v2716_v22 = vmul.f32 %v5624_v18, %v5608_v51 }
0x190a   :  { %5150 = vmatpush3.bf16.msra.mxu1 %v2720_v17  ;;  %5151 = vmatprep.mubr.msk.bf16.mxu1 %vm5799_vm1, %v5798_v1  ;;  %v2837_v25 = vpop.permute.xlu1 %2836 }
0x190b   :  { %5161 = vmatprep.subr.bf16.mxu1 %v5798_v1 }
0x190c   :  { %v5626_v19 = vpop.eup %5625 }
0x190d   :  { %v2717_v23 = vmul.f32 %v5626_v19, %v5610_v53 }
0x190f   :  { %v2718_v46 = vpack.c.bf16 %v2717_v23, %v2716_v22 }
0x1910   :  { %v5628_v27 = vpop.eup %5627 }
0x1911   :  { %5152 = vmatmul.mubr.msk.bf16.vlgmr.msra.gmra.mxu1 %vm363_vm6, %v2718_v46  ;;  %v2833_v31 = vmul.f32 %v5628_v27, %v5612_v24 }
0x1912   :  { %5162 = vmatpush3.bf16.msra.mxu1 %v2837_v25  ;;  %5163 = vmatprep.mubr.msk.bf16.mxu1 %vm5799_vm1, %v5798_v1 }
0x1913   :  { %5179 = vmatprep.subr.bf16.mxu1 %v5798_v1 }
0x1914   :  { %v5630_v28 = vpop.eup %5629 }
0x1915   :  { %v2834_v32 = vmul.f32 %v5630_v28, %v5614_v56 }
0x1917   :  { %v2835_v34 = vpack.c.bf16 %v2834_v32, %v2833_v31 }
0x1919   :  { %5164 = vmatmul.mubr.msk.bf16.vlgmr.msra.gmra.mxu1 %vm363_vm6, %v2835_v34 }
0x191a   :  { %5187 = vmatprep.mubr.msk.bf16.mxu1 %vm5799_vm1, %v5798_v1  ;;  %5180 = vmatpush3.bf16.msra.mxu1 %v5475_v36 }
0x191b   :  { %5181 = vmatprep.subr.bf16.mxu1 %v5798_v1 }
0x19c1   :  { %v2523_v62 = vpop.f32.mrf.mxu1 }
0x19c3   :  { %v5129_v44 = vpop.f32.mrf.mxu1 }
0x19c5   :  { %v2526_v35 = vpop.f32.mrf.mxu1 }
0x19c7   :  { %v5130_v37 = vpop.f32.mrf.mxu1 }
0x19c8   :  { %v5477_v37 = vld [vmem:[#allocation5 + $0x48] sm:$0xff]  }
0x19c9   :  { %v2642_v4 = vpop.f32.mrf.mxu1 }
0x19cb   :  { %v5141_v38 = vpop.f32.mrf.mxu1 }
0x19cc   :  { %v5479_v38 = vld [vmem:[%s6808_s12 + $0xb8] sm:$0xff]  }
0x19cd   :  { %v2645_v40 = vpop.f32.mrf.mxu1 }
0x19ce   :  { %v5369_v20 = vpack.i.bf16 %v2645_v40, %v2642_v4  ;;  %v5478_v4 = vld [vmem:[#allocation5 + $0x40] sm:$0xff]   ;;  %v5481_v40 = vld [vmem:[%s6808_s12 + $0xa8] sm:$0xff]  }
0x19cf   :  { %v5142_v43 = vpop.f32.mrf.mxu1 }
0x19d0   :  { %5370 = vrot.lane.b32.xlu1 %v5369_v20, %s5794_s10  ;;  %v5482_v20 = vld [vmem:[%s6808_s12 + $0xa0] sm:$0xff]  }
0x19d1   :  { %v2759_v45 = vpop.f32.mrf.mxu1 }
0x19d3   :  { %v5153_v47 = vpop.f32.mrf.mxu1 }
0x19d5   :  { %v2762_v49 = vpop.f32.mrf.mxu1 }
0x19d6   :  { %v5374_v50 = vpack.i.bf16 %v2762_v49, %v2759_v45 }
0x19d7   :  { %v5154_v51 = vpop.f32.mrf.mxu1 }
0x19d8   :  { %5375 = vrot.lane.b32.xlu1 %v5374_v50, %s5803_s23 }
0x19d9   :  { %v2876_v52 = vpop.f32.mrf.mxu1 }
0x19db   :  { %v5165_v53 = vpop.f32.mrf.mxu1 }
0x19dc   :  { %v4647_v53 = vld [vmem:[%s6804_s8 + $0x2] ss:$0 sm:$0xff] }
0x19dd   :  { %v2879_v54 = vpop.f32.mrf.mxu1 }
0x19de   :  { %v5379_v24 = vpack.i.bf16 %v2879_v54, %v2876_v52 }
0x19df   :  { %v5166_v55 = vpop.f32.mrf.mxu1 }
0x19e0   :  { %5380 = vrot.lane.b32.xlu0 %v5379_v24, %s5804_s27 }
0x1a42   :  { %v5371_v56 = vpop.permute.xlu1 %5370 }
0x1a43   :  { %v5373_v26 = vunpack.i.h.bf16 %v5371_v56  ;;  %v5372_v58 = vunpack.i.l.bf16 %v5371_v56  ;;  %v4648_v56 = vld [vmem:[%s6805_s9 + $0x2] ss:$0 sm:$0xff] }
0x1a45   :  { %v2908_v63 = vsel %vm363_vm6, %v2526_v35, %v5373_v26  ;;  %v2907_v2 = vsel %vm363_vm6, %v2523_v62, %v5372_v58 }
0x1a4a   :  { %v5376_v57 = vpop.permute.xlu1 %5375 }
0x1a4b   :  { %v5378_v59 = vunpack.i.h.bf16 %v5376_v57  ;;  %v5377_v60 = vunpack.i.l.bf16 %v5376_v57 }
0x1a4d   :  { %v2909_v8 = vsel %vm854_vm7, %v2907_v2, %v5377_v60  ;;  %v2910_v9 = vsel %vm854_vm7, %v2908_v63, %v5378_v59  ;;  %v5484_v60 = vld [vmem:[%s6808_s12 + $0x90] sm:$0xff]   ;;  %v5486_v63 = vld [vmem:[%s6808_s12 + $0x80] sm:$0xff]  }
0x1a52   :  { %v5381_v61 = vpop.permute.xlu0 %5380 }
0x1a53   :  { %v5383_v3 = vunpack.i.h.bf16 %v5381_v61  ;;  %v5382_v7 = vunpack.i.l.bf16 %v5381_v61  ;;  %v5485_v61 = vld [vmem:[%s6808_s12 + $0x88] sm:$0xff]  }
0x1a55   :  { %v2911_v10 = vsel %vm857_vm8, %v2909_v8, %v5382_v7  ;;  %v2912_v29 = vsel %vm857_vm8, %v2910_v9, %v5383_v3 }
0x1a56   :  { %v2913_v11 = vpack.c.bf16 %v2912_v29, %v2911_v10 }
0x1a58   :  { %5176 = vmatmul.mubr.msk.bf16.vlgmr.msra.gmra.mxu0 %vm273_vm5, %v2913_v11 }
0x1a59   :  { %5207 = vmatprep.mubr.msk.bf16.mxu0 %vm5799_vm1, %v5798_v1  ;;  %5192 = vmatpush3.bf16.msra.mxu0 %v5479_v38  ;;  %v5490_v38 = vld [vmem:[%s6800_s4 + $0xe0] ss:$8 sps:$4 sm:$0xff]  }
0x1a5a   :  { %5193 = vmatprep.subr.bf16.mxu0 %v5798_v1 }
0x1a5d   :  { %5194 = vmatpush3.bf16.msra.mxu0 %v5480_v39  ;;  %v5495_v39 = vld [vmem:[%s6800_s4 + $0xd4] ss:$8 sps:$4 sm:$0xff]  }
0x1a5e   :  { %5195 = vmatprep.subr.bf16.mxu0 %v5798_v1 }
0x1a61   :  { %5196 = vmatpush3.bf16.msra.mxu0 %v5481_v40  ;;  %v5493_v40 = vld [vmem:[%s6800_s4 + $0xd0] ss:$8 sps:$4 sm:$0xff]  }
0x1a62   :  { %5197 = vmatprep.subr.bf16.mxu0 %v5798_v1 }
0x1a65   :  { %5198 = vmatpush3.bf16.msra.mxu0 %v5482_v20  ;;  %v5498_v20 = vld [vmem:[%s6800_s4 + $0xc4] ss:$8 sps:$4 sm:$0xff]  }
0x1a66   :  { %5199 = vmatprep.subr.bf16.mxu0 %v5798_v1 }
0x1a69   :  { %5200 = vmatpush3.bf16.msra.mxu0 %v5483_v42  ;;  %v5496_v42 = vld [vmem:[%s6800_s4 + $0xc0] ss:$8 sps:$4 sm:$0xff]  }
0x1a6a   :  { %5201 = vmatprep.subr.bf16.mxu0 %v5798_v1 }
0x1a6d   :  { %5202 = vmatpush3.bf16.msra.mxu0 %v5484_v60  ;;  %v4692_v60 = vld [vmem:[%s6801_s5 + $0x6] sm:$0x3] }
0x1a6e   :  { %5203 = vmatprep.subr.bf16.mxu0 %v5798_v1 }
0x1a71   :  { %5204 = vmatpush3.bf16.msra.mxu0 %v5485_v61  ;;  %v3314_v61 = vrot.slane %v4692_v60, %v5974_v30 }
0x1a72   :  { %5205 = vmatprep.subr.bf16.mxu0 %v5798_v1 }
0x1a75   :  { %5206 = vmatpush3.bf16.msra.mxu0 %v5486_v63 }
0x1a76   :  { %5223 = vmatprep.subr.bf16.mxu0 %v5798_v1 }
0x1b18   :  { %v2992_v13 = vpop.f32.mrf.mxu0 }
0x1b19   :  { %v2993_v14 = vadd.f32 %v4639_v12, %v2992_v13  ;;  %v4672_v13 = vld [vmem:[#allocation7 + $0x2] ss:$0 sm:$0xff] }
0x1b1a   :  { %v5177_v15 = vpop.f32.mrf.mxu0 }
0x1b1b   :  { %v2999_v16 = vadd.f32 %v2993_v14, %v6381_v5 }
0x1b1c   :  { %v2995_v17 = vpop.f32.mrf.mxu0 }
0x1b1d   :  { %v2996_v18 = vadd.f32 %v4639_v12, %v2995_v17  ;;  %v3005_v19 = vsel %vm273_vm5, %v2999_v16, 0.0 }
0x1b1e   :  { %3006 = vadd.xlane.f32.xlu1 %v3005_v19  ;;  %v5178_v22 = vpop.f32.mrf.mxu0 }
0x1b1f   :  { %v3000_v23 = vadd.f32 %v2996_v18, %v6383_v6  ;;  %v5476_v6 = vld [vmem:[#allocation5 + $0x50] sm:$0xff]  }
0x1b20   :  { %5182 = vmatpush3.bf16.msra.mxu1 %v5476_v6  ;;  %v5489_v6 = vld [vmem:[%s6800_s4 + $0xf4] ss:$8 sps:$4 sm:$0xff]  }
0x1b21   :  { %v3008_v46 = vsel %vm273_vm5, %v3000_v23, 0.0  ;;  %5183 = vmatprep.subr.bf16.mxu1 %v5798_v1 }
0x1b22   :  { %3009 = vadd.xlane.f32.xlu0 %v3008_v46 }
0x1b24   :  { %5184 = vmatpush3.bf16.msra.mxu1 %v5477_v37  ;;  %v5487_v37 = vld [vmem:[%s6800_s4 + $0xf0] ss:$8 sps:$4 sm:$0xff]  }
0x1b25   :  { %5185 = vmatprep.subr.bf16.mxu1 %v5798_v1 }
0x1b28   :  { %5186 = vmatpush3.bf16.msra.mxu1 %v5478_v4  ;;  %v5492_v4 = vld [vmem:[%s6800_s4 + $0xe4] ss:$8 sps:$4 sm:$0xff]  }
0x1b29   :  { %3372 = vmatprep.subr.bf16.mxu1 %v5489_v6 }
0x1ba7   :  { %v3007_v25 = vpop.xlane.xlu1 %3006 }
0x1ba8   :  { %v3011_v27 = vmul.f32 0.015625, %v3007_v25 }
0x1baa   :  { %v3013_v28 = vsub.f32 %v2999_v16, %v3011_v27 }
0x1bab   :  { %v3010_v31 = vpop.xlane.xlu0 %3009 }
0x1bac   :  { %v3012_v32 = vmul.f32 0.015625, %v3010_v31  ;;  %v3015_v34 = vmul.f32 %v3013_v28, %v3013_v28 }
0x1bae   :  { %v3014_v62 = vsub.f32 %v3000_v23, %v3012_v32  ;;  %v3017_v5 = vsel %vm273_vm5, %v3015_v34, 0.0 }
0x1baf   :  { %3018 = vadd.xlane.f32.xlu0 %v3017_v5 }
0x1bb0   :  { %v3016_v44 = vmul.f32 %v3014_v62, %v3014_v62 }
0x1bb2   :  { %v3020_v35 = vsel %vm273_vm5, %v3016_v44, 0.0 }
0x1bb3   :  { %3021 = vadd.xlane.f32.xlu1 %v3020_v35 }
0x1c38   :  { %v3019_v43 = vpop.xlane.xlu0 %3018 }
0x1c39   :  { %v3023_v45 = vmul.f32 0.015625, %v3019_v43 }
0x1c3b   :  { %v3025_v47 = vadd.f32 1e-05, %v3023_v45 }
0x1c3c   :  { %v3022_v48 = vpop.xlane.xlu1 %3021 }
0x1c3d   :  { %5631 = vrsqrt.f32 %v3025_v47  ;;  %v3024_v49 = vmul.f32 0.015625, %v3022_v48 }
0x1c3f   :  { %v3026_v50 = vadd.f32 1e-05, %v3024_v49 }
0x1c41   :  { %5633 = vrsqrt.f32 %v3026_v50 }
0x1c4a   :  { %v5632_v51 = vpop.eup %5631 }
0x1c4b   :  { %v3029_v52 = vmul.f32 %v5632_v51, %v3013_v28 }
0x1c4d   :  { %v3037_v55 = vmul.f32 %v4647_v53, %v3029_v52 }
0x1c4e   :  { %v5634_v54 = vpop.eup %5633 }
0x1c4f   :  { %v3030_v24 = vmul.f32 %v5634_v54, %v3014_v62  ;;  %v3045_v26 = vadd.f32 %v4648_v56, %v3037_v55 }
0x1c51   :  { %v3038_v57 = vmul.f32 %v4647_v53, %v3030_v24  ;;  %v4682_v53 = vld [vmem:[%s6810_s14 + $0x2] ss:$0 sm:$0xff] }
0x1c53   :  { %v3046_v58 = vadd.f32 %v4648_v56, %v3038_v57  ;;  %v4683_v56 = vld [vmem:[#allocation8 + $0x2] ss:$0 sm:$0xff] }
0x1c55   :  { %v3047_v59 = vpack.c.bf16 %v3046_v58, %v3045_v26 }
0x1c57   :  { %5188 = vmatmul.mubr.msk.bf16.vlgmr.msra.gmra.mxu1 %vm273_vm5, %v3047_v59 }
0x1c58   :  { %3396 = vmatprep.mubr.bf16.mxu1 %v5797_v0  ;;  %v4650_v0 = vld [vmem:[%s6807_s11 + $0x2] ss:$0 sm:$0xff]  ;;  %3373 = vmatpush1.bf16.msra.mxu1 %v5487_v37 }
0x1c59   :  { %3374 = vmatprep.subr.bf16.mxu1 %v5492_v4 }
0x1c5c   :  { %3375 = vmatpush1.bf16.msra.mxu1 %v5490_v38 }
0x1c5d   :  { %3376 = vmatprep.subr.bf16.mxu1 %v5495_v39 }
0x1c60   :  { %3377 = vmatpush1.bf16.msra.mxu1 %v5493_v40 }
0x1c61   :  { %3378 = vmatprep.subr.bf16.mxu1 %v5498_v20 }
0x1c64   :  { %3379 = vmatpush1.bf16.msra.mxu1 %v5496_v42 }
0x1c65   :  { %5211 = vmatprep.subr.bf16.mxu1 %v5798_v1 }
0x1d17   :  { %v3126_v2 = vpop.f32.mrf.mxu1 }
0x1d18   :  { %v3127_v7 = vadd.f32 %v4650_v0, %v3126_v2 }
0x1d19   :  { %v5189_v3 = vpop.f32.mrf.mxu1 }
0x1d1a   :  { %v3133_v29 = vmax.f32 %v3127_v7, 0.0 }
0x1d1b   :  { %v3129_v8 = vpop.f32.mrf.mxu1 }
0x1d1c   :  { %v3130_v9 = vadd.f32 %v4650_v0, %v3129_v8 }
0x1d1d   :  { %v5190_v10 = vpop.f32.mrf.mxu1 }
0x1d1e   :  { %v3134_v11 = vmax.f32 %v3130_v9, 0.0 }
0x1d20   :  { %v3135_v12 = vpack.c.bf16 %v3134_v11, %v3133_v29 }
0x1d22   :  { %5208 = vmatmul.mubr.bf16.vlgmr.msra.gmra.mxu0 %v3135_v12  ;;  %v3318_v12 = vrot.slane %v4692_v60, %v5980_v33 }
0x1d23   :  { %5225 = vmatprep.mubr.msk.bf16.mxu0 %vm5799_vm1, %v5798_v1 }
0x1de2   :  { %v3243_v14 = vpop.f32.mrf.mxu0 }
0x1de3   :  { %v3244_v15 = vadd.f32 %v4672_v13, %v3243_v14 }
0x1de4   :  { %v5209_v16 = vpop.f32.mrf.mxu0 }
0x1de5   :  { %v3250_v17 = vadd.f32 %v3244_v15, %v3045_v26 }
0x1de6   :  { %v3246_v18 = vpop.f32.mrf.mxu0 }
0x1de7   :  { %v3247_v19 = vadd.f32 %v4672_v13, %v3246_v18  ;;  %v3256_v22 = vsel %vm273_vm5, %v3250_v17, 0.0 }
0x1de8   :  { %3257 = vadd.xlane.f32.xlu0 %v3256_v22  ;;  %v5210_v23 = vpop.f32.mrf.mxu0 }
0x1de9   :  { %v3251_v46 = vadd.f32 %v3247_v19, %v3046_v58 }
0x1deb   :  { %v3259_v25 = vsel %vm273_vm5, %v3251_v46, 0.0 }
0x1dec   :  { %3260 = vadd.xlane.f32.xlu1 %v3259_v25 }
0x1e71   :  { %v3258_v27 = vpop.xlane.xlu0 %3257 }
0x1e72   :  { %v3262_v28 = vmul.f32 0.015625, %v3258_v27 }
0x1e74   :  { %v3264_v31 = vsub.f32 %v3250_v17, %v3262_v28 }
0x1e75   :  { %v3261_v32 = vpop.xlane.xlu1 %3260 }
0x1e76   :  { %v3263_v34 = vmul.f32 0.015625, %v3261_v32  ;;  %v3266_v62 = vmul.f32 %v3264_v31, %v3264_v31 }
0x1e78   :  { %v3265_v5 = vsub.f32 %v3251_v46, %v3263_v34  ;;  %v3268_v44 = vsel %vm273_vm5, %v3266_v62, 0.0 }
0x1e79   :  { %3269 = vadd.xlane.f32.xlu0 %v3268_v44 }
0x1e7a   :  { %v3267_v35 = vmul.f32 %v3265_v5, %v3265_v5 }
0x1e7c   :  { %v3271_v36 = vsel %vm273_vm5, %v3267_v35, 0.0 }
0x1e7d   :  { %3272 = vadd.xlane.f32.xlu1 %v3271_v36 }
0x1f02   :  { %v3270_v43 = vpop.xlane.xlu0 %3269 }
0x1f03   :  { %v3274_v45 = vmul.f32 0.015625, %v3270_v43 }
0x1f05   :  { %v3276_v47 = vadd.f32 1e-05, %v3274_v45 }
0x1f06   :  { %v3273_v48 = vpop.xlane.xlu1 %3272 }
0x1f07   :  { %5635 = vrsqrt.f32 %v3276_v47  ;;  %v3275_v49 = vmul.f32 0.015625, %v3273_v48 }
0x1f09   :  { %v3277_v50 = vadd.f32 1e-05, %v3275_v49 }
0x1f0b   :  { %5637 = vrsqrt.f32 %v3277_v50 }
0x1f14   :  { %v5636_v51 = vpop.eup %5635 }
0x1f15   :  { %v3280_v52 = vmul.f32 %v5636_v51, %v3264_v31 }
0x1f17   :  { %v3288_v55 = vmul.f32 %v4682_v53, %v3280_v52 }
0x1f18   :  { %v5638_v54 = vpop.eup %5637 }
0x1f19   :  { %v3281_v24 = vmul.f32 %v5638_v54, %v3265_v5  ;;  %v6592_v26 = vadd.f32 %v4683_v56, %v3288_v55 }
0x1f1b   :  { %v3289_v57 = vmul.f32 %v4682_v53, %v3281_v24 }
0x1f1d   :  { %v6594_v58 = vadd.f32 %v4683_v56, %v3289_v57 }
0x1f1f   :  { %v3298_v59 = vpack.c.bf16 %v6594_v58, %v6592_v26 }
0x1f21   :  { %4701 = vmatmul.mubr.msk.bf16.vlgmr.msra.gmra.mxu1 %vm273_vm5, %v3298_v59 }
0x1f22   :  { %5213 = vmatprep.mubr.msk.bf16.mxu1 %vm5799_vm1, %v5798_v1 }
0x1fe1   :  { %v3398_v63 = vpop.f32.mrf.mxu1 }
0x1fe2   :  { %v3399_v0 = vadd.f32 %v3398_v63, %v3314_v61 }
0x1fe3   :  { %v3400_v2 = vpop.f32.mrf.mxu1 }
0x1fe4   :  { %3409 = vrot.lane.b32.xlu0 %v3399_v0, %s5791_s19  ;;  %v3401_v16 = vadd.f32 %v3400_v2, %v3318_v12 }
0x1fe5   :  { %v3402_v3 = vpop.f32.mrf.mxu1 }
0x1fe6   :  { %v3403_v7 = vadd.f32 %v3402_v3, %v3314_v61 }
0x1fe7   :  { %v3404_v11 = vpop.f32.mrf.mxu1 }
0x1fe8   :  { %v3447_v8 = vpack.c.bf16 %v3403_v7, %v3399_v0  ;;  %3411 = vrot.lane.b32.xlu1 %v3403_v7, %s5791_s19  ;;  %v3405_v14 = vadd.f32 %v3404_v11, %v3318_v12 }
0x1fea   :  { %3681 = vrot.lane.b32.xlu0 %v3447_v8, %s5801_s25  ;;  %v6612_v18 = vpack.c.bf16 %v3405_v14, %v3401_v16 }
0x1fec   :  { %3563 = vrot.lane.b32.xlu1 %v3447_v8, %s5800_s24 }
0x1fee   :  { %3798 = vrot.lane.b32.xlu0 %v3447_v8, %s5802_s26 }
0x2056   :  { %v3410_v9 = vpop.permute.xlu0 %3409 }
0x2057   :  { %3415 = vxpose.xlu1.b32.start [1/2] (short) (narrow) %v3410_v9, 64 }
0x205a   :  { %v3412_v10 = vpop.permute.xlu1 %3411 }
0x205b   :  { %3416 = vxpose.xlu1.b32.end [2/2] (short) (narrow) %v3412_v10, 64 }
0x205c   :  { %v3682_v27 = vpop.permute.xlu0 %3681 }
0x205e   :  { %v3564_v30 = vpop.permute.xlu1 %3563 }
0x2060   :  { %v3799_v32 = vpop.permute.xlu0 %3798 }
0x20d3   :  { %v3431_v29 = vpop.trf.xlu1 }
0x20d7   :  { %v3432_v13 = vpop.trf.xlu1 }
0x20d8   :  { %v3448_v15 = vpack.c.bf16 %v3432_v13, %v3431_v29 }
0x20da   :  { %5212 = vmatpush3.bf16.msra.mxu1 %v3448_v15 }
0x20db   :  { %v3433_v17 = vpop.trf.xlu1  ;;  %5217 = vmatprep.subr.bf16.mxu1 %v5798_v1 }
0x20dd   :  { %5214 = vmatmul.mubr.msk.bf16.vlgmr.msra.gmra.mxu1 %vm363_vm6, %v3447_v8 }
0x20de   :  { %5218 = vmatpush3.bf16.msra.mxu1 %v6612_v18  ;;  %5219 = vmatprep.mubr.msk.bf16.mxu1 %vm5799_vm1, %v5798_v1 }
0x20df   :  { %v3434_v19 = vpop.trf.xlu1  ;;  %5229 = vmatprep.subr.bf16.mxu1 %v5798_v1 }
0x20e0   :  { %v3561_v33 = vpack.c.bf16 %v3434_v19, %v3433_v17 }
0x20e2   :  { %5224 = vmatpush3.bf16.msra.mxu0 %v3561_v33 }
0x20e3   :  { %v3435_v22 = vpop.trf.xlu1  ;;  %5235 = vmatprep.subr.bf16.mxu0 %v5798_v1 }
0x20e5   :  { %5226 = vmatmul.mubr.msk.bf16.vlgmr.msra.gmra.mxu0 %vm363_vm6, %v3564_v30 }
0x20e6   :  { %5237 = vmatprep.mubr.msk.bf16.mxu0 %vm5799_vm1, %v5798_v1 }
0x20e7   :  { %v3436_v23 = vpop.trf.xlu1 }
0x20e8   :  { %v3680_v46 = vpack.c.bf16 %v3436_v23, %v3435_v22 }
0x20ea   :  { %5236 = vmatpush3.bf16.msra.mxu0 %v3680_v46 }
0x20eb   :  { %v3437_v25 = vpop.trf.xlu1  ;;  %5247 = vmatprep.subr.bf16.mxu0 %v5798_v1 }
0x20ed   :  { %5238 = vmatmul.mubr.msk.bf16.vlgmr.msra.gmra.mxu0 %vm363_vm6, %v3682_v27 }
0x20ee   :  { %5249 = vmatprep.mubr.msk.bf16.mxu0 %vm5799_vm1, %v5798_v1 }
0x20ef   :  { %v3438_v28 = vpop.trf.xlu1 }
0x20f0   :  { %v3797_v31 = vpack.c.bf16 %v3438_v28, %v3437_v25 }
0x20f2   :  { %5248 = vmatpush3.bf16.msra.mxu0 %v3797_v31 }
0x20f3   :  { %5259 = vmatprep.subr.bf16.mxu0 %v5798_v1 }
0x20f5   :  { %5250 = vmatmul.mubr.msk.bf16.vlgmr.msra.gmra.mxu0 %vm363_vm6, %v3799_v32 }
0x20f6   :  { %5267 = vmatprep.mubr.msk.bf16.mxu0 %vm5799_vm1, %v5798_v1 }
0x219d   :  { %v3487_v34 = vpop.f32.mrf.mxu1 }
0x219e   :  { %v3488_v62 = vadd.f32 %v6423_v41, %v3487_v34 }
0x219f   :  { %v5215_v5 = vpop.f32.mrf.mxu1 }
0x21a0   :  { %v3494_v44 = vsel %vm363_vm6, %v3488_v62, -inf }
0x21a1   :  { %3495 = vmax.xlane.f32.xlu0 %v3494_v44  ;;  %v3490_v35 = vpop.f32.mrf.mxu1 }
0x21a2   :  { %v3491_v36 = vadd.f32 %v6430_v21, %v3490_v35 }
0x21a3   :  { %v5216_v6 = vpop.f32.mrf.mxu1 }
0x21a4   :  { %v3497_v37 = vsel %vm363_vm6, %v3491_v36, -inf }
0x21a5   :  { %3498 = vmax.xlane.f32.xlu0 %v3497_v37  ;;  %v3602_v4 = vpop.f32.mrf.mxu0 }
0x21a6   :  { %v3603_v38 = vadd.f32 %v6423_v41, %v3602_v4 }
0x21a7   :  { %v5227_v39 = vpop.f32.mrf.mxu0 }
0x21a8   :  { %v3609_v40 = vsel %vm363_vm6, %v3603_v38, -inf }
0x21a9   :  { %3610 = vmax.xlane.f32.xlu0 %v3609_v40  ;;  %v3605_v20 = vpop.f32.mrf.mxu0 }
0x21aa   :  { %v3606_v42 = vadd.f32 %v6430_v21, %v3605_v20 }
0x21ab   :  { %v5228_v43 = vpop.f32.mrf.mxu0 }
0x21ac   :  { %v3612_v45 = vsel %vm363_vm6, %v3606_v42, -inf }
0x21ad   :  { %3613 = vmax.xlane.f32.xlu1 %v3612_v45  ;;  %v3720_v47 = vpop.f32.mrf.mxu0 }
0x21ae   :  { %v3721_v48 = vadd.f32 %v6423_v41, %v3720_v47 }
0x21af   :  { %v5239_v49 = vpop.f32.mrf.mxu0 }
0x21b0   :  { %v3727_v50 = vsel %vm363_vm6, %v3721_v48, -inf }
0x21b1   :  { %3728 = vmax.xlane.f32.xlu0 %v3727_v50  ;;  %v3723_v51 = vpop.f32.mrf.mxu0 }
0x21b2   :  { %v3724_v52 = vadd.f32 %v6430_v21, %v3723_v51 }
0x21b3   :  { %v5240_v53 = vpop.f32.mrf.mxu0 }
0x21b4   :  { %v3730_v54 = vsel %vm363_vm6, %v3724_v52, -inf }
0x21b5   :  { %3731 = vmax.xlane.f32.xlu0 %v3730_v54  ;;  %v3837_v24 = vpop.f32.mrf.mxu0 }
0x21b6   :  { %v3838_v55 = vadd.f32 %v6423_v41, %v3837_v24 }
0x21b7   :  { %v5251_v56 = vpop.f32.mrf.mxu0 }
0x21b8   :  { %v3844_v57 = vsel %vm363_vm6, %v3838_v55, -inf }
0x21b9   :  { %3845 = vmax.xlane.f32.xlu0 %v3844_v57  ;;  %v3840_v59 = vpop.f32.mrf.mxu0 }
0x21ba   :  { %v3841_v60 = vadd.f32 %v6430_v21, %v3840_v59 }
0x21bb   :  { %v5252_v61 = vpop.f32.mrf.mxu0 }
0x21bc   :  { %v3847_v63 = vsel %vm363_vm6, %v3841_v60, -inf }
0x21bd   :  { %3848 = vmax.xlane.f32.xlu0 %v3847_v63 }
0x21be   :  { %3750 = vrot.lane.b32.xlu1 %v6612_v18, %s5801_s25 }
0x21d3   :  { %3633 = vrot.lane.b32.xlu0 %v6612_v18, %s5800_s24 }
0x222a   :  { %v3496_v0 = vpop.xlane.xlu0 %3495 }
0x222b   :  { %v3500_v2 = vsub.f32 %v3488_v62, %v3496_v0 }
0x222d   :  { %v3502_v41 = vmul.f32 1.442695, %v3500_v2 }
0x222e   :  { %v3499_v3 = vpop.xlane.xlu0 %3498 }
0x222f   :  { %5639 = vpow2.f32 %v3502_v41  ;;  %v3501_v7 = vsub.f32 %v3491_v36, %v3499_v3 }
0x2231   :  { %v3504_v8 = vmul.f32 1.442695, %v3501_v7 }
0x2232   :  { %v3611_v9 = vpop.xlane.xlu0 %3610 }
0x2233   :  { %5641 = vpow2.f32 %v3504_v8  ;;  %v3615_v21 = vsub.f32 %v3603_v38, %v3611_v9 }
0x2235   :  { %v3617_v10 = vmul.f32 1.442695, %v3615_v21 }
0x2236   :  { %v3614_v30 = vpop.xlane.xlu1 %3613 }
0x2237   :  { %5643 = vpow2.f32 %v3617_v10  ;;  %v3616_v29 = vsub.f32 %v3606_v42, %v3614_v30 }
0x2239   :  { %v3619_v11 = vmul.f32 1.442695, %v3616_v29 }
0x223a   :  { %v3729_v12 = vpop.xlane.xlu0 %3728  ;;  %v3751_v61 = vpop.permute.xlu1 %3750 }
0x223b   :  { %5645 = vpow2.f32 %v3619_v11  ;;  %v3733_v13 = vsub.f32 %v3721_v48, %v3729_v12 }
0x223c   :  { %v5640_v14 = vpop.eup %5639 }
0x223d   :  { %v3735_v15 = vmul.f32 1.442695, %v3733_v13  ;;  %v3506_v16 = vsel %vm363_vm6, %v5640_v14, 0.0  ;;  %v5499_v13 = vld [vmem:[%s6802_s6 + $0x78] sm:$0xff]  }
0x223e   :  { %v3732_v17 = vpop.xlane.xlu0 %3731  ;;  %3507 = vadd.xlane.f32.xlu0 %v3506_v16  ;;  %5260 = vmatpush3.bf16.msra.mxu0 %v5499_v13  ;;  %v5509_v13 = vld [vmem:[%s6808_s12 + $0xe8] sm:$0xff]  }
0x223f   :  { %5647 = vpow2.f32 %v3735_v15  ;;  %v3734_v19 = vsub.f32 %v3724_v52, %v3732_v17  ;;  %5261 = vmatprep.subr.bf16.mxu0 %v5798_v1  ;;  %v5500_v17 = vld [vmem:[%s6802_s6 + $0x70] sm:$0xff]  }
0x2240   :  { %v5642_v33 = vpop.eup %5641 }
0x2241   :  { %v3737_v22 = vmul.f32 1.442695, %v3734_v19  ;;  %v3509_v23 = vsel %vm363_vm6, %v5642_v33, 0.0 }
0x2242   :  { %v3846_v46 = vpop.xlane.xlu0 %3845  ;;  %3510 = vadd.xlane.f32.xlu0 %v3509_v23  ;;  %5262 = vmatpush3.bf16.msra.mxu0 %v5500_v17 }
0x2243   :  { %5649 = vpow2.f32 %v3737_v22  ;;  %v3850_v25 = vsub.f32 %v3838_v55, %v3846_v46  ;;  %v5501_v22 = vld [vmem:[%s6802_s6 + $0x68] sm:$0xff]   ;;  %5263 = vmatprep.subr.bf16.mxu0 %v5798_v1 }
0x2244   :  { %v5644_v27 = vpop.eup %5643 }
0x2245   :  { %v3852_v28 = vmul.f32 1.442695, %v3850_v25  ;;  %v3621_v31 = vsel %vm363_vm6, %v5644_v27, 0.0 }
0x2246   :  { %3622 = vadd.xlane.f32.xlu0 %v3621_v31  ;;  %v3849_v32 = vpop.xlane.xlu0 %3848  ;;  %5264 = vmatpush3.bf16.msra.mxu0 %v5501_v22 }
0x2247   :  { %5651 = vpow2.f32 %v3852_v28  ;;  %v3851_v34 = vsub.f32 %v3841_v60, %v3849_v32  ;;  %5265 = vmatprep.subr.bf16.mxu0 %v5798_v1 }
0x2248   :  { %v5646_v62 = vpop.eup %5645 }
0x2249   :  { %v3854_v5 = vmul.f32 1.442695, %v3851_v34  ;;  %v3624_v44 = vsel %vm363_vm6, %v5646_v62, 0.0 }
0x224a   :  { %3625 = vadd.xlane.f32.xlu0 %v3624_v44  ;;  %v3634_v20 = vpop.permute.xlu0 %3633 }
0x224b   :  { %5653 = vpow2.f32 %v3854_v5 }
0x224c   :  { %v5648_v35 = vpop.eup %5647 }
0x224d   :  { %v3739_v36 = vsel %vm363_vm6, %v5648_v35, 0.0 }
0x224e   :  { %3740 = vadd.xlane.f32.xlu0 %v3739_v36 }
0x2250   :  { %v5650_v6 = vpop.eup %5649 }
0x2251   :  { %v3742_v37 = vsel %vm363_vm6, %v5650_v6, 0.0 }
0x2252   :  { %3743 = vadd.xlane.f32.xlu0 %v3742_v37 }
0x2254   :  { %v5652_v4 = vpop.eup %5651 }
0x2255   :  { %v3856_v38 = vsel %vm363_vm6, %v5652_v4, 0.0 }
0x2256   :  { %3857 = vadd.xlane.f32.xlu0 %v3856_v38 }
0x2258   :  { %v5654_v39 = vpop.eup %5653 }
0x2259   :  { %v3859_v40 = vsel %vm363_vm6, %v5654_v39, 0.0 }
0x225a   :  { %3860 = vadd.xlane.f32.xlu0 %v3859_v40 }
0x2270   :  { %3867 = vrot.lane.b32.xlu0 %v6612_v18, %s5802_s26 }
0x22c7   :  { %v3508_v42 = vpop.xlane.xlu0 %3507 }
0x22c8   :  { %5655 = vrcp.f32 %v3508_v42 }
0x22cb   :  { %v3511_v43 = vpop.xlane.xlu0 %3510 }
0x22cc   :  { %5657 = vrcp.f32 %v3511_v43 }
0x22cf   :  { %v3623_v45 = vpop.xlane.xlu0 %3622 }
0x22d0   :  { %5659 = vrcp.f32 %v3623_v45 }
0x22d3   :  { %v3626_v47 = vpop.xlane.xlu0 %3625 }
0x22d4   :  { %5661 = vrcp.f32 %v3626_v47 }
0x22d5   :  { %v5656_v48 = vpop.eup %5655 }
0x22d6   :  { %v3514_v51 = vmul.f32 %v5656_v48, %v5640_v14 }
0x22d7   :  { %v3741_v49 = vpop.xlane.xlu0 %3740 }
0x22d8   :  { %5663 = vrcp.f32 %v3741_v49 }
0x22d9   :  { %v5658_v50 = vpop.eup %5657 }
0x22da   :  { %v3515_v52 = vmul.f32 %v5658_v50, %v5642_v33 }
0x22db   :  { %v3744_v53 = vpop.xlane.xlu0 %3743 }
0x22dc   :  { %5665 = vrcp.f32 %v3744_v53  ;;  %v3516_v54 = vpack.c.bf16 %v3515_v52, %v3514_v51  ;;  %v4719_v52 = vld [vmem:[%s6803_s7 + $0x3] ss:$0 sm:$0xff] }
0x22dd   :  { %v5660_v18 = vpop.eup %5659 }
0x22de   :  { %5220 = vmatmul.mubr.msk.bf16.vlgmr.msra.gmra.mxu1 %vm363_vm6, %v3516_v54  ;;  %v3629_v56 = vmul.f32 %v5660_v18, %v5644_v27  ;;  %v5502_v27 = vld [vmem:[%s6802_s6 + $0x60] sm:$0xff]  }
0x22df   :  { %5230 = vmatpush3.bf16.msra.mxu1 %v3634_v20  ;;  %v3858_v24 = vpop.xlane.xlu0 %3857  ;;  %5231 = vmatprep.mubr.msk.bf16.mxu1 %vm5799_vm1, %v5798_v1 }
0x22e0   :  { %5241 = vmatprep.subr.bf16.mxu1 %v5798_v1  ;;  %5667 = vrcp.f32 %v3858_v24  ;;  %5266 = vmatpush3.bf16.msra.mxu0 %v5502_v27  ;;  %v4727_v27 = vld [vmem:[%s6804_s8 + $0x3] ss:$0 sm:$0xff] }
0x22e1   :  { %v5662_v55 = vpop.eup %5661  ;;  %5283 = vmatprep.subr.bf16.mxu0 %v5798_v1 }
0x22e2   :  { %v3630_v57 = vmul.f32 %v5662_v55, %v5646_v62 }
0x22e3   :  { %v3861_v59 = vpop.xlane.xlu0 %3860 }
0x22e4   :  { %5669 = vrcp.f32 %v3861_v59  ;;  %v3631_v60 = vpack.c.bf16 %v3630_v57, %v3629_v56 }
0x22e5   :  { %v5664_v63 = vpop.eup %5663 }
0x22e6   :  { %5232 = vmatmul.mubr.msk.bf16.vlgmr.msra.gmra.mxu1 %vm363_vm6, %v3631_v60  ;;  %v3747_v2 = vmul.f32 %v5664_v63, %v5648_v35 }
0x22e7   :  { %5242 = vmatpush3.bf16.msra.mxu1 %v3751_v61  ;;  %5243 = vmatprep.mubr.msk.bf16.mxu1 %vm5799_vm1, %v5798_v1  ;;  %v3868_v7 = vpop.permute.xlu0 %3867 }
0x22e8   :  { %5253 = vmatprep.subr.bf16.mxu1 %v5798_v1 }
0x22e9   :  { %v5666_v0 = vpop.eup %5665 }
0x22ea   :  { %v3748_v41 = vmul.f32 %v5666_v0, %v5650_v6 }
0x22ec   :  { %v3749_v3 = vpack.c.bf16 %v3748_v41, %v3747_v2 }
0x22ed   :  { %v5668_v8 = vpop.eup %5667 }
0x22ee   :  { %5244 = vmatmul.mubr.msk.bf16.vlgmr.msra.gmra.mxu1 %vm363_vm6, %v3749_v3  ;;  %v3864_v21 = vmul.f32 %v5668_v8, %v5652_v4 }
0x22ef   :  { %5254 = vmatpush3.bf16.msra.mxu1 %v3868_v7  ;;  %5255 = vmatprep.mubr.msk.bf16.mxu1 %vm5799_vm1, %v5798_v1 }
0x22f0   :  { %5271 = vmatprep.subr.bf16.mxu1 %v5798_v1 }
0x22f1   :  { %v5670_v9 = vpop.eup %5669 }
0x22f2   :  { %v3865_v10 = vmul.f32 %v5670_v9, %v5654_v39 }
0x22f4   :  { %v3866_v30 = vpack.c.bf16 %v3865_v10, %v3864_v21  ;;  %v5503_v10 = vld [vmem:[#allocation5 + $0x78] sm:$0xff]  }
0x22f6   :  { %5256 = vmatmul.mubr.msk.bf16.vlgmr.msra.gmra.mxu1 %vm363_vm6, %v3866_v30  ;;  %v5505_v30 = vld [vmem:[#allocation5 + $0x68] sm:$0xff]  }
0x22f7   :  { %5279 = vmatprep.mubr.msk.bf16.mxu1 %vm5799_vm1, %v5798_v1  ;;  %5272 = vmatpush3.bf16.msra.mxu1 %v5503_v10 }
0x22f8   :  { %5273 = vmatprep.subr.bf16.mxu1 %v5798_v1 }
0x239e   :  { %v3554_v29 = vpop.f32.mrf.mxu1 }
0x23a0   :  { %v5221_v11 = vpop.f32.mrf.mxu1 }
0x23a1   :  { %v5507_v11 = vld [vmem:[%s6808_s12 + $0xf8] sm:$0xff]  }
0x23a2   :  { %v3557_v12 = vpop.f32.mrf.mxu1 }
0x23a4   :  { %v5222_v14 = vpop.f32.mrf.mxu1 }
0x23a5   :  { %v5510_v14 = vld [vmem:[%s6808_s12 + $0xe0] sm:$0xff]  }
0x23a6   :  { %v3673_v15 = vpop.f32.mrf.mxu1 }
0x23a8   :  { %v5233_v16 = vpop.f32.mrf.mxu1 }
0x23aa   :  { %v3676_v19 = vpop.f32.mrf.mxu1 }
0x23ab   :  { %v5384_v33 = vpack.i.bf16 %v3676_v19, %v3673_v15  ;;  %v5511_v15 = vld [vmem:[%s6808_s12 + $0xd8] sm:$0xff]  }
0x23ac   :  { %v5234_v23 = vpop.f32.mrf.mxu1 }
0x23ad   :  { %5385 = vrot.lane.b32.xlu0 %v5384_v33, %s5794_s10  ;;  %s6822_s10 = sld [smem:[#allocation17_spill]] }
0x23ae   :  { %v3790_v46 = vpop.f32.mrf.mxu1 }
0x23b0   :  { %v5245_v25 = vpop.f32.mrf.mxu1 }
0x23b2   :  { %v3793_v28 = vpop.f32.mrf.mxu1 }
0x23b3   :  { %v5389_v31 = vpack.i.bf16 %v3793_v28, %v3790_v46 }
0x23b4   :  { %v5246_v32 = vpop.f32.mrf.mxu1 }
0x23b5   :  { %5390 = vrot.lane.b32.xlu0 %v5389_v31, %s5803_s23 }
0x23b6   :  { %v3907_v34 = vpop.f32.mrf.mxu1 }
0x23b8   :  { %v5257_v62 = vpop.f32.mrf.mxu1 }
0x23ba   :  { %v3910_v5 = vpop.f32.mrf.mxu1 }
0x23bb   :  { %v5394_v44 = vpack.i.bf16 %v3910_v5, %v3907_v34  ;;  %v4728_v34 = vld [vmem:[%s6805_s9 + $0x3] ss:$0 sm:$0xff] }
0x23bc   :  { %v5258_v35 = vpop.f32.mrf.mxu1 }
0x23bd   :  { %5395 = vrot.lane.b32.xlu1 %v5394_v44, %s5804_s27 }
0x241f   :  { %v5386_v36 = vpop.permute.xlu0 %5385 }
0x2420   :  { %v5388_v37 = vunpack.i.h.bf16 %v5386_v36  ;;  %v5387_v4 = vunpack.i.l.bf16 %v5386_v36  ;;  %v5512_v36 = vld [vmem:[%s6808_s12 + $0xd0] sm:$0xff]  }
0x2422   :  { %v3939_v20 = vsel %vm363_vm6, %v3557_v12, %v5388_v37  ;;  %v3938_v42 = vsel %vm363_vm6, %v3554_v29, %v5387_v4  ;;  %v5506_v29 = vld [vmem:[#allocation5 + $0x60] sm:$0xff]   ;;  %v5508_v12 = vld [vmem:[%s6808_s12 + $0xf0] sm:$0xff]  }
0x2423   :  { %v5514_v37 = vld [vmem:[%s6808_s12 + $0xc0] sm:$0xff]  }
0x2424   :  { %v4730_v4 = vld [vmem:[%s6807_s11 + $0x3] ss:$0 sm:$0xff] }
0x2427   :  { %v5391_v6 = vpop.permute.xlu0 %5390 }
0x2428   :  { %v5393_v38 = vunpack.i.h.bf16 %v5391_v6  ;;  %v5392_v39 = vunpack.i.l.bf16 %v5391_v6  ;;  %v5513_v6 = vld [vmem:[%s6808_s12 + $0xc8] sm:$0xff]  }
0x242a   :  { %v3940_v47 = vsel %vm854_vm7, %v3938_v42, %v5392_v39  ;;  %v3941_v48 = vsel %vm854_vm7, %v3939_v20, %v5393_v38 }
0x242f   :  { %v5396_v40 = vpop.permute.xlu1 %5395 }
0x2430   :  { %v5398_v43 = vunpack.i.h.bf16 %v5396_v40  ;;  %v5397_v45 = vunpack.i.l.bf16 %v5396_v40 }
0x2432   :  { %v3942_v49 = vsel %vm857_vm8, %v3940_v47, %v5397_v45  ;;  %v3943_v50 = vsel %vm857_vm8, %v3941_v48, %v5398_v43 }
0x2433   :  { %v3944_v51 = vpack.c.bf16 %v3943_v50, %v3942_v49  ;;  %v4752_v49 = vld [vmem:[#allocation7 + $0x3] ss:$0 sm:$0xff] }
0x2435   :  { %5268 = vmatmul.mubr.msk.bf16.vlgmr.msra.gmra.mxu0 %vm273_vm5, %v3944_v51 }
0x2436   :  { %5299 = vmatprep.mubr.msk.bf16.mxu0 %vm5799_vm1, %v5798_v1  ;;  %5284 = vmatpush3.bf16.msra.mxu0 %v5507_v11 }
0x2437   :  { %5285 = vmatprep.subr.bf16.mxu0 %v5798_v1 }
0x243a   :  { %5286 = vmatpush3.bf16.msra.mxu0 %v5508_v12  ;;  %v4762_v12 = vld [vmem:[%s6810_s14 + $0x3] ss:$0 sm:$0xff] }
0x243b   :  { %5287 = vmatprep.subr.bf16.mxu0 %v5798_v1 }
0x243e   :  { %5288 = vmatpush3.bf16.msra.mxu0 %v5509_v13 }
0x243f   :  { %5289 = vmatprep.subr.bf16.mxu0 %v5798_v1 }
0x2442   :  { %5290 = vmatpush3.bf16.msra.mxu0 %v5510_v14 }
0x2443   :  { %5291 = vmatprep.subr.bf16.mxu0 %v5798_v1 }
0x2446   :  { %5292 = vmatpush3.bf16.msra.mxu0 %v5511_v15 }
0x2447   :  { %5293 = vmatprep.subr.bf16.mxu0 %v5798_v1 }
0x244a   :  { %5294 = vmatpush3.bf16.msra.mxu0 %v5512_v36 }
0x244b   :  { %5295 = vmatprep.subr.bf16.mxu0 %v5798_v1 }
0x244e   :  { %5296 = vmatpush3.bf16.msra.mxu0 %v5513_v6 }
0x244f   :  { %5297 = vmatprep.subr.bf16.mxu0 %v5798_v1 }
0x2452   :  { %5298 = vmatpush3.bf16.msra.mxu0 %v5514_v37 }
0x24f5   :  { %v4023_v53 = vpop.f32.mrf.mxu0 }
0x24f6   :  { %v4024_v54 = vadd.f32 %v4719_v52, %v4023_v53 }
0x24f7   :  { %v5269_v18 = vpop.f32.mrf.mxu0 }
0x24f8   :  { %v4030_v24 = vadd.f32 %v4024_v54, %v6592_v26 }
0x24f9   :  { %v4026_v55 = vpop.f32.mrf.mxu0 }
0x24fa   :  { %v4027_v56 = vadd.f32 %v4719_v52, %v4026_v55  ;;  %v4036_v57 = vsel %vm273_vm5, %v4030_v24, 0.0 }
0x24fb   :  { %4037 = vadd.xlane.f32.xlu0 %v4036_v57  ;;  %v5270_v59 = vpop.f32.mrf.mxu0 }
0x24fc   :  { %v4031_v60 = vadd.f32 %v4027_v56, %v6594_v58  ;;  %v5504_v58 = vld [vmem:[#allocation5 + $0x70] sm:$0xff]  }
0x24fd   :  { %5274 = vmatpush3.bf16.msra.mxu1 %v5504_v58 }
0x24fe   :  { %v4039_v61 = vsel %vm273_vm5, %v4031_v60, 0.0  ;;  %5275 = vmatprep.subr.bf16.mxu1 %v5798_v1 }
0x24ff   :  { %4040 = vadd.xlane.f32.xlu1 %v4039_v61 }
0x2501   :  { %5276 = vmatpush3.bf16.msra.mxu1 %v5505_v30 }
0x2502   :  { %5277 = vmatprep.subr.bf16.mxu1 %v5798_v1 }
0x2505   :  { %5278 = vmatpush3.bf16.msra.mxu1 %v5506_v29 }
0x2506   :  { %5303 = vmatprep.subr.bf16.mxu1 %v5798_v1 }
0x2584   :  { %v4038_v63 = vpop.xlane.xlu0 %4037 }
0x2585   :  { %v4042_v0 = vmul.f32 0.015625, %v4038_v63 }
0x2587   :  { %v4044_v2 = vsub.f32 %v4030_v24, %v4042_v0 }
0x2588   :  { %v4041_v41 = vpop.xlane.xlu1 %4040 }
0x2589   :  { %v4043_v3 = vmul.f32 0.015625, %v4041_v41  ;;  %v4046_v7 = vmul.f32 %v4044_v2, %v4044_v2 }
0x258b   :  { %v4045_v8 = vsub.f32 %v4031_v60, %v4043_v3  ;;  %v4048_v26 = vsel %vm273_vm5, %v4046_v7, 0.0 }
0x258c   :  { %4049 = vadd.xlane.f32.xlu0 %v4048_v26 }
0x258d   :  { %v4047_v9 = vmul.f32 %v4045_v8, %v4045_v8 }
0x258f   :  { %v4051_v21 = vsel %vm273_vm5, %v4047_v9, 0.0 }
0x2590   :  { %4052 = vadd.xlane.f32.xlu0 %v4051_v21 }
0x2615   :  { %v4050_v16 = vpop.xlane.xlu0 %4049 }
0x2616   :  { %v4054_v17 = vmul.f32 0.015625, %v4050_v16  ;;  %v4763_v16 = vld [vmem:[#allocation8 + $0x3] ss:$0 sm:$0xff] }
0x2618   :  { %v4056_v19 = vadd.f32 1e-05, %v4054_v17 }
0x2619   :  { %v4053_v33 = vpop.xlane.xlu0 %4052 }
0x261a   :  { %5671 = vrsqrt.f32 %v4056_v19  ;;  %v4055_v22 = vmul.f32 0.015625, %v4053_v33 }
0x261c   :  { %v4057_v23 = vadd.f32 1e-05, %v4055_v22 }
0x261e   :  { %5673 = vrsqrt.f32 %v4057_v23  ;;  %v4329_v23 = vld [vmem:[%s6822_s10] sm:$0x1] }
0x2627   :  { %v5672_v46 = vpop.eup %5671 }
0x2628   :  { %v4060_v25 = vmul.f32 %v5672_v46, %v4044_v2  ;;  %v5515_v46 = vld [vmem:[%s6812_s16 + $0x18] sm:$0xff]  }
0x262a   :  { %v4068_v32 = vmul.f32 %v4727_v27, %v4060_v25  ;;  %v5516_v25 = vld [vmem:[%s6812_s16 + $0x10] sm:$0xff]  }
0x262b   :  { %v5674_v28 = vpop.eup %5673 }
0x262c   :  { %v4061_v31 = vmul.f32 %v5674_v28, %v4045_v8  ;;  %v4076_v5 = vadd.f32 %v4728_v34, %v4068_v32  ;;  %v5518_v28 = vld [vmem:[%s6812_s16] sm:$0xff]  }
0x262e   :  { %v4069_v62 = vmul.f32 %v4727_v27, %v4061_v31  ;;  %v5517_v27 = vld [vmem:[%s6812_s16 + $0x8] sm:$0xff]   ;;  %s5761_s16 = scalar_lea.vmem %s4465_s0, 32 }
0x262f   :  { %p5762_p6 = scmp.ne.s32.totalorder %s4465_s0, %s5761_s16  ;;  %p5767_p8 = scmp.lt.s32.totalorder %s5761_s16, %s5761_s16 }
0x2630   :  { %v4077_v44 = vadd.f32 %v4728_v34, %v4069_v62 }
0x2631   :  { %p5768_p9 = por %p5767_p8, %p5766_p7 }
0x2632   :  { %v4078_v35 = vpack.c.bf16 %v4077_v44, %v4076_v5 }
0x2633   :  { %p5769_p10 = pnand %p5768_p9, %p5762_p6 }
0x2634   :  { %5280 = vmatmul.mubr.msk.bf16.vlgmr.msra.gmra.mxu1 %vm273_vm5, %v4078_v35 }
0x2635   :  { %5305 = vmatprep.mubr.msk.bf16.mxu1 %vm5799_vm1, %v5798_v1 }
0x26f4   :  { %v4157_v38 = vpop.f32.mrf.mxu1 }
0x26f5   :  { %v4158_v40 = vadd.f32 %v4730_v4, %v4157_v38 }
0x26f6   :  { %v5281_v39 = vpop.f32.mrf.mxu1 }
0x26f7   :  { %v4164_v45 = vmax.f32 %v4158_v40, 0.0 }
0x26f8   :  { %v4160_v20 = vpop.f32.mrf.mxu1 }
0x26f9   :  { %v4161_v42 = vadd.f32 %v4730_v4, %v4160_v20 }
0x26fa   :  { %v5282_v43 = vpop.f32.mrf.mxu1 }
0x26fb   :  { %v4165_v47 = vmax.f32 %v4161_v42, 0.0 }
0x26fd   :  { %v4166_v48 = vpack.c.bf16 %v4165_v47, %v4164_v45 }
0x26ff   :  { %5300 = vmatmul.mubr.bf16.vlgmr.msra.gmra.mxu0 %v4166_v48 }
0x27bf   :  { %v4274_v50 = vpop.f32.mrf.mxu0 }
0x27c0   :  { %v4275_v51 = vadd.f32 %v4752_v49, %v4274_v50 }
0x27c1   :  { %v5301_v52 = vpop.f32.mrf.mxu0 }
0x27c2   :  { %v4281_v53 = vadd.f32 %v4275_v51, %v4076_v5 }
0x27c3   :  { %v4277_v54 = vpop.f32.mrf.mxu0 }
0x27c4   :  { %v4278_v18 = vadd.f32 %v4752_v49, %v4277_v54  ;;  %v4287_v24 = vsel %vm273_vm5, %v4281_v53, 0.0 }
0x27c5   :  { %4288 = vadd.xlane.f32.xlu1 %v4287_v24  ;;  %v5302_v55 = vpop.f32.mrf.mxu0 }
0x27c6   :  { %v4282_v56 = vadd.f32 %v4278_v18, %v4077_v44  ;;  %v4765_v44 = vld [vmem:[%s6813_s17] ss:$0 sm:$0xff] }
0x27c8   :  { %v4290_v57 = vsel %vm273_vm5, %v4282_v56, 0.0 }
0x27c9   :  { %4291 = vadd.xlane.f32.xlu0 %v4290_v57 }
0x284e   :  { %v4289_v59 = vpop.xlane.xlu1 %4288 }
0x284f   :  { %v4293_v60 = vmul.f32 0.015625, %v4289_v59 }
0x2851   :  { %v4295_v61 = vsub.f32 %v4281_v53, %v4293_v60 }
0x2852   :  { %v4292_v63 = vpop.xlane.xlu0 %4291 }
0x2853   :  { %v4294_v0 = vmul.f32 0.015625, %v4292_v63  ;;  %v4297_v2 = vmul.f32 %v4295_v61, %v4295_v61 }
0x2855   :  { %v4296_v41 = vsub.f32 %v4282_v56, %v4294_v0  ;;  %v4299_v3 = vsel %vm273_vm5, %v4297_v2, 0.0 }
0x2856   :  { %4300 = vadd.xlane.f32.xlu1 %v4299_v3 }
0x2857   :  { %v4298_v7 = vmul.f32 %v4296_v41, %v4296_v41 }
0x2859   :  { %v4302_v8 = vsel %vm273_vm5, %v4298_v7, 0.0 }
0x285a   :  { %4303 = vadd.xlane.f32.xlu0 %v4302_v8 }
0x28df   :  { %v4301_v26 = vpop.xlane.xlu1 %4300 }
0x28e0   :  { %v4305_v9 = vmul.f32 0.015625, %v4301_v26 }
0x28e2   :  { %v4307_v21 = vadd.f32 1e-05, %v4305_v9 }
0x28e3   :  { %v4304_v10 = vpop.xlane.xlu0 %4303 }
0x28e4   :  { %5675 = vrsqrt.f32 %v4307_v21  ;;  %v4306_v58 = vmul.f32 0.015625, %v4304_v10 }
0x28e6   :  { %v4308_v30 = vadd.f32 1e-05, %v4306_v58 }
0x28e8   :  { %5677 = vrsqrt.f32 %v4308_v30 }
0x28f1   :  { %v5676_v29 = vpop.eup %5675 }
0x28f2   :  { %v4311_v11 = vmul.f32 %v5676_v29, %v4295_v61 }
0x28f4   :  { %v4319_v15 = vmul.f32 %v4762_v12, %v4311_v11 }
0x28f5   :  { %v5678_v13 = vpop.eup %5677 }
0x28f6   :  { %v4312_v14 = vmul.f32 %v5678_v13, %v4296_v41  ;;  %v4327_v19 = vadd.f32 %v4763_v16, %v4319_v15 }
0x28f8   :  { %v4320_v17 = vmul.f32 %v4762_v12, %v4312_v14 }
0x28fa   :  { %v4328_v33 = vadd.f32 %v4763_v16, %v4320_v17 }
0x28fc   :  { %v4330_v22 = vpack.c.bf16 %v4328_v33, %v4327_v19 }
0x28fe   :  { %5304 = vmatpush3.bf16.msra.mxu1 %v4330_v22 }
0x28ff   :  { %5309 = vmatprep.subr.bf16.mxu1 %v5798_v1 }
0x2901   :  { %5306 = vmatmul.mubr.msk.bf16.vlgmr.msra.gmra.mxu1 %vm363_vm6, %v4329_v23 }
0x2902   :  { %5310 = vmatpush3.bf16.msra.mxu1 %v5515_v46  ;;  %5317 = vmatprep.mubr.msk.bf16.mxu1 %vm5799_vm1, %v5798_v1 }
0x2903   :  { %5311 = vmatprep.subr.bf16.mxu1 %v5798_v1 }
0x2906   :  { %5312 = vmatpush3.bf16.msra.mxu1 %v5516_v25 }
0x2907   :  { %5313 = vmatprep.subr.bf16.mxu1 %v5798_v1 }
0x290a   :  { %5314 = vmatpush3.bf16.msra.mxu1 %v5517_v27 }
0x290b   :  { %5315 = vmatprep.subr.bf16.mxu1 %v5798_v1 }
0x290e   :  { %5316 = vmatpush3.bf16.msra.mxu1 %v5518_v28 }
0x29c1   :  { %v4368_v31 = vpop.f32.mrf.mxu1 }
0x29c2   :  { %v4374_v32 = vpack.c.bf16 %v4368_v31, %v4368_v31 }
0x29c3   :  { %v5307_v34 = vpop.f32.mrf.mxu1 }
0x29c4   :  { %5318 = vmatmul.mubr.msk.bf16.vlgmr.msra.gmra.mxu1 %vm273_vm5, %v4374_v32 }
0x29c5   :  { %v4371_v62 = vpop.f32.mrf.mxu1 }
0x29c7   :  { %v5308_v5 = vpop.f32.mrf.mxu1 }
0x2a84   :  { %v4451_v35 = vpop.f32.mrf.mxu1 }
0x2a85   :  { %v4452_v1 = vadd.f32 %v4765_v44, %v4451_v35 }
0x2a86   :  { %v5319_v36 = vpop.f32.mrf.mxu1 }
0x2a87   :  { %4457 = vst [vmem:[#allocation10] sm:$0x3] %v4452_v1 }
0x2a88   :  { %v4454_v6 = vpop.f32.mrf.mxu1 }
0x2a89   :  { %5772 = shalt.err (!%p5769_p10)
}
0x2a8a   :  { %4467 = dma.vmem_to_hbm [thread:$0]  %s4465_s0, 32, %s6814_s18, [#allocation4]   ;;  %v5320_v37 = vpop.f32.mrf.mxu1 }
0x2a8b   :  { %5787 = dma.done.wait [#allocation4], 32  }
0x2a8c   :  { %5788 = vsyncadd [#allocation4], 4294967264 }
0x2a8d   :  { %4471 = vsyncpa [#allocation3], 1 }
0x2a8e   :  { %4472 = vsyncpa [#allocation6], 1 }
0x2a8f   :  { %4473 = vsyncpa [#allocation9], 1 }
0x2a90   :  { %4474 = vsyncpa [#allocation4], 1 }

</bundles_post_ra>
